<compile_context>
chip_gen: v7x
topology: tpu7x:2x2x1
jax: 0.10.0
libtpu: 0.0.40
codegen_flags: <defaults>
</compile_context>

<pallas_src>
import functools

import jax
import jax.numpy as jnp
from jax.experimental import pallas as pl
from jax.experimental.pallas import tpu as pltpu

_LN_EPS = 1e-5  # matches torch.nn.LayerNorm default


# ----------------------------------------------------------------------------
# helpers
# ----------------------------------------------------------------------------
def _bcast_spec(shape):
    """BlockSpec for an operand that is broadcast (same block) to every grid step."""
    nd = len(shape)
    return pl.BlockSpec(shape, lambda *_: (0,) * nd)


def _layer_norm(v, g, b, eps):
    mu = jnp.mean(v, axis=-1, keepdims=True)
    vc = v - mu
    var = jnp.mean(vc * vc, axis=-1, keepdims=True)
    return vc * jax.lax.rsqrt(var + eps) * g + b


# ----------------------------------------------------------------------------
# Pallas kernels
# ----------------------------------------------------------------------------
def _embed_kernel(tok_ref, w_ref, b_ref, pos_ref, type_ref, o_ref):
    # tok: [N, Pdim] for one batch element; fused: patch-embed matmul + pos + type.
    t = tok_ref[0]
    y = jnp.dot(t, w_ref[...], preferred_element_type=jnp.float32) + b_ref[...]
    o_ref[0] = y + pos_ref[...] + type_ref[0]


def _block_kernel(x_ref, ln1_g_ref, ln1_b_ref,
                  qw_ref, qb_ref, kw_ref, kb_ref, vw_ref, vb_ref,
                  pw_ref, pb_ref, ln2_g_ref, ln2_b_ref,
                  fc1_w_ref, fc1_b_ref, fc2_w_ref, fc2_b_ref,
                  o_ref, *, num_heads, scale, eps):
    """One full transformer block for one batch element, entirely in VMEM."""
    x = x_ref[0]                                                # [S, D]
    S, D = x.shape

    h = _layer_norm(x, ln1_g_ref[...], ln1_b_ref[...], eps)

    # Multi-head self-attention: per-head weight slabs [H, D, dh] so no in-kernel
    # reshapes / transposes / lane slicing are needed.  Python loop is unrolled.
    attn = jnp.zeros((S, D), jnp.float32)
    for hd in range(num_heads):
        q = jnp.dot(h, qw_ref[hd], preferred_element_type=jnp.float32) + qb_ref[hd]
        k = jnp.dot(h, kw_ref[hd], preferred_element_type=jnp.float32) + kb_ref[hd]
        v = jnp.dot(h, vw_ref[hd], preferred_element_type=jnp.float32) + vb_ref[hd]
        s = jax.lax.dot_general(q, k, (((1,), (1,)), ((), ())),
                                preferred_element_type=jnp.float32) * scale
        m = jnp.max(s, axis=-1, keepdims=True)
        p = jnp.exp(s - m)
        p = p * pl.reciprocal(jnp.sum(p, axis=-1, keepdims=True), approx=True)
        o_h = jnp.dot(p, v, preferred_element_type=jnp.float32)          # [S, dh]
        attn = attn + jnp.dot(o_h, pw_ref[hd], preferred_element_type=jnp.float32)

    x2 = x + attn + pb_ref[...]

    h2 = _layer_norm(x2, ln2_g_ref[...], ln2_b_ref[...], eps)
    # TODO(synk): torch.nn.GELU default is the exact erf form; tanh approximation
    # is used for a robust Mosaic lowering.
    f = jnp.dot(h2, fc1_w_ref[...], preferred_element_type=jnp.float32) + fc1_b_ref[...]
    f = jax.nn.gelu(f, approximate=True)
    f = jnp.dot(f, fc2_w_ref[...], preferred_element_type=jnp.float32) + fc2_b_ref[...]

    o_ref[0] = x2 + f


def _enc_tail_kernel(x_ref, g_ref, b_ref, dw_ref, db_ref, cw_ref, cb_ref,
                     y_ref, z_ref, *, eps):
    # fused: encoder LayerNorm -> (decoder embed) and (mean-pool -> contrast proj)
    x = x_ref[0]                                                # [Lk, D]
    xn = _layer_norm(x, g_ref[...], b_ref[...], eps)
    y_ref[0] = jnp.dot(xn, dw_ref[...], preferred_element_type=jnp.float32) + db_ref[...]
    # mean over tokens via a tiny matmul (bulletproof cross-sublane reduction)
    lk = xn.shape[0]
    ones_row = jnp.full((1, lk), 1.0 / lk, jnp.float32)
    zm = jnp.dot(ones_row, xn, preferred_element_type=jnp.float32)        # [1, D]
    z_ref[0] = jnp.dot(zm, cw_ref[...], preferred_element_type=jnp.float32) + cb_ref[...]


def _dec_tail_kernel(y_ref, g_ref, b_ref, pw_ref, pb_ref, tgt_ref, mrow_ref,
                     pred_ref, num_ref, *, eps):
    # fused: decoder LayerNorm -> prediction head -> masked-MSE numerator.
    y = y_ref[...]                                              # [M, Dd]
    yn = _layer_norm(y, g_ref[...], b_ref[...], eps)
    pred = jnp.dot(yn, pw_ref[...], preferred_element_type=jnp.float32) + pb_ref[...]
    pred_ref[...] = pred
    d = pred - tgt_ref[...]
    dd = d * d                                                  # [M, Pdim]
    # sum_m mask[m] * mean_p dd[m, p]  ==  sum(mask_row @ dd) / Pdim  (lane-dense mask)
    num = jnp.sum(jnp.dot(mrow_ref[...], dd, preferred_element_type=jnp.float32))
    num_ref[...] = (num / dd.shape[1]) * jnp.ones((1, 1), jnp.float32)


def _contrast_kernel(z_ref, cm_ref, o_ref, *, temp):
    z = z_ref[...]
    zn = z * jax.lax.rsqrt(jnp.sum(z * z, axis=-1, keepdims=True) + 1e-6)
    sim = jax.lax.dot_general(zn, zn, (((1,), (1,)), ((), ())),
                              preferred_element_type=jnp.float32) * (1.0 / temp)
    m = jnp.max(sim, axis=-1, keepdims=True)
    lse = jnp.log(jnp.sum(jnp.exp(sim - m), axis=-1, keepdims=True)) + m
    logp = sim - lse
    cm = cm_ref[...]
    p = cm / jnp.sum(cm, axis=-1, keepdims=True)
    loss = -jnp.sum(p * logp) / cm.shape[0]
    o_ref[...] = loss * jnp.ones((1, 1), jnp.float32)


# ----------------------------------------------------------------------------
# Pallas wrappers
# ----------------------------------------------------------------------------
def pallas_patch_embed(tokens, w, b, pos, type_vec):
    B, N, Pdim = tokens.shape
    D = w.shape[1]
    return pl.pallas_call(
        _embed_kernel,
        out_shape=jax.ShapeDtypeStruct((B, N, D), jnp.float32),
        grid=(B,),
        in_specs=[
            pl.BlockSpec((1, N, Pdim), lambda bb: (bb, 0, 0)),
            _bcast_spec((Pdim, D)),
            _bcast_spec((1, D)),
            _bcast_spec((N, D)),
            pl.BlockSpec((1, 1, D), lambda bb: (bb, 0, 0)),
        ],
        out_specs=pl.BlockSpec((1, N, D), lambda bb: (bb, 0, 0)),
        compiler_params=pltpu.CompilerParams(dimension_semantics=("parallel",)),
    )(tokens, w, b.reshape(1, D), pos, type_vec)


def fused_transformer_block(x, prm, num_heads):
    """One pallas_call per transformer block; grid over batch ("parallel")."""
    B, S, D = x.shape
    dh = D // num_heads
    Hd = prm["fc1_w"].shape[1]
    scale = 1.0 / float(dh) ** 0.5

    # Head-split weight slabs (constant-folded under jit).
    def split_w(w):                                  # [D, D] -> [H, D, dh]
        return w.reshape(D, num_heads, dh).transpose(1, 0, 2)

    def split_b(b):                                  # [D] -> [H, 1, dh]
        return b.reshape(num_heads, 1, dh)

    qkv_w, qkv_b = prm["qkv_w"], prm["qkv_b"]
    qw, kw, vw = (split_w(qkv_w[:, :D]), split_w(qkv_w[:, D:2 * D]),
                  split_w(qkv_w[:, 2 * D:]))
    qb, kb, vb = (split_b(qkv_b[:D]), split_b(qkv_b[D:2 * D]), split_b(qkv_b[2 * D:]))
    pw = prm["proj_w"].reshape(num_heads, dh, D)

    row = lambda a: a.reshape(1, -1)

    in_specs = [
        pl.BlockSpec((1, S, D), lambda bb: (bb, 0, 0)),          # x
        _bcast_spec((1, D)), _bcast_spec((1, D)),                # ln1 g, b
        _bcast_spec((num_heads, D, dh)), _bcast_spec((num_heads, 1, dh)),   # q
        _bcast_spec((num_heads, D, dh)), _bcast_spec((num_heads, 1, dh)),   # k
        _bcast_spec((num_heads, D, dh)), _bcast_spec((num_heads, 1, dh)),   # v
        _bcast_spec((num_heads, dh, D)), _bcast_spec((1, D)),    # proj w, b
        _bcast_spec((1, D)), _bcast_spec((1, D)),                # ln2 g, b
        _bcast_spec((D, Hd)), _bcast_spec((1, Hd)),              # fc1
        _bcast_spec((Hd, D)), _bcast_spec((1, D)),               # fc2
    ]

    return pl.pallas_call(
        functools.partial(_block_kernel, num_heads=num_heads, scale=scale, eps=_LN_EPS),
        out_shape=jax.ShapeDtypeStruct((B, S, D), jnp.float32),
        grid=(B,),
        in_specs=in_specs,
        out_specs=pl.BlockSpec((1, S, D), lambda bb: (bb, 0, 0)),
        compiler_params=pltpu.CompilerParams(dimension_semantics=("parallel",)),
    )(x, row(prm["ln1_g"]), row(prm["ln1_b"]),
      qw, qb, kw, kb, vw, vb, pw, row(prm["proj_b"]),
      row(prm["ln2_g"]), row(prm["ln2_b"]),
      prm["fc1_w"], row(prm["fc1_b"]), prm["fc2_w"], row(prm["fc2_b"]))


def pallas_encoder_tail(x_vis, g, b, dec_w, dec_b, cw, cb):
    B, Lk, D = x_vis.shape
    Dd = dec_w.shape[1]
    Dz = cw.shape[1]
    y, z = pl.pallas_call(
        functools.partial(_enc_tail_kernel, eps=_LN_EPS),
        out_shape=(jax.ShapeDtypeStruct((B, Lk, Dd), jnp.float32),
                   jax.ShapeDtypeStruct((B, 1, Dz), jnp.float32)),
        grid=(B,),
        in_specs=[
            pl.BlockSpec((1, Lk, D), lambda bb: (bb, 0, 0)),
            _bcast_spec((1, D)), _bcast_spec((1, D)),
            _bcast_spec((D, Dd)), _bcast_spec((1, Dd)),
            _bcast_spec((D, Dz)), _bcast_spec((1, Dz)),
        ],
        out_specs=(pl.BlockSpec((1, Lk, Dd), lambda bb: (bb, 0, 0)),
                   pl.BlockSpec((1, 1, Dz), lambda bb: (bb, 0, 0))),
        compiler_params=pltpu.CompilerParams(dimension_semantics=("parallel",)),
    )(x_vis, g.reshape(1, D), b.reshape(1, D),
      dec_w, dec_b.reshape(1, Dd), cw, cb.reshape(1, Dz))
    return y, z[:, 0, :]


def pallas_decoder_tail(y2d, g, b, pw, pb, tgt2d, mask_row):
    M, Dd = y2d.shape
    Pdim = pw.shape[1]
    pred, num = pl.pallas_call(
        functools.partial(_dec_tail_kernel, eps=_LN_EPS),
        out_shape=(jax.ShapeDtypeStruct((M, Pdim), jnp.float32),
                   jax.ShapeDtypeStruct((1, 1), jnp.float32)),
        grid=(1,),
        in_specs=[
            _bcast_spec((M, Dd)),
            _bcast_spec((1, Dd)), _bcast_spec((1, Dd)),
            _bcast_spec((Dd, Pdim)), _bcast_spec((1, Pdim)),
            _bcast_spec((M, Pdim)),
            _bcast_spec((1, M)),
        ],
        out_specs=(_bcast_spec((M, Pdim)), _bcast_spec((1, 1))),
    )(y2d, g.reshape(1, Dd), b.reshape(1, Dd), pw, pb.reshape(1, Pdim), tgt2d, mask_row)
    return pred, num


def pallas_contrast_loss(z, contrast_matrix, temp=0.07):
    B, D = z.shape
    return pl.pallas_call(
        functools.partial(_contrast_kernel, temp=temp),
        out_shape=jax.ShapeDtypeStruct((1, 1), jnp.float32),
        grid=(1,),
        in_specs=[_bcast_spec((B, D)), _bcast_spec((B, B))],
        out_specs=_bcast_spec((1, 1)),
    )(z, contrast_matrix)[0, 0]


# ----------------------------------------------------------------------------
# Glue: patchify + parameter init
# ----------------------------------------------------------------------------
def patchify(imgs, p):
    # imgs: NCHW [B, C, H, W] -> tokens [B, (H/p)*(W/p), p*p*C]
    B, C, H, W = imgs.shape
    h, w = H // p, W // p
    x = imgs.reshape(B, C, h, p, w, p)
    x = x.transpose(0, 2, 4, 3, 5, 1)
    return x.reshape(B, h * w, p * p * C)


def _w(key, shape, scale=0.02):
    return scale * jax.random.normal(key, shape, jnp.float32)


def init_block_params(key, dim, mlp_hidden):
    ks = jax.random.split(key, 4)
    return {
        "ln1_g": jnp.ones((dim,), jnp.float32),
        "ln1_b": jnp.zeros((dim,), jnp.float32),
        "qkv_w": _w(ks[0], (dim, 3 * dim)),
        "qkv_b": jnp.zeros((3 * dim,), jnp.float32),
        "proj_w": _w(ks[1], (dim, dim)),
        "proj_b": jnp.zeros((dim,), jnp.float32),
        "ln2_g": jnp.ones((dim,), jnp.float32),
        "ln2_b": jnp.zeros((dim,), jnp.float32),
        "fc1_w": _w(ks[2], (dim, mlp_hidden)),
        "fc1_b": jnp.zeros((mlp_hidden,), jnp.float32),
        "fc2_w": _w(ks[3], (mlp_hidden, dim)),
        "fc2_b": jnp.zeros((dim,), jnp.float32),
    }


# ----------------------------------------------------------------------------
# Model / dataset / train-model (mirrors the PyTorch classes)
# ----------------------------------------------------------------------------
class MMaeVitPallas:
    def __init__(self, key, *, img_size=16, patch=4, in_chans=4, num_types=3,
                 enc_dim=32, dec_dim=32, num_heads=4, mlp_ratio=2, mask_ratio=0.5):
        self.patch = patch
        self.num_heads = num_heads
        self.mask_ratio = mask_ratio
        n_patches = (img_size // patch) ** 2
        patch_dim = in_chans * patch * patch
        self.n_patches = n_patches

        ks = jax.random.split(key, 12)
        self.params = {
            "patch_w": _w(ks[0], (patch_dim, enc_dim)),
            "patch_b": jnp.zeros((enc_dim,), jnp.float32),
            "pos_enc": _w(ks[1], (n_patches, enc_dim)),
            "type_enc": _w(ks[2], (num_types, enc_dim)),
            "enc_block": init_block_params(ks[3], enc_dim, mlp_ratio * enc_dim),
            "enc_norm_g": jnp.ones((enc_dim,), jnp.float32),
            "enc_norm_b": jnp.zeros((enc_dim,), jnp.float32),
            "contrast_w": _w(ks[4], (enc_dim, enc_dim)),
            "contrast_b": jnp.zeros((enc_dim,), jnp.float32),
            "dec_embed_w": _w(ks[5], (enc_dim, dec_dim)),
            "dec_embed_b": jnp.zeros((dec_dim,), jnp.float32),
            "mask_token": _w(ks[6], (1, 1, dec_dim)),
            "pos_dec": _w(ks[7], (n_patches, dec_dim)),
            "type_dec": _w(ks[8], (num_types, dec_dim)),
            "dec_block": init_block_params(ks[9], dec_dim, mlp_ratio * dec_dim),
            "dec_norm_g": jnp.ones((dec_dim,), jnp.float32),
            "dec_norm_b": jnp.zeros((dec_dim,), jnp.float32),
            "pred_w": _w(ks[10], (dec_dim, patch_dim)),
            "pred_b": jnp.zeros((patch_dim,), jnp.float32),
        }
        # TODO(synk): thread a fresh PRNG key per training step; a fixed key keeps
        # this smoke test deterministic.
        self._mask_key = ks[11]

        self._fwd_plain = jax.jit(self._forward_impl)
        self._fwd_contrast = jax.jit(self._forward_contrast_impl)

    def _random_masking(self, x):
        B, N, D = x.shape
        len_keep = int(N * (1.0 - self.mask_ratio))
        noise = jax.random.uniform(self._mask_key, (B, N))
        ids_shuffle = jnp.argsort(noise, axis=1)
        ids_restore = jnp.argsort(ids_shuffle, axis=1)
        ids_keep = ids_shuffle[:, :len_keep]
        x_vis = jnp.take_along_axis(x, ids_keep[:, :, None], axis=1)
        mask = jnp.ones((B, N), jnp.float32).at[:, :len_keep].set(0.0)
        mask = jnp.take_along_axis(mask, ids_restore, axis=1)
        return x_vis, mask, ids_restore, len_keep

    def _forward_core(self, source_types, source_images, target_types, target_images):
        p = self.params
        B = source_images.shape[0]
        tokens_src = patchify(source_images, self.patch)           # [B, N, Pdim]
        tokens_tgt = patchify(target_images, self.patch)
        _, N, Pdim = tokens_src.shape
        D = p["patch_w"].shape[1]
        Dd = p["dec_embed_w"].shape[1]

        # encoder: patch embed + pos + modality type embedding (one fused kernel)
        type_src = p["type_enc"][source_types][:, None, :]          # [B, 1, D]
        x = pallas_patch_embed(tokens_src, p["patch_w"], p["patch_b"],
                               p["pos_enc"], type_src)
        x_vis, mask, ids_restore, len_keep = self._random_masking(x)

        x_vis = fused_transformer_block(x_vis, p["enc_block"], self.num_heads)

        # encoder tail: enc-norm + decoder embed + contrastive feature (one kernel)
        y, z = pallas_encoder_tail(x_vis, p["enc_norm_g"], p["enc_norm_b"],
                                   p["dec_embed_w"], p["dec_embed_b"],
                                   p["contrast_w"], p["contrast_b"])

        # decoder token assembly (gathers stay in plain JAX)
        mask_tokens = jnp.broadcast_to(p["mask_token"], (B, N - len_keep, Dd))
        y_full = jnp.concatenate([y, mask_tokens], axis=1)
        y_full = jnp.take_along_axis(y_full, ids_restore[:, :, None], axis=1)
        y_full = y_full + p["pos_dec"][None] + p["type_dec"][target_types][:, None, :]

        y_full = fused_transformer_block(y_full, p["dec_block"], self.num_heads)

        # decoder tail: dec-norm + prediction head + masked-MSE numerator (one kernel)
        pred2d, num = pallas_decoder_tail(y_full.reshape(B * N, Dd),
                                          p["dec_norm_g"], p["dec_norm_b"],
                                          p["pred_w"], p["pred_b"],
                                          tokens_tgt.reshape(B * N, Pdim),
                                          mask.reshape(1, B * N))
        pred = pred2d.reshape(B, N, Pdim)
        recon = num[0, 0] / jnp.sum(mask)          # MAE convention: masked patches only
        return pred, recon, mask, z

    def _forward_impl(self, source_types, source_images, target_types, target_images):
        pred, recon, mask, _ = self._forward_core(
            source_types, source_images, target_types, target_images)
        return pred, recon, mask

    def _forward_contrast_impl(self, source_types, source_images, target_types,
                               target_images, contrast_matrix):
        pred, recon, mask, z = self._forward_core(
            source_types, source_images, target_types, target_images)
        contrast = pallas_contrast_loss(z, contrast_matrix)
        return pred, recon, mask, contrast

    def forward(self, source_types, source_images, target_types, target_images):
        return self._fwd_plain(source_types, source_images, target_types, target_images)

    def forward_contrast_loss(self, source_types, source_images, target_types,
                              target_images, contrast_matrix):
        return self._fwd_contrast(source_types, source_images, target_types,
                                  target_images, contrast_matrix)


class MmaeDatasetCompatPallas:
    def __init__(self, key, *, num_samples=8, num_types=3, in_chans=4, img_size=16):
        self.num_types = num_types
        self.images = jax.random.normal(
            key, (num_samples, num_types, in_chans, img_size, img_size), jnp.float32)

    def _batch_get(self, ids):
        source_types = ids % self.num_types
        target_types = (ids + 1) % self.num_types
        source_images = self.images[ids, source_types]
        target_images = self.images[ids, target_types]
        contrast_matrix = (ids[:, None] == ids[None, :]).astype(jnp.float32)
        return source_types, source_images, target_types, target_images, contrast_matrix

    def batch_get_train_device(self, device, ids):
        return self._batch_get(ids)

    def batch_get_valid_device(self, device, ids):
        return self._batch_get(ids)


global_last_result = (None, None, None)


class MmaeTrainModelPallas:
    def __init__(self, model, dataset, use_contrast_loss=True):
        self.model = model
        self.dataset = dataset
        self.use_contrast_loss = use_contrast_loss

    def forward(self, device, ids, is_train=True):
        (source_types, source_images, target_types, target_images, contrast_matrix) = (
            self.dataset.batch_get_train_device(device, ids)
            if is_train else self.dataset.batch_get_valid_device(device, ids))
        if self.use_contrast_loss:
            pred, reconstruction_loss, _mask, contrast_loss = self.model.forward_contrast_loss(
                source_types, source_images, target_types, target_images, contrast_matrix)
            loss = reconstruction_loss + contrast_loss
        else:
            pred, loss, _mask = self.model.forward(
                source_types, source_images, target_types, target_images)
        if device == 0:
            global global_last_result
            global_last_result = (source_images[0], target_images[0], pred[0])
        return (loss,)


# ----------------------------------------------------------------------------
if __name__ == "__main__":
    key = jax.random.PRNGKey(0)
    k_data, k_model = jax.random.split(key)

    dataset = MmaeDatasetCompatPallas(k_data, num_samples=8, num_types=3,
                                      in_chans=4, img_size=16)
    model = MMaeVitPallas(k_model, img_size=16, patch=4, in_chans=4, num_types=3,
                          enc_dim=32, dec_dim=32, num_heads=4, mlp_ratio=2,
                          mask_ratio=0.5)
    train_model = MmaeTrainModelPallas(model, dataset, use_contrast_loss=True)

    ids = jnp.arange(2, dtype=jnp.int32)          # batch = 2
    (loss,) = train_model.forward(0, ids, is_train=True)
    loss = jax.block_until_ready(loss)
    assert jnp.isfinite(loss)
    print("KERNEL_OK")
</pallas_src>

<mosaic_0001>
module attributes {stable_mosaic.version = 11 : i64} {
  func.func @_embed_kernel(%arg0: i32, %arg1: memref<1x16x64xf32, #tpu.memory_space<vmem>>, %arg2: memref<64x32xf32, #tpu.memory_space<vmem>>, %arg3: memref<1x32xf32, #tpu.memory_space<vmem>>, %arg4: memref<16x32xf32, #tpu.memory_space<vmem>>, %arg5: memref<1x1x32xf32, #tpu.memory_space<vmem>>, %arg6: memref<1x16x32xf32, #tpu.memory_space<vmem>>) attributes {dimension_semantics = [#tpu.dimension_semantics<parallel>], iteration_bounds = array<i64: 2>, scalar_prefetch = 0 : i64, scratch_operands = 0 : i64, tpu.core_type = #tpu.core_type<tc>, window_params = [{transform_indices = @transform_0, window_bounds = array<i64: 1, 16, 64>}, {pipeline_mode = #tpu.pipeline_mode<synchronous>, transform_indices = @transform_1, window_bounds = array<i64: 64, 32>}, {pipeline_mode = #tpu.pipeline_mode<synchronous>, transform_indices = @transform_2, window_bounds = array<i64: 1, 32>}, {pipeline_mode = #tpu.pipeline_mode<synchronous>, transform_indices = @transform_3, window_bounds = array<i64: 16, 32>}, {transform_indices = @transform_4, window_bounds = array<i64: 1, 1, 32>}, {transform_indices = @transform_5, window_bounds = array<i64: 1, 16, 32>}]} {
    %c0 = arith.constant 0 : index
    %c0_0 = arith.constant 0 : index
    %c0_1 = arith.constant 0 : index
    %0 = vector.load %arg1[%c0, %c0_0, %c0_1] : memref<1x16x64xf32, #tpu.memory_space<vmem>>, vector<1x16x64xf32>
    %1 = vector.shape_cast %0 : vector<1x16x64xf32> to vector<16x64xf32>
    %c0_2 = arith.constant 0 : index
    %c0_3 = arith.constant 0 : index
    %2 = vector.load %arg2[%c0_2, %c0_3] : memref<64x32xf32, #tpu.memory_space<vmem>>, vector<64x32xf32>
    %cst = arith.constant dense<0.000000e+00> : vector<16x32xf32>
    %3 = tpu.matmul %1, %2, %cst {dimension_numbers = #tpu.dot_dimension_numbers<[1], [0], [0], [1], [0, 0, 1, 1], [], []>} : vector<16x64xf32>, vector<64x32xf32>, vector<16x32xf32> -> vector<16x32xf32>
    %c0_4 = arith.constant 0 : index
    %c0_5 = arith.constant 0 : index
    %4 = vector.load %arg3[%c0_4, %c0_5] : memref<1x32xf32, #tpu.memory_space<vmem>>, vector<1x32xf32>
    %5 = vector.broadcast %4 : vector<1x32xf32> to vector<16x32xf32>
    %6 = arith.addf %3, %5 : vector<16x32xf32>
    %c0_6 = arith.constant 0 : index
    %c0_7 = arith.constant 0 : index
    %7 = vector.load %arg4[%c0_6, %c0_7] : memref<16x32xf32, #tpu.memory_space<vmem>>, vector<16x32xf32>
    %8 = arith.addf %6, %7 : vector<16x32xf32>
    %c0_8 = arith.constant 0 : index
    %c0_9 = arith.constant 0 : index
    %c0_10 = arith.constant 0 : index
    %9 = vector.load %arg5[%c0_8, %c0_9, %c0_10] : memref<1x1x32xf32, #tpu.memory_space<vmem>>, vector<1x1x32xf32>
    %10 = vector.shape_cast %9 : vector<1x1x32xf32> to vector<1x32xf32>
    %11 = vector.broadcast %10 : vector<1x32xf32> to vector<16x32xf32>
    %12 = arith.addf %8, %11 : vector<16x32xf32>
    %c0_11 = arith.constant 0 : index
    %c0_12 = arith.constant 0 : index
    %c0_13 = arith.constant 0 : index
    %13 = vector.load %arg6[%c0_11, %c0_12, %c0_13] : memref<1x16x32xf32, #tpu.memory_space<vmem>>, vector<1x16x32xf32>
    %14 = vector.shape_cast %13 : vector<1x16x32xf32> to vector<16x32xf32>
    %15 = vector.shape_cast %12 : vector<16x32xf32> to vector<1x16x32xf32>
    tpu.vector_store %arg6[%c0_11, %c0_12, %c0_13], %15 {strides = array<i32>} : memref<1x16x32xf32, #tpu.memory_space<vmem>>, vector<1x16x32xf32>,
    return
  }
  func.func @transform_0(%arg0: i32) -> (i32, i32, i32) {
    %c0_i32 = arith.constant 0 : i32
    %c0_i32_0 = arith.constant 0 : i32
    %c0_i32_1 = arith.constant 0 : i32
    return %arg0, %c0_i32, %c0_i32_0 : i32, i32, i32
  }
  func.func @transform_1(%arg0: i32) -> (i32, i32) {
    %c0_i32 = arith.constant 0 : i32
    %c0_i32_0 = arith.constant 0 : i32
    %c0_i32_1 = arith.constant 0 : i32
    return %c0_i32, %c0_i32_0 : i32, i32
  }
  func.func @transform_2(%arg0: i32) -> (i32, i32) {
    %c0_i32 = arith.constant 0 : i32
    %c0_i32_0 = arith.constant 0 : i32
    %c0_i32_1 = arith.constant 0 : i32
    return %c0_i32, %c0_i32_0 : i32, i32
  }
  func.func @transform_3(%arg0: i32) -> (i32, i32) {
    %c0_i32 = arith.constant 0 : i32
    %c0_i32_0 = arith.constant 0 : i32
    %c0_i32_1 = arith.constant 0 : i32
    return %c0_i32, %c0_i32_0 : i32, i32
  }
  func.func @transform_4(%arg0: i32) -> (i32, i32, i32) {
    %c0_i32 = arith.constant 0 : i32
    %c0_i32_0 = arith.constant 0 : i32
    %c0_i32_1 = arith.constant 0 : i32
    return %arg0, %c0_i32, %c0_i32_0 : i32, i32, i32
  }
  func.func @transform_5(%arg0: i32) -> (i32, i32, i32) {
    %c0_i32 = arith.constant 0 : i32
    %c0_i32_0 = arith.constant 0 : i32
    %c0_i32_1 = arith.constant 0 : i32
    return %arg0, %c0_i32, %c0_i32_0 : i32, i32, i32
  }
}

module attributes {stable_mosaic.version = 11 : i64} {
  func.func @_block_kernel(%arg0: i32, %arg1: memref<1x8x32xf32, #tpu.memory_space<vmem>>, %arg2: memref<1x32xf32, #tpu.memory_space<vmem>>, %arg3: memref<1x32xf32, #tpu.memory_space<vmem>>, %arg4: memref<4x32x8xf32, #tpu.memory_space<vmem>>, %arg5: memref<4x1x8xf32, #tpu.memory_space<vmem>>, %arg6: memref<4x32x8xf32, #tpu.memory_space<vmem>>, %arg7: memref<4x1x8xf32, #tpu.memory_space<vmem>>, %arg8: memref<4x32x8xf32, #tpu.memory_space<vmem>>, %arg9: memref<4x1x8xf32, #tpu.memory_space<vmem>>, %arg10: memref<4x8x32xf32, #tpu.memory_space<vmem>>, %arg11: memref<1x32xf32, #tpu.memory_space<vmem>>, %arg12: memref<1x32xf32, #tpu.memory_space<vmem>>, %arg13: memref<1x32xf32, #tpu.memory_space<vmem>>, %arg14: memref<32x64xf32, #tpu.memory_space<vmem>>, %arg15: memref<1x64xf32, #tpu.memory_space<vmem>>, %arg16: memref<64x32xf32, #tpu.memory_space<vmem>>, %arg17: memref<1x32xf32, #tpu.memory_space<vmem>>, %arg18: memref<1x8x32xf32, #tpu.memory_space<vmem>>) attributes {dimension_semantics = [#tpu.dimension_semantics<parallel>], iteration_bounds = array<i64: 2>, scalar_prefetch = 0 : i64, scratch_operands = 0 : i64, tpu.core_type = #tpu.core_type<tc>, window_params = [{transform_indices = @transform_0, window_bounds = array<i64: 1, 8, 32>}, {pipeline_mode = #tpu.pipeline_mode<synchronous>, transform_indices = @transform_1, window_bounds = array<i64: 1, 32>}, {pipeline_mode = #tpu.pipeline_mode<synchronous>, transform_indices = @transform_2, window_bounds = array<i64: 1, 32>}, {pipeline_mode = #tpu.pipeline_mode<synchronous>, transform_indices = @transform_3, window_bounds = array<i64: 4, 32, 8>}, {pipeline_mode = #tpu.pipeline_mode<synchronous>, transform_indices = @transform_4, window_bounds = array<i64: 4, 1, 8>}, {pipeline_mode = #tpu.pipeline_mode<synchronous>, transform_indices = @transform_5, window_bounds = array<i64: 4, 32, 8>}, {pipeline_mode = #tpu.pipeline_mode<synchronous>, transform_indices = @transform_6, window_bounds = array<i64: 4, 1, 8>}, {pipeline_mode = #tpu.pipeline_mode<synchronous>, transform_indices = @transform_7, window_bounds = array<i64: 4, 32, 8>}, {pipeline_mode = #tpu.pipeline_mode<synchronous>, transform_indices = @transform_8, window_bounds = array<i64: 4, 1, 8>}, {pipeline_mode = #tpu.pipeline_mode<synchronous>, transform_indices = @transform_9, window_bounds = array<i64: 4, 8, 32>}, {pipeline_mode = #tpu.pipeline_mode<synchronous>, transform_indices = @transform_10, window_bounds = array<i64: 1, 32>}, {pipeline_mode = #tpu.pipeline_mode<synchronous>, transform_indices = @transform_11, window_bounds = array<i64: 1, 32>}, {pipeline_mode = #tpu.pipeline_mode<synchronous>, transform_indices = @transform_12, window_bounds = array<i64: 1, 32>}, {pipeline_mode = #tpu.pipeline_mode<synchronous>, transform_indices = @transform_13, window_bounds = array<i64: 32, 64>}, {pipeline_mode = #tpu.pipeline_mode<synchronous>, transform_indices = @transform_14, window_bounds = array<i64: 1, 64>}, {pipeline_mode = #tpu.pipeline_mode<synchronous>, transform_indices = @transform_15, window_bounds = array<i64: 64, 32>}, {pipeline_mode = #tpu.pipeline_mode<synchronous>, transform_indices = @transform_16, window_bounds = array<i64: 1, 32>}, {transform_indices = @transform_17, window_bounds = array<i64: 1, 8, 32>}]} {
    %c0 = arith.constant 0 : index
    %c0_0 = arith.constant 0 : index
    %c0_1 = arith.constant 0 : index
    %0 = vector.load %arg1[%c0, %c0_0, %c0_1] : memref<1x8x32xf32, #tpu.memory_space<vmem>>, vector<1x8x32xf32>
    %1 = vector.shape_cast %0 : vector<1x8x32xf32> to vector<8x32xf32>
    %c0_2 = arith.constant 0 : index
    %c0_3 = arith.constant 0 : index
    %2 = vector.load %arg2[%c0_2, %c0_3] : memref<1x32xf32, #tpu.memory_space<vmem>>, vector<1x32xf32>
    %c0_4 = arith.constant 0 : index
    %c0_5 = arith.constant 0 : index
    %3 = vector.load %arg3[%c0_4, %c0_5] : memref<1x32xf32, #tpu.memory_space<vmem>>, vector<1x32xf32>
    %cst = arith.constant dense<0.000000e+00> : vector<8xf32>
    %4 = vector.multi_reduction <add>, %1, %cst [1] : vector<8x32xf32> to vector<8xf32>
    %5 = vector.shape_cast %4 : vector<8xf32> to vector<8x1xf32>
    %cst_6 = arith.constant 3.200000e+01 : f32
    %6 = vector.broadcast %cst_6 : f32 to vector<8x1xf32>
    %7 = arith.divf %5, %6 : vector<8x1xf32>
    %8 = vector.broadcast %7 : vector<8x1xf32> to vector<8x32xf32>
    %9 = arith.subf %1, %8 : vector<8x32xf32>
    %10 = arith.mulf %9, %9 : vector<8x32xf32>
    %cst_7 = arith.constant dense<0.000000e+00> : vector<8xf32>
    %11 = vector.multi_reduction <add>, %10, %cst_7 [1] : vector<8x32xf32> to vector<8xf32>
    %12 = vector.shape_cast %11 : vector<8xf32> to vector<8x1xf32>
    %cst_8 = arith.constant 3.200000e+01 : f32
    %13 = vector.broadcast %cst_8 : f32 to vector<8x1xf32>
    %14 = arith.divf %12, %13 : vector<8x1xf32>
    %cst_9 = arith.constant 9.99999974E-6 : f32
    %15 = vector.broadcast %cst_9 : f32 to vector<8x1xf32>
    %16 = arith.addf %14, %15 : vector<8x1xf32>
    %17 = math.rsqrt %16 : vector<8x1xf32>
    %18 = vector.broadcast %17 : vector<8x1xf32> to vector<8x32xf32>
    %19 = arith.mulf %9, %18 : vector<8x32xf32>
    %20 = vector.broadcast %2 : vector<1x32xf32> to vector<8x32xf32>
    %21 = arith.mulf %19, %20 : vector<8x32xf32>
    %22 = vector.broadcast %3 : vector<1x32xf32> to vector<8x32xf32>
    %23 = arith.addf %21, %22 : vector<8x32xf32>
    %cst_10 = arith.constant 0.000000e+00 : f32
    %24 = vector.broadcast %cst_10 : f32 to vector<8x32xf32>
    %c0_11 = arith.constant 0 : index
    %c0_12 = arith.constant 0 : index
    %c0_13 = arith.constant 0 : index
    %25 = vector.load %arg4[%c0_11, %c0_12, %c0_13] : memref<4x32x8xf32, #tpu.memory_space<vmem>>, vector<1x32x8xf32>
    %26 = vector.shape_cast %25 : vector<1x32x8xf32> to vector<32x8xf32>
    %cst_14 = arith.constant dense<0.000000e+00> : vector<8x8xf32>
    %27 = tpu.matmul %23, %26, %cst_14 {dimension_numbers = #tpu.dot_dimension_numbers<[1], [0], [0], [1], [0, 0, 1, 1], [], []>} : vector<8x32xf32>, vector<32x8xf32>, vector<8x8xf32> -> vector<8x8xf32>
    %c0_15 = arith.constant 0 : index
    %c0_16 = arith.constant 0 : index
    %c0_17 = arith.constant 0 : index
    %28 = vector.load %arg5[%c0_15, %c0_16, %c0_17] : memref<4x1x8xf32, #tpu.memory_space<vmem>>, vector<1x1x8xf32>
    %29 = vector.shape_cast %28 : vector<1x1x8xf32> to vector<1x8xf32>
    %30 = vector.broadcast %29 : vector<1x8xf32> to vector<8x8xf32>
    %31 = arith.addf %27, %30 : vector<8x8xf32>
    %c0_18 = arith.constant 0 : index
    %c0_19 = arith.constant 0 : index
    %c0_20 = arith.constant 0 : index
    %32 = vector.load %arg6[%c0_18, %c0_19, %c0_20] : memref<4x32x8xf32, #tpu.memory_space<vmem>>, vector<1x32x8xf32>
    %33 = vector.shape_cast %32 : vector<1x32x8xf32> to vector<32x8xf32>
    %cst_21 = arith.constant dense<0.000000e+00> : vector<8x8xf32>
    %34 = tpu.matmul %23, %33, %cst_21 {dimension_numbers = #tpu.dot_dimension_numbers<[1], [0], [0], [1], [0, 0, 1, 1], [], []>} : vector<8x32xf32>, vector<32x8xf32>, vector<8x8xf32> -> vector<8x8xf32>
    %c0_22 = arith.constant 0 : index
    %c0_23 = arith.constant 0 : index
    %c0_24 = arith.constant 0 : index
    %35 = vector.load %arg7[%c0_22, %c0_23, %c0_24] : memref<4x1x8xf32, #tpu.memory_space<vmem>>, vector<1x1x8xf32>
    %36 = vector.shape_cast %35 : vector<1x1x8xf32> to vector<1x8xf32>
    %37 = vector.broadcast %36 : vector<1x8xf32> to vector<8x8xf32>
    %38 = arith.addf %34, %37 : vector<8x8xf32>
    %c0_25 = arith.constant 0 : index
    %c0_26 = arith.constant 0 : index
    %c0_27 = arith.constant 0 : index
    %39 = vector.load %arg8[%c0_25, %c0_26, %c0_27] : memref<4x32x8xf32, #tpu.memory_space<vmem>>, vector<1x32x8xf32>
    %40 = vector.shape_cast %39 : vector<1x32x8xf32> to vector<32x8xf32>
    %cst_28 = arith.constant dense<0.000000e+00> : vector<8x8xf32>
    %41 = tpu.matmul %23, %40, %cst_28 {dimension_numbers = #tpu.dot_dimension_numbers<[1], [0], [0], [1], [0, 0, 1, 1], [], []>} : vector<8x32xf32>, vector<32x8xf32>, vector<8x8xf32> -> vector<8x8xf32>
    %c0_29 = arith.constant 0 : index
    %c0_30 = arith.constant 0 : index
    %c0_31 = arith.constant 0 : index
    %42 = vector.load %arg9[%c0_29, %c0_30, %c0_31] : memref<4x1x8xf32, #tpu.memory_space<vmem>>, vector<1x1x8xf32>
    %43 = vector.shape_cast %42 : vector<1x1x8xf32> to vector<1x8xf32>
    %44 = vector.broadcast %43 : vector<1x8xf32> to vector<8x8xf32>
    %45 = arith.addf %41, %44 : vector<8x8xf32>
    %cst_32 = arith.constant dense<0.000000e+00> : vector<8x8xf32>
    %46 = tpu.matmul %31, %38, %cst_32 {dimension_numbers = #tpu.dot_dimension_numbers<[1], [1], [0], [0], [0, 0, 1, 0], [], []>} : vector<8x8xf32>, vector<8x8xf32>, vector<8x8xf32> -> vector<8x8xf32>
    %cst_33 = arith.constant 0.353553385 : f32
    %47 = vector.broadcast %cst_33 : f32 to vector<8x8xf32>
    %48 = arith.mulf %46, %47 : vector<8x8xf32>
    %cst_34 = arith.constant dense<0xFF800000> : vector<8xf32>
    %49 = vector.multi_reduction <maximumf>, %48, %cst_34 [1] : vector<8x8xf32> to vector<8xf32>
    %50 = vector.shape_cast %49 : vector<8xf32> to vector<8x1xf32>
    %51 = vector.broadcast %50 : vector<8x1xf32> to vector<8x8xf32>
    %52 = arith.subf %48, %51 : vector<8x8xf32>
    %53 = math.exp %52 : vector<8x8xf32>
    %cst_35 = arith.constant dense<0.000000e+00> : vector<8xf32>
    %54 = vector.multi_reduction <add>, %53, %cst_35 [1] : vector<8x8xf32> to vector<8xf32>
    %55 = vector.shape_cast %54 : vector<8xf32> to vector<8x1xf32>
    %56 = tpu.reciprocal %55 {approx = true} : vector<8x1xf32> -> vector<8x1xf32>
    %57 = vector.broadcast %56 : vector<8x1xf32> to vector<8x8xf32>
    %58 = arith.mulf %53, %57 : vector<8x8xf32>
    %cst_36 = arith.constant dense<0.000000e+00> : vector<8x8xf32>
    %59 = tpu.matmul %58, %45, %cst_36 {dimension_numbers = #tpu.dot_dimension_numbers<[1], [0], [0], [1], [0, 0, 1, 1], [], []>} : vector<8x8xf32>, vector<8x8xf32>, vector<8x8xf32> -> vector<8x8xf32>
    %c0_37 = arith.constant 0 : index
    %c0_38 = arith.constant 0 : index
    %c0_39 = arith.constant 0 : index
    %60 = vector.load %arg10[%c0_37, %c0_38, %c0_39] : memref<4x8x32xf32, #tpu.memory_space<vmem>>, vector<1x8x32xf32>
    %61 = vector.shape_cast %60 : vector<1x8x32xf32> to vector<8x32xf32>
    %cst_40 = arith.constant dense<0.000000e+00> : vector<8x32xf32>
    %62 = tpu.matmul %59, %61, %cst_40 {dimension_numbers = #tpu.dot_dimension_numbers<[1], [0], [0], [1], [0, 0, 1, 1], [], []>} : vector<8x8xf32>, vector<8x32xf32>, vector<8x32xf32> -> vector<8x32xf32>
    %63 = arith.addf %24, %62 : vector<8x32xf32>
    %c1 = arith.constant 1 : index
    %c0_41 = arith.constant 0 : index
    %c0_42 = arith.constant 0 : index
    %64 = vector.load %arg4[%c1, %c0_41, %c0_42] : memref<4x32x8xf32, #tpu.memory_space<vmem>>, vector<1x32x8xf32>
    %65 = vector.shape_cast %64 : vector<1x32x8xf32> to vector<32x8xf32>
    %cst_43 = arith.constant dense<0.000000e+00> : vector<8x8xf32>
    %66 = tpu.matmul %23, %65, %cst_43 {dimension_numbers = #tpu.dot_dimension_numbers<[1], [0], [0], [1], [0, 0, 1, 1], [], []>} : vector<8x32xf32>, vector<32x8xf32>, vector<8x8xf32> -> vector<8x8xf32>
    %c1_44 = arith.constant 1 : index
    %c0_45 = arith.constant 0 : index
    %c0_46 = arith.constant 0 : index
    %67 = vector.load %arg5[%c1_44, %c0_45, %c0_46] : memref<4x1x8xf32, #tpu.memory_space<vmem>>, vector<1x1x8xf32>
    %68 = vector.shape_cast %67 : vector<1x1x8xf32> to vector<1x8xf32>
    %69 = vector.broadcast %68 : vector<1x8xf32> to vector<8x8xf32>
    %70 = arith.addf %66, %69 : vector<8x8xf32>
    %c1_47 = arith.constant 1 : index
    %c0_48 = arith.constant 0 : index
    %c0_49 = arith.constant 0 : index
    %71 = vector.load %arg6[%c1_47, %c0_48, %c0_49] : memref<4x32x8xf32, #tpu.memory_space<vmem>>, vector<1x32x8xf32>
    %72 = vector.shape_cast %71 : vector<1x32x8xf32> to vector<32x8xf32>
    %cst_50 = arith.constant dense<0.000000e+00> : vector<8x8xf32>
    %73 = tpu.matmul %23, %72, %cst_50 {dimension_numbers = #tpu.dot_dimension_numbers<[1], [0], [0], [1], [0, 0, 1, 1], [], []>} : vector<8x32xf32>, vector<32x8xf32>, vector<8x8xf32> -> vector<8x8xf32>
    %c1_51 = arith.constant 1 : index
    %c0_52 = arith.constant 0 : index
    %c0_53 = arith.constant 0 : index
    %74 = vector.load %arg7[%c1_51, %c0_52, %c0_53] : memref<4x1x8xf32, #tpu.memory_space<vmem>>, vector<1x1x8xf32>
    %75 = vector.shape_cast %74 : vector<1x1x8xf32> to vector<1x8xf32>
    %76 = vector.broadcast %75 : vector<1x8xf32> to vector<8x8xf32>
    %77 = arith.addf %73, %76 : vector<8x8xf32>
    %c1_54 = arith.constant 1 : index
    %c0_55 = arith.constant 0 : index
    %c0_56 = arith.constant 0 : index
    %78 = vector.load %arg8[%c1_54, %c0_55, %c0_56] : memref<4x32x8xf32, #tpu.memory_space<vmem>>, vector<1x32x8xf32>
    %79 = vector.shape_cast %78 : vector<1x32x8xf32> to vector<32x8xf32>
    %cst_57 = arith.constant dense<0.000000e+00> : vector<8x8xf32>
    %80 = tpu.matmul %23, %79, %cst_57 {dimension_numbers = #tpu.dot_dimension_numbers<[1], [0], [0], [1], [0, 0, 1, 1], [], []>} : vector<8x32xf32>, vector<32x8xf32>, vector<8x8xf32> -> vector<8x8xf32>
    %c1_58 = arith.constant 1 : index
    %c0_59 = arith.constant 0 : index
    %c0_60 = arith.constant 0 : index
    %81 = vector.load %arg9[%c1_58, %c0_59, %c0_60] : memref<4x1x8xf32, #tpu.memory_space<vmem>>, vector<1x1x8xf32>
    %82 = vector.shape_cast %81 : vector<1x1x8xf32> to vector<1x8xf32>
    %83 = vector.broadcast %82 : vector<1x8xf32> to vector<8x8xf32>
    %84 = arith.addf %80, %83 : vector<8x8xf32>
    %cst_61 = arith.constant dense<0.000000e+00> : vector<8x8xf32>
    %85 = tpu.matmul %70, %77, %cst_61 {dimension_numbers = #tpu.dot_dimension_numbers<[1], [1], [0], [0], [0, 0, 1, 0], [], []>} : vector<8x8xf32>, vector<8x8xf32>, vector<8x8xf32> -> vector<8x8xf32>
    %cst_62 = arith.constant 0.353553385 : f32
    %86 = vector.broadcast %cst_62 : f32 to vector<8x8xf32>
    %87 = arith.mulf %85, %86 : vector<8x8xf32>
    %cst_63 = arith.constant dense<0xFF800000> : vector<8xf32>
    %88 = vector.multi_reduction <maximumf>, %87, %cst_63 [1] : vector<8x8xf32> to vector<8xf32>
    %89 = vector.shape_cast %88 : vector<8xf32> to vector<8x1xf32>
    %90 = vector.broadcast %89 : vector<8x1xf32> to vector<8x8xf32>
    %91 = arith.subf %87, %90 : vector<8x8xf32>
    %92 = math.exp %91 : vector<8x8xf32>
    %cst_64 = arith.constant dense<0.000000e+00> : vector<8xf32>
    %93 = vector.multi_reduction <add>, %92, %cst_64 [1] : vector<8x8xf32> to vector<8xf32>
    %94 = vector.shape_cast %93 : vector<8xf32> to vector<8x1xf32>
    %95 = tpu.reciprocal %94 {approx = true} : vector<8x1xf32> -> vector<8x1xf32>
    %96 = vector.broadcast %95 : vector<8x1xf32> to vector<8x8xf32>
    %97 = arith.mulf %92, %96 : vector<8x8xf32>
    %cst_65 = arith.constant dense<0.000000e+00> : vector<8x8xf32>
    %98 = tpu.matmul %97, %84, %cst_65 {dimension_numbers = #tpu.dot_dimension_numbers<[1], [0], [0], [1], [0, 0, 1, 1], [], []>} : vector<8x8xf32>, vector<8x8xf32>, vector<8x8xf32> -> vector<8x8xf32>
    %c1_66 = arith.constant 1 : index
    %c0_67 = arith.constant 0 : index
    %c0_68 = arith.constant 0 : index
    %99 = vector.load %arg10[%c1_66, %c0_67, %c0_68] : memref<4x8x32xf32, #tpu.memory_space<vmem>>, vector<1x8x32xf32>
    %100 = vector.shape_cast %99 : vector<1x8x32xf32> to vector<8x32xf32>
    %cst_69 = arith.constant dense<0.000000e+00> : vector<8x32xf32>
    %101 = tpu.matmul %98, %100, %cst_69 {dimension_numbers = #tpu.dot_dimension_numbers<[1], [0], [0], [1], [0, 0, 1, 1], [], []>} : vector<8x8xf32>, vector<8x32xf32>, vector<8x32xf32> -> vector<8x32xf32>
    %102 = arith.addf %63, %101 : vector<8x32xf32>
    %c2 = arith.constant 2 : index
    %c0_70 = arith.constant 0 : index
    %c0_71 = arith.constant 0 : index
    %103 = vector.load %arg4[%c2, %c0_70, %c0_71] : memref<4x32x8xf32, #tpu.memory_space<vmem>>, vector<1x32x8xf32>
    %104 = vector.shape_cast %103 : vector<1x32x8xf32> to vector<32x8xf32>
    %cst_72 = arith.constant dense<0.000000e+00> : vector<8x8xf32>
    %105 = tpu.matmul %23, %104, %cst_72 {dimension_numbers = #tpu.dot_dimension_numbers<[1], [0], [0], [1], [0, 0, 1, 1], [], []>} : vector<8x32xf32>, vector<32x8xf32>, vector<8x8xf32> -> vector<8x8xf32>
    %c2_73 = arith.constant 2 : index
    %c0_74 = arith.constant 0 : index
    %c0_75 = arith.constant 0 : index
    %106 = vector.load %arg5[%c2_73, %c0_74, %c0_75] : memref<4x1x8xf32, #tpu.memory_space<vmem>>, vector<1x1x8xf32>
    %107 = vector.shape_cast %106 : vector<1x1x8xf32> to vector<1x8xf32>
    %108 = vector.broadcast %107 : vector<1x8xf32> to vector<8x8xf32>
    %109 = arith.addf %105, %108 : vector<8x8xf32>
    %c2_76 = arith.constant 2 : index
    %c0_77 = arith.constant 0 : index
    %c0_78 = arith.constant 0 : index
    %110 = vector.load %arg6[%c2_76, %c0_77, %c0_78] : memref<4x32x8xf32, #tpu.memory_space<vmem>>, vector<1x32x8xf32>
    %111 = vector.shape_cast %110 : vector<1x32x8xf32> to vector<32x8xf32>
    %cst_79 = arith.constant dense<0.000000e+00> : vector<8x8xf32>
    %112 = tpu.matmul %23, %111, %cst_79 {dimension_numbers = #tpu.dot_dimension_numbers<[1], [0], [0], [1], [0, 0, 1, 1], [], []>} : vector<8x32xf32>, vector<32x8xf32>, vector<8x8xf32> -> vector<8x8xf32>
    %c2_80 = arith.constant 2 : index
    %c0_81 = arith.constant 0 : index
    %c0_82 = arith.constant 0 : index
    %113 = vector.load %arg7[%c2_80, %c0_81, %c0_82] : memref<4x1x8xf32, #tpu.memory_space<vmem>>, vector<1x1x8xf32>
    %114 = vector.shape_cast %113 : vector<1x1x8xf32> to vector<1x8xf32>
    %115 = vector.broadcast %114 : vector<1x8xf32> to vector<8x8xf32>
    %116 = arith.addf %112, %115 : vector<8x8xf32>
    %c2_83 = arith.constant 2 : index
    %c0_84 = arith.constant 0 : index
    %c0_85 = arith.constant 0 : index
    %117 = vector.load %arg8[%c2_83, %c0_84, %c0_85] : memref<4x32x8xf32, #tpu.memory_space<vmem>>, vector<1x32x8xf32>
    %118 = vector.shape_cast %117 : vector<1x32x8xf32> to vector<32x8xf32>
    %cst_86 = arith.constant dense<0.000000e+00> : vector<8x8xf32>
    %119 = tpu.matmul %23, %118, %cst_86 {dimension_numbers = #tpu.dot_dimension_numbers<[1], [0], [0], [1], [0, 0, 1, 1], [], []>} : vector<8x32xf32>, vector<32x8xf32>, vector<8x8xf32> -> vector<8x8xf32>
    %c2_87 = arith.constant 2 : index
    %c0_88 = arith.constant 0 : index
    %c0_89 = arith.constant 0 : index
    %120 = vector.load %arg9[%c2_87, %c0_88, %c0_89] : memref<4x1x8xf32, #tpu.memory_space<vmem>>, vector<1x1x8xf32>
    %121 = vector.shape_cast %120 : vector<1x1x8xf32> to vector<1x8xf32>
    %122 = vector.broadcast %121 : vector<1x8xf32> to vector<8x8xf32>
    %123 = arith.addf %119, %122 : vector<8x8xf32>
    %cst_90 = arith.constant dense<0.000000e+00> : vector<8x8xf32>
    %124 = tpu.matmul %109, %116, %cst_90 {dimension_numbers = #tpu.dot_dimension_numbers<[1], [1], [0], [0], [0, 0, 1, 0], [], []>} : vector<8x8xf32>, vector<8x8xf32>, vector<8x8xf32> -> vector<8x8xf32>
    %cst_91 = arith.constant 0.353553385 : f32
    %125 = vector.broadcast %cst_91 : f32 to vector<8x8xf32>
    %126 = arith.mulf %124, %125 : vector<8x8xf32>
    %cst_92 = arith.constant dense<0xFF800000> : vector<8xf32>
    %127 = vector.multi_reduction <maximumf>, %126, %cst_92 [1] : vector<8x8xf32> to vector<8xf32>
    %128 = vector.shape_cast %127 : vector<8xf32> to vector<8x1xf32>
    %129 = vector.broadcast %128 : vector<8x1xf32> to vector<8x8xf32>
    %130 = arith.subf %126, %129 : vector<8x8xf32>
    %131 = math.exp %130 : vector<8x8xf32>
    %cst_93 = arith.constant dense<0.000000e+00> : vector<8xf32>
    %132 = vector.multi_reduction <add>, %131, %cst_93 [1] : vector<8x8xf32> to vector<8xf32>
    %133 = vector.shape_cast %132 : vector<8xf32> to vector<8x1xf32>
    %134 = tpu.reciprocal %133 {approx = true} : vector<8x1xf32> -> vector<8x1xf32>
    %135 = vector.broadcast %134 : vector<8x1xf32> to vector<8x8xf32>
    %136 = arith.mulf %131, %135 : vector<8x8xf32>
    %cst_94 = arith.constant dense<0.000000e+00> : vector<8x8xf32>
    %137 = tpu.matmul %136, %123, %cst_94 {dimension_numbers = #tpu.dot_dimension_numbers<[1], [0], [0], [1], [0, 0, 1, 1], [], []>} : vector<8x8xf32>, vector<8x8xf32>, vector<8x8xf32> -> vector<8x8xf32>
    %c2_95 = arith.constant 2 : index
    %c0_96 = arith.constant 0 : index
    %c0_97 = arith.constant 0 : index
    %138 = vector.load %arg10[%c2_95, %c0_96, %c0_97] : memref<4x8x32xf32, #tpu.memory_space<vmem>>, vector<1x8x32xf32>
    %139 = vector.shape_cast %138 : vector<1x8x32xf32> to vector<8x32xf32>
    %cst_98 = arith.constant dense<0.000000e+00> : vector<8x32xf32>
    %140 = tpu.matmul %137, %139, %cst_98 {dimension_numbers = #tpu.dot_dimension_numbers<[1], [0], [0], [1], [0, 0, 1, 1], [], []>} : vector<8x8xf32>, vector<8x32xf32>, vector<8x32xf32> -> vector<8x32xf32>
    %141 = arith.addf %102, %140 : vector<8x32xf32>
    %c3 = arith.constant 3 : index
    %c0_99 = arith.constant 0 : index
    %c0_100 = arith.constant 0 : index
    %142 = vector.load %arg4[%c3, %c0_99, %c0_100] : memref<4x32x8xf32, #tpu.memory_space<vmem>>, vector<1x32x8xf32>
    %143 = vector.shape_cast %142 : vector<1x32x8xf32> to vector<32x8xf32>
    %cst_101 = arith.constant dense<0.000000e+00> : vector<8x8xf32>
    %144 = tpu.matmul %23, %143, %cst_101 {dimension_numbers = #tpu.dot_dimension_numbers<[1], [0], [0], [1], [0, 0, 1, 1], [], []>} : vector<8x32xf32>, vector<32x8xf32>, vector<8x8xf32> -> vector<8x8xf32>
    %c3_102 = arith.constant 3 : index
    %c0_103 = arith.constant 0 : index
    %c0_104 = arith.constant 0 : index
    %145 = vector.load %arg5[%c3_102, %c0_103, %c0_104] : memref<4x1x8xf32, #tpu.memory_space<vmem>>, vector<1x1x8xf32>
    %146 = vector.shape_cast %145 : vector<1x1x8xf32> to vector<1x8xf32>
    %147 = vector.broadcast %146 : vector<1x8xf32> to vector<8x8xf32>
    %148 = arith.addf %144, %147 : vector<8x8xf32>
    %c3_105 = arith.constant 3 : index
    %c0_106 = arith.constant 0 : index
    %c0_107 = arith.constant 0 : index
    %149 = vector.load %arg6[%c3_105, %c0_106, %c0_107] : memref<4x32x8xf32, #tpu.memory_space<vmem>>, vector<1x32x8xf32>
    %150 = vector.shape_cast %149 : vector<1x32x8xf32> to vector<32x8xf32>
    %cst_108 = arith.constant dense<0.000000e+00> : vector<8x8xf32>
    %151 = tpu.matmul %23, %150, %cst_108 {dimension_numbers = #tpu.dot_dimension_numbers<[1], [0], [0], [1], [0, 0, 1, 1], [], []>} : vector<8x32xf32>, vector<32x8xf32>, vector<8x8xf32> -> vector<8x8xf32>
    %c3_109 = arith.constant 3 : index
    %c0_110 = arith.constant 0 : index
    %c0_111 = arith.constant 0 : index
    %152 = vector.load %arg7[%c3_109, %c0_110, %c0_111] : memref<4x1x8xf32, #tpu.memory_space<vmem>>, vector<1x1x8xf32>
    %153 = vector.shape_cast %152 : vector<1x1x8xf32> to vector<1x8xf32>
    %154 = vector.broadcast %153 : vector<1x8xf32> to vector<8x8xf32>
    %155 = arith.addf %151, %154 : vector<8x8xf32>
    %c3_112 = arith.constant 3 : index
    %c0_113 = arith.constant 0 : index
    %c0_114 = arith.constant 0 : index
    %156 = vector.load %arg8[%c3_112, %c0_113, %c0_114] : memref<4x32x8xf32, #tpu.memory_space<vmem>>, vector<1x32x8xf32>
    %157 = vector.shape_cast %156 : vector<1x32x8xf32> to vector<32x8xf32>
    %cst_115 = arith.constant dense<0.000000e+00> : vector<8x8xf32>
    %158 = tpu.matmul %23, %157, %cst_115 {dimension_numbers = #tpu.dot_dimension_numbers<[1], [0], [0], [1], [0, 0, 1, 1], [], []>} : vector<8x32xf32>, vector<32x8xf32>, vector<8x8xf32> -> vector<8x8xf32>
    %c3_116 = arith.constant 3 : index
    %c0_117 = arith.constant 0 : index
    %c0_118 = arith.constant 0 : index
    %159 = vector.load %arg9[%c3_116, %c0_117, %c0_118] : memref<4x1x8xf32, #tpu.memory_space<vmem>>, vector<1x1x8xf32>
    %160 = vector.shape_cast %159 : vector<1x1x8xf32> to vector<1x8xf32>
    %161 = vector.broadcast %160 : vector<1x8xf32> to vector<8x8xf32>
    %162 = arith.addf %158, %161 : vector<8x8xf32>
    %cst_119 = arith.constant dense<0.000000e+00> : vector<8x8xf32>
    %163 = tpu.matmul %148, %155, %cst_119 {dimension_numbers = #tpu.dot_dimension_numbers<[1], [1], [0], [0], [0, 0, 1, 0], [], []>} : vector<8x8xf32>, vector<8x8xf32>, vector<8x8xf32> -> vector<8x8xf32>
    %cst_120 = arith.constant 0.353553385 : f32
    %164 = vector.broadcast %cst_120 : f32 to vector<8x8xf32>
    %165 = arith.mulf %163, %164 : vector<8x8xf32>
    %cst_121 = arith.constant dense<0xFF800000> : vector<8xf32>
    %166 = vector.multi_reduction <maximumf>, %165, %cst_121 [1] : vector<8x8xf32> to vector<8xf32>
    %167 = vector.shape_cast %166 : vector<8xf32> to vector<8x1xf32>
    %168 = vector.broadcast %167 : vector<8x1xf32> to vector<8x8xf32>
    %169 = arith.subf %165, %168 : vector<8x8xf32>
    %170 = math.exp %169 : vector<8x8xf32>
    %cst_122 = arith.constant dense<0.000000e+00> : vector<8xf32>
    %171 = vector.multi_reduction <add>, %170, %cst_122 [1] : vector<8x8xf32> to vector<8xf32>
    %172 = vector.shape_cast %171 : vector<8xf32> to vector<8x1xf32>
    %173 = tpu.reciprocal %172 {approx = true} : vector<8x1xf32> -> vector<8x1xf32>
    %174 = vector.broadcast %173 : vector<8x1xf32> to vector<8x8xf32>
    %175 = arith.mulf %170, %174 : vector<8x8xf32>
    %cst_123 = arith.constant dense<0.000000e+00> : vector<8x8xf32>
    %176 = tpu.matmul %175, %162, %cst_123 {dimension_numbers = #tpu.dot_dimension_numbers<[1], [0], [0], [1], [0, 0, 1, 1], [], []>} : vector<8x8xf32>, vector<8x8xf32>, vector<8x8xf32> -> vector<8x8xf32>
    %c3_124 = arith.constant 3 : index
    %c0_125 = arith.constant 0 : index
    %c0_126 = arith.constant 0 : index
    %177 = vector.load %arg10[%c3_124, %c0_125, %c0_126] : memref<4x8x32xf32, #tpu.memory_space<vmem>>, vector<1x8x32xf32>
    %178 = vector.shape_cast %177 : vector<1x8x32xf32> to vector<8x32xf32>
    %cst_127 = arith.constant dense<0.000000e+00> : vector<8x32xf32>
    %179 = tpu.matmul %176, %178, %cst_127 {dimension_numbers = #tpu.dot_dimension_numbers<[1], [0], [0], [1], [0, 0, 1, 1], [], []>} : vector<8x8xf32>, vector<8x32xf32>, vector<8x32xf32> -> vector<8x32xf32>
    %180 = arith.addf %141, %179 : vector<8x32xf32>
    %181 = arith.addf %1, %180 : vector<8x32xf32>
    %c0_128 = arith.constant 0 : index
    %c0_129 = arith.constant 0 : index
    %182 = vector.load %arg11[%c0_128, %c0_129] : memref<1x32xf32, #tpu.memory_space<vmem>>, vector<1x32xf32>
    %183 = vector.broadcast %182 : vector<1x32xf32> to vector<8x32xf32>
    %184 = arith.addf %181, %183 : vector<8x32xf32>
    %c0_130 = arith.constant 0 : index
    %c0_131 = arith.constant 0 : index
    %185 = vector.load %arg12[%c0_130, %c0_131] : memref<1x32xf32, #tpu.memory_space<vmem>>, vector<1x32xf32>
    %c0_132 = arith.constant 0 : index
    %c0_133 = arith.constant 0 : index
    %186 = vector.load %arg13[%c0_132, %c0_133] : memref<1x32xf32, #tpu.memory_space<vmem>>, vector<1x32xf32>
    %cst_134 = arith.constant dense<0.000000e+00> : vector<8xf32>
    %187 = vector.multi_reduction <add>, %184, %cst_134 [1] : vector<8x32xf32> to vector<8xf32>
    %188 = vector.shape_cast %187 : vector<8xf32> to vector<8x1xf32>
    %cst_135 = arith.constant 3.200000e+01 : f32
    %189 = vector.broadcast %cst_135 : f32 to vector<8x1xf32>
    %190 = arith.divf %188, %189 : vector<8x1xf32>
    %191 = vector.broadcast %190 : vector<8x1xf32> to vector<8x32xf32>
    %192 = arith.subf %184, %191 : vector<8x32xf32>
    %193 = arith.mulf %192, %192 : vector<8x32xf32>
    %cst_136 = arith.constant dense<0.000000e+00> : vector<8xf32>
    %194 = vector.multi_reduction <add>, %193, %cst_136 [1] : vector<8x32xf32> to vector<8xf32>
    %195 = vector.shape_cast %194 : vector<8xf32> to vector<8x1xf32>
    %cst_137 = arith.constant 3.200000e+01 : f32
    %196 = vector.broadcast %cst_137 : f32 to vector<8x1xf32>
    %197 = arith.divf %195, %196 : vector<8x1xf32>
    %cst_138 = arith.constant 9.99999974E-6 : f32
    %198 = vector.broadcast %cst_138 : f32 to vector<8x1xf32>
    %199 = arith.addf %197, %198 : vector<8x1xf32>
    %200 = math.rsqrt %199 : vector<8x1xf32>
    %201 = vector.broadcast %200 : vector<8x1xf32> to vector<8x32xf32>
    %202 = arith.mulf %192, %201 : vector<8x32xf32>
    %203 = vector.broadcast %185 : vector<1x32xf32> to vector<8x32xf32>
    %204 = arith.mulf %202, %203 : vector<8x32xf32>
    %205 = vector.broadcast %186 : vector<1x32xf32> to vector<8x32xf32>
    %206 = arith.addf %204, %205 : vector<8x32xf32>
    %c0_139 = arith.constant 0 : index
    %c0_140 = arith.constant 0 : index
    %207 = vector.load %arg14[%c0_139, %c0_140] : memref<32x64xf32, #tpu.memory_space<vmem>>, vector<32x64xf32>
    %cst_141 = arith.constant dense<0.000000e+00> : vector<8x64xf32>
    %208 = tpu.matmul %206, %207, %cst_141 {dimension_numbers = #tpu.dot_dimension_numbers<[1], [0], [0], [1], [0, 0, 1, 1], [], []>} : vector<8x32xf32>, vector<32x64xf32>, vector<8x64xf32> -> vector<8x64xf32>
    %c0_142 = arith.constant 0 : index
    %c0_143 = arith.constant 0 : index
    %209 = vector.load %arg15[%c0_142, %c0_143] : memref<1x64xf32, #tpu.memory_space<vmem>>, vector<1x64xf32>
    %210 = vector.broadcast %209 : vector<1x64xf32> to vector<8x64xf32>
    %211 = arith.addf %208, %210 : vector<8x64xf32>
    %212 = arith.mulf %211, %211 : vector<8x64xf32>
    %213 = arith.mulf %211, %212 : vector<8x64xf32>
    %cst_144 = arith.constant 4.471500e-02 : f32
    %214 = vector.broadcast %cst_144 : f32 to vector<8x64xf32>
    %215 = arith.mulf %214, %213 : vector<8x64xf32>
    %216 = arith.addf %211, %215 : vector<8x64xf32>
    %cst_145 = arith.constant 0.797884583 : f32
    %217 = vector.broadcast %cst_145 : f32 to vector<8x64xf32>
    %218 = arith.mulf %217, %216 : vector<8x64xf32>
    %219 = math.tanh %218 : vector<8x64xf32>
    %cst_146 = arith.constant 1.000000e+00 : f32
    %220 = vector.broadcast %cst_146 : f32 to vector<8x64xf32>
    %221 = arith.addf %220, %219 : vector<8x64xf32>
    %cst_147 = arith.constant 5.000000e-01 : f32
    %222 = vector.broadcast %cst_147 : f32 to vector<8x64xf32>
    %223 = arith.mulf %222, %221 : vector<8x64xf32>
    %224 = arith.mulf %211, %223 : vector<8x64xf32>
    %c0_148 = arith.constant 0 : index
    %c0_149 = arith.constant 0 : index
    %225 = vector.load %arg16[%c0_148, %c0_149] : memref<64x32xf32, #tpu.memory_space<vmem>>, vector<64x32xf32>
    %cst_150 = arith.constant dense<0.000000e+00> : vector<8x32xf32>
    %226 = tpu.matmul %224, %225, %cst_150 {dimension_numbers = #tpu.dot_dimension_numbers<[1], [0], [0], [1], [0, 0, 1, 1], [], []>} : vector<8x64xf32>, vector<64x32xf32>, vector<8x32xf32> -> vector<8x32xf32>
    %c0_151 = arith.constant 0 : index
    %c0_152 = arith.constant 0 : index
    %227 = vector.load %arg17[%c0_151, %c0_152] : memref<1x32xf32, #tpu.memory_space<vmem>>, vector<1x32xf32>
    %228 = vector.broadcast %227 : vector<1x32xf32> to vector<8x32xf32>
    %229 = arith.addf %226, %228 : vector<8x32xf32>
    %230 = arith.addf %184, %229 : vector<8x32xf32>
    %c0_153 = arith.constant 0 : index
    %c0_154 = arith.constant 0 : index
    %c0_155 = arith.constant 0 : index
    %231 = vector.load %arg18[%c0_153, %c0_154, %c0_155] : memref<1x8x32xf32, #tpu.memory_space<vmem>>, vector<1x8x32xf32>
    %232 = vector.shape_cast %231 : vector<1x8x32xf32> to vector<8x32xf32>
    %233 = vector.shape_cast %230 : vector<8x32xf32> to vector<1x8x32xf32>
    tpu.vector_store %arg18[%c0_153, %c0_154, %c0_155], %233 {strides = array<i32>} : memref<1x8x32xf32, #tpu.memory_space<vmem>>, vector<1x8x32xf32>,
    return
  }
  func.func @transform_0(%arg0: i32) -> (i32, i32, i32) {
    %c0_i32 = arith.constant 0 : i32
    %c0_i32_0 = arith.constant 0 : i32
    %c0_i32_1 = arith.constant 0 : i32
    return %arg0, %c0_i32, %c0_i32_0 : i32, i32, i32
  }
  func.func @transform_1(%arg0: i32) -> (i32, i32) {
    %c0_i32 = arith.constant 0 : i32
    %c0_i32_0 = arith.constant 0 : i32
    %c0_i32_1 = arith.constant 0 : i32
    return %c0_i32, %c0_i32_0 : i32, i32
  }
  func.func @transform_2(%arg0: i32) -> (i32, i32) {
    %c0_i32 = arith.constant 0 : i32
    %c0_i32_0 = arith.constant 0 : i32
    %c0_i32_1 = arith.constant 0 : i32
    return %c0_i32, %c0_i32_0 : i32, i32
  }
  func.func @transform_3(%arg0: i32) -> (i32, i32, i32) {
    %c0_i32 = arith.constant 0 : i32
    %c0_i32_0 = arith.constant 0 : i32
    %c0_i32_1 = arith.constant 0 : i32
    %c0_i32_2 = arith.constant 0 : i32
    return %c0_i32, %c0_i32_0, %c0_i32_1 : i32, i32, i32
  }
  func.func @transform_4(%arg0: i32) -> (i32, i32, i32) {
    %c0_i32 = arith.constant 0 : i32
    %c0_i32_0 = arith.constant 0 : i32
    %c0_i32_1 = arith.constant 0 : i32
    %c0_i32_2 = arith.constant 0 : i32
    return %c0_i32, %c0_i32_0, %c0_i32_1 : i32, i32, i32
  }
  func.func @transform_5(%arg0: i32) -> (i32, i32, i32) {
    %c0_i32 = arith.constant 0 : i32
    %c0_i32_0 = arith.constant 0 : i32
    %c0_i32_1 = arith.constant 0 : i32
    %c0_i32_2 = arith.constant 0 : i32
    return %c0_i32, %c0_i32_0, %c0_i32_1 : i32, i32, i32
  }
  func.func @transform_6(%arg0: i32) -> (i32, i32, i32) {
    %c0_i32 = arith.constant 0 : i32
    %c0_i32_0 = arith.constant 0 : i32
    %c0_i32_1 = arith.constant 0 : i32
    %c0_i32_2 = arith.constant 0 : i32
    return %c0_i32, %c0_i32_0, %c0_i32_1 : i32, i32, i32
  }
  func.func @transform_7(%arg0: i32) -> (i32, i32, i32) {
    %c0_i32 = arith.constant 0 : i32
    %c0_i32_0 = arith.constant 0 : i32
    %c0_i32_1 = arith.constant 0 : i32
    %c0_i32_2 = arith.constant 0 : i32
    return %c0_i32, %c0_i32_0, %c0_i32_1 : i32, i32, i32
  }
  func.func @transform_8(%arg0: i32) -> (i32, i32, i32) {
    %c0_i32 = arith.constant 0 : i32
    %c0_i32_0 = arith.constant 0 : i32
    %c0_i32_1 = arith.constant 0 : i32
    %c0_i32_2 = arith.constant 0 : i32
    return %c0_i32, %c0_i32_0, %c0_i32_1 : i32, i32, i32
  }
  func.func @transform_9(%arg0: i32) -> (i32, i32, i32) {
    %c0_i32 = arith.constant 0 : i32
    %c0_i32_0 = arith.constant 0 : i32
    %c0_i32_1 = arith.constant 0 : i32
    %c0_i32_2 = arith.constant 0 : i32
    return %c0_i32, %c0_i32_0, %c0_i32_1 : i32, i32, i32
  }
  func.func @transform_10(%arg0: i32) -> (i32, i32) {
    %c0_i32 = arith.constant 0 : i32
    %c0_i32_0 = arith.constant 0 : i32
    %c0_i32_1 = arith.constant 0 : i32
    return %c0_i32, %c0_i32_0 : i32, i32
  }
  func.func @transform_11(%arg0: i32) -> (i32, i32) {
    %c0_i32 = arith.constant 0 : i32
    %c0_i32_0 = arith.constant 0 : i32
    %c0_i32_1 = arith.constant 0 : i32
    return %c0_i32, %c0_i32_0 : i32, i32
  }
  func.func @transform_12(%arg0: i32) -> (i32, i32) {
    %c0_i32 = arith.constant 0 : i32
    %c0_i32_0 = arith.constant 0 : i32
    %c0_i32_1 = arith.constant 0 : i32
    return %c0_i32, %c0_i32_0 : i32, i32
  }
  func.func @transform_13(%arg0: i32) -> (i32, i32) {
    %c0_i32 = arith.constant 0 : i32
    %c0_i32_0 = arith.constant 0 : i32
    %c0_i32_1 = arith.constant 0 : i32
    return %c0_i32, %c0_i32_0 : i32, i32
  }
  func.func @transform_14(%arg0: i32) -> (i32, i32) {
    %c0_i32 = arith.constant 0 : i32
    %c0_i32_0 = arith.constant 0 : i32
    %c0_i32_1 = arith.constant 0 : i32
    return %c0_i32, %c0_i32_0 : i32, i32
  }
  func.func @transform_15(%arg0: i32) -> (i32, i32) {
    %c0_i32 = arith.constant 0 : i32
    %c0_i32_0 = arith.constant 0 : i32
    %c0_i32_1 = arith.constant 0 : i32
    return %c0_i32, %c0_i32_0 : i32, i32
  }
  func.func @transform_16(%arg0: i32) -> (i32, i32) {
    %c0_i32 = arith.constant 0 : i32
    %c0_i32_0 = arith.constant 0 : i32
    %c0_i32_1 = arith.constant 0 : i32
    return %c0_i32, %c0_i32_0 : i32, i32
  }
  func.func @transform_17(%arg0: i32) -> (i32, i32, i32) {
    %c0_i32 = arith.constant 0 : i32
    %c0_i32_0 = arith.constant 0 : i32
    %c0_i32_1 = arith.constant 0 : i32
    return %arg0, %c0_i32, %c0_i32_0 : i32, i32, i32
  }
}

module attributes {stable_mosaic.version = 11 : i64} {
  func.func @_enc_tail_kernel(%arg0: i32, %arg1: memref<1x8x32xf32, #tpu.memory_space<vmem>>, %arg2: memref<1x32xf32, #tpu.memory_space<vmem>>, %arg3: memref<1x32xf32, #tpu.memory_space<vmem>>, %arg4: memref<32x32xf32, #tpu.memory_space<vmem>>, %arg5: memref<1x32xf32, #tpu.memory_space<vmem>>, %arg6: memref<32x32xf32, #tpu.memory_space<vmem>>, %arg7: memref<1x32xf32, #tpu.memory_space<vmem>>, %arg8: memref<1x8x32xf32, #tpu.memory_space<vmem>>, %arg9: memref<1x1x32xf32, #tpu.memory_space<vmem>>) attributes {dimension_semantics = [#tpu.dimension_semantics<parallel>], iteration_bounds = array<i64: 2>, scalar_prefetch = 0 : i64, scratch_operands = 0 : i64, tpu.core_type = #tpu.core_type<tc>, window_params = [{transform_indices = @transform_0, window_bounds = array<i64: 1, 8, 32>}, {pipeline_mode = #tpu.pipeline_mode<synchronous>, transform_indices = @transform_1, window_bounds = array<i64: 1, 32>}, {pipeline_mode = #tpu.pipeline_mode<synchronous>, transform_indices = @transform_2, window_bounds = array<i64: 1, 32>}, {pipeline_mode = #tpu.pipeline_mode<synchronous>, transform_indices = @transform_3, window_bounds = array<i64: 32, 32>}, {pipeline_mode = #tpu.pipeline_mode<synchronous>, transform_indices = @transform_4, window_bounds = array<i64: 1, 32>}, {pipeline_mode = #tpu.pipeline_mode<synchronous>, transform_indices = @transform_5, window_bounds = array<i64: 32, 32>}, {pipeline_mode = #tpu.pipeline_mode<synchronous>, transform_indices = @transform_6, window_bounds = array<i64: 1, 32>}, {transform_indices = @transform_7, window_bounds = array<i64: 1, 8, 32>}, {transform_indices = @transform_8, window_bounds = array<i64: 1, 1, 32>}]} {
    %c0 = arith.constant 0 : index
    %c0_0 = arith.constant 0 : index
    %c0_1 = arith.constant 0 : index
    %0 = vector.load %arg1[%c0, %c0_0, %c0_1] : memref<1x8x32xf32, #tpu.memory_space<vmem>>, vector<1x8x32xf32>
    %1 = vector.shape_cast %0 : vector<1x8x32xf32> to vector<8x32xf32>
    %c0_2 = arith.constant 0 : index
    %c0_3 = arith.constant 0 : index
    %2 = vector.load %arg2[%c0_2, %c0_3] : memref<1x32xf32, #tpu.memory_space<vmem>>, vector<1x32xf32>
    %c0_4 = arith.constant 0 : index
    %c0_5 = arith.constant 0 : index
    %3 = vector.load %arg3[%c0_4, %c0_5] : memref<1x32xf32, #tpu.memory_space<vmem>>, vector<1x32xf32>
    %cst = arith.constant dense<0.000000e+00> : vector<8xf32>
    %4 = vector.multi_reduction <add>, %1, %cst [1] : vector<8x32xf32> to vector<8xf32>
    %5 = vector.shape_cast %4 : vector<8xf32> to vector<8x1xf32>
    %cst_6 = arith.constant 3.200000e+01 : f32
    %6 = vector.broadcast %cst_6 : f32 to vector<8x1xf32>
    %7 = arith.divf %5, %6 : vector<8x1xf32>
    %8 = vector.broadcast %7 : vector<8x1xf32> to vector<8x32xf32>
    %9 = arith.subf %1, %8 : vector<8x32xf32>
    %10 = arith.mulf %9, %9 : vector<8x32xf32>
    %cst_7 = arith.constant dense<0.000000e+00> : vector<8xf32>
    %11 = vector.multi_reduction <add>, %10, %cst_7 [1] : vector<8x32xf32> to vector<8xf32>
    %12 = vector.shape_cast %11 : vector<8xf32> to vector<8x1xf32>
    %cst_8 = arith.constant 3.200000e+01 : f32
    %13 = vector.broadcast %cst_8 : f32 to vector<8x1xf32>
    %14 = arith.divf %12, %13 : vector<8x1xf32>
    %cst_9 = arith.constant 9.99999974E-6 : f32
    %15 = vector.broadcast %cst_9 : f32 to vector<8x1xf32>
    %16 = arith.addf %14, %15 : vector<8x1xf32>
    %17 = math.rsqrt %16 : vector<8x1xf32>
    %18 = vector.broadcast %17 : vector<8x1xf32> to vector<8x32xf32>
    %19 = arith.mulf %9, %18 : vector<8x32xf32>
    %20 = vector.broadcast %2 : vector<1x32xf32> to vector<8x32xf32>
    %21 = arith.mulf %19, %20 : vector<8x32xf32>
    %22 = vector.broadcast %3 : vector<1x32xf32> to vector<8x32xf32>
    %23 = arith.addf %21, %22 : vector<8x32xf32>
    %c0_10 = arith.constant 0 : index
    %c0_11 = arith.constant 0 : index
    %24 = vector.load %arg4[%c0_10, %c0_11] : memref<32x32xf32, #tpu.memory_space<vmem>>, vector<32x32xf32>
    %cst_12 = arith.constant dense<0.000000e+00> : vector<8x32xf32>
    %25 = tpu.matmul %23, %24, %cst_12 {dimension_numbers = #tpu.dot_dimension_numbers<[1], [0], [0], [1], [0, 0, 1, 1], [], []>} : vector<8x32xf32>, vector<32x32xf32>, vector<8x32xf32> -> vector<8x32xf32>
    %c0_13 = arith.constant 0 : index
    %c0_14 = arith.constant 0 : index
    %26 = vector.load %arg5[%c0_13, %c0_14] : memref<1x32xf32, #tpu.memory_space<vmem>>, vector<1x32xf32>
    %27 = vector.broadcast %26 : vector<1x32xf32> to vector<8x32xf32>
    %28 = arith.addf %25, %27 : vector<8x32xf32>
    %c0_15 = arith.constant 0 : index
    %c0_16 = arith.constant 0 : index
    %c0_17 = arith.constant 0 : index
    %29 = vector.load %arg8[%c0_15, %c0_16, %c0_17] : memref<1x8x32xf32, #tpu.memory_space<vmem>>, vector<1x8x32xf32>
    %30 = vector.shape_cast %29 : vector<1x8x32xf32> to vector<8x32xf32>
    %31 = vector.shape_cast %28 : vector<8x32xf32> to vector<1x8x32xf32>
    tpu.vector_store %arg8[%c0_15, %c0_16, %c0_17], %31 {strides = array<i32>} : memref<1x8x32xf32, #tpu.memory_space<vmem>>, vector<1x8x32xf32>,
    %cst_18 = arith.constant 1.250000e-01 : f32
    %32 = vector.broadcast %cst_18 : f32 to vector<1x8xf32>
    %cst_19 = arith.constant dense<0.000000e+00> : vector<1x32xf32>
    %33 = tpu.matmul %32, %23, %cst_19 {dimension_numbers = #tpu.dot_dimension_numbers<[1], [0], [0], [1], [0, 0, 1, 1], [], []>} : vector<1x8xf32>, vector<8x32xf32>, vector<1x32xf32> -> vector<1x32xf32>
    %c0_20 = arith.constant 0 : index
    %c0_21 = arith.constant 0 : index
    %34 = vector.load %arg6[%c0_20, %c0_21] : memref<32x32xf32, #tpu.memory_space<vmem>>, vector<32x32xf32>
    %cst_22 = arith.constant dense<0.000000e+00> : vector<1x32xf32>
    %35 = tpu.matmul %33, %34, %cst_22 {dimension_numbers = #tpu.dot_dimension_numbers<[1], [0], [0], [1], [0, 0, 1, 1], [], []>} : vector<1x32xf32>, vector<32x32xf32>, vector<1x32xf32> -> vector<1x32xf32>
    %c0_23 = arith.constant 0 : index
    %c0_24 = arith.constant 0 : index
    %36 = vector.load %arg7[%c0_23, %c0_24] : memref<1x32xf32, #tpu.memory_space<vmem>>, vector<1x32xf32>
    %37 = arith.addf %35, %36 : vector<1x32xf32>
    %c0_25 = arith.constant 0 : index
    %c0_26 = arith.constant 0 : index
    %c0_27 = arith.constant 0 : index
    %38 = vector.load %arg9[%c0_25, %c0_26, %c0_27] : memref<1x1x32xf32, #tpu.memory_space<vmem>>, vector<1x1x32xf32>
    %39 = vector.shape_cast %38 : vector<1x1x32xf32> to vector<1x32xf32>
    %40 = vector.shape_cast %37 : vector<1x32xf32> to vector<1x1x32xf32>
    tpu.vector_store %arg9[%c0_25, %c0_26, %c0_27], %40 {strides = array<i32>} : memref<1x1x32xf32, #tpu.memory_space<vmem>>, vector<1x1x32xf32>,
    return
  }
  func.func @transform_0(%arg0: i32) -> (i32, i32, i32) {
    %c0_i32 = arith.constant 0 : i32
    %c0_i32_0 = arith.constant 0 : i32
    %c0_i32_1 = arith.constant 0 : i32
    return %arg0, %c0_i32, %c0_i32_0 : i32, i32, i32
  }
  func.func @transform_1(%arg0: i32) -> (i32, i32) {
    %c0_i32 = arith.constant 0 : i32
    %c0_i32_0 = arith.constant 0 : i32
    %c0_i32_1 = arith.constant 0 : i32
    return %c0_i32, %c0_i32_0 : i32, i32
  }
  func.func @transform_2(%arg0: i32) -> (i32, i32) {
    %c0_i32 = arith.constant 0 : i32
    %c0_i32_0 = arith.constant 0 : i32
    %c0_i32_1 = arith.constant 0 : i32
    return %c0_i32, %c0_i32_0 : i32, i32
  }
  func.func @transform_3(%arg0: i32) -> (i32, i32) {
    %c0_i32 = arith.constant 0 : i32
    %c0_i32_0 = arith.constant 0 : i32
    %c0_i32_1 = arith.constant 0 : i32
    return %c0_i32, %c0_i32_0 : i32, i32
  }
  func.func @transform_4(%arg0: i32) -> (i32, i32) {
    %c0_i32 = arith.constant 0 : i32
    %c0_i32_0 = arith.constant 0 : i32
    %c0_i32_1 = arith.constant 0 : i32
    return %c0_i32, %c0_i32_0 : i32, i32
  }
  func.func @transform_5(%arg0: i32) -> (i32, i32) {
    %c0_i32 = arith.constant 0 : i32
    %c0_i32_0 = arith.constant 0 : i32
    %c0_i32_1 = arith.constant 0 : i32
    return %c0_i32, %c0_i32_0 : i32, i32
  }
  func.func @transform_6(%arg0: i32) -> (i32, i32) {
    %c0_i32 = arith.constant 0 : i32
    %c0_i32_0 = arith.constant 0 : i32
    %c0_i32_1 = arith.constant 0 : i32
    return %c0_i32, %c0_i32_0 : i32, i32
  }
  func.func @transform_7(%arg0: i32) -> (i32, i32, i32) {
    %c0_i32 = arith.constant 0 : i32
    %c0_i32_0 = arith.constant 0 : i32
    %c0_i32_1 = arith.constant 0 : i32
    return %arg0, %c0_i32, %c0_i32_0 : i32, i32, i32
  }
  func.func @transform_8(%arg0: i32) -> (i32, i32, i32) {
    %c0_i32 = arith.constant 0 : i32
    %c0_i32_0 = arith.constant 0 : i32
    %c0_i32_1 = arith.constant 0 : i32
    return %arg0, %c0_i32, %c0_i32_0 : i32, i32, i32
  }
}

module attributes {stable_mosaic.version = 11 : i64} {
  func.func @_contrast_kernel(%arg0: i32, %arg1: memref<2x32xf32, #tpu.memory_space<vmem>>, %arg2: memref<2x2xf32, #tpu.memory_space<vmem>>, %arg3: memref<1x1xf32, #tpu.memory_space<vmem>>) attributes {dimension_semantics = [#tpu.dimension_semantics<arbitrary>], iteration_bounds = array<i64: 1>, scalar_prefetch = 0 : i64, scratch_operands = 0 : i64, tpu.core_type = #tpu.core_type<tc>, window_params = [{pipeline_mode = #tpu.pipeline_mode<synchronous>, transform_indices = @transform_0, window_bounds = array<i64: 2, 32>}, {pipeline_mode = #tpu.pipeline_mode<synchronous>, transform_indices = @transform_1, window_bounds = array<i64: 2, 2>}, {pipeline_mode = #tpu.pipeline_mode<synchronous>, transform_indices = @transform_2, window_bounds = array<i64: 1, 1>}]} {
    %c0 = arith.constant 0 : index
    %c0_0 = arith.constant 0 : index
    %0 = vector.load %arg1[%c0, %c0_0] : memref<2x32xf32, #tpu.memory_space<vmem>>, vector<2x32xf32>
    %1 = arith.mulf %0, %0 : vector<2x32xf32>
    %cst = arith.constant dense<0.000000e+00> : vector<2xf32>
    %2 = vector.multi_reduction <add>, %1, %cst [1] : vector<2x32xf32> to vector<2xf32>
    %3 = vector.shape_cast %2 : vector<2xf32> to vector<2x1xf32>
    %cst_1 = arith.constant 9.99999997E-7 : f32
    %4 = vector.broadcast %cst_1 : f32 to vector<2x1xf32>
    %5 = arith.addf %3, %4 : vector<2x1xf32>
    %6 = math.rsqrt %5 : vector<2x1xf32>
    %7 = vector.broadcast %6 : vector<2x1xf32> to vector<2x32xf32>
    %8 = arith.mulf %0, %7 : vector<2x32xf32>
    %cst_2 = arith.constant dense<0.000000e+00> : vector<2x2xf32>
    %9 = tpu.matmul %8, %8, %cst_2 {dimension_numbers = #tpu.dot_dimension_numbers<[1], [1], [0], [0], [0, 0, 1, 0], [], []>} : vector<2x32xf32>, vector<2x32xf32>, vector<2x2xf32> -> vector<2x2xf32>
    %cst_3 = arith.constant 14.2857141 : f32
    %10 = vector.broadcast %cst_3 : f32 to vector<2x2xf32>
    %11 = arith.mulf %9, %10 : vector<2x2xf32>
    %cst_4 = arith.constant dense<0xFF800000> : vector<2xf32>
    %12 = vector.multi_reduction <maximumf>, %11, %cst_4 [1] : vector<2x2xf32> to vector<2xf32>
    %13 = vector.shape_cast %12 : vector<2xf32> to vector<2x1xf32>
    %14 = vector.broadcast %13 : vector<2x1xf32> to vector<2x2xf32>
    %15 = arith.subf %11, %14 : vector<2x2xf32>
    %16 = math.exp %15 : vector<2x2xf32>
    %cst_5 = arith.constant dense<0.000000e+00> : vector<2xf32>
    %17 = vector.multi_reduction <add>, %16, %cst_5 [1] : vector<2x2xf32> to vector<2xf32>
    %18 = vector.shape_cast %17 : vector<2xf32> to vector<2x1xf32>
    %19 = math.log %18 : vector<2x1xf32>
    %20 = arith.addf %19, %13 : vector<2x1xf32>
    %21 = vector.broadcast %20 : vector<2x1xf32> to vector<2x2xf32>
    %22 = arith.subf %11, %21 : vector<2x2xf32>
    %c0_6 = arith.constant 0 : index
    %c0_7 = arith.constant 0 : index
    %23 = vector.load %arg2[%c0_6, %c0_7] : memref<2x2xf32, #tpu.memory_space<vmem>>, vector<2x2xf32>
    %cst_8 = arith.constant dense<0.000000e+00> : vector<2xf32>
    %24 = vector.multi_reduction <add>, %23, %cst_8 [1] : vector<2x2xf32> to vector<2xf32>
    %25 = vector.shape_cast %24 : vector<2xf32> to vector<2x1xf32>
    %26 = vector.broadcast %25 : vector<2x1xf32> to vector<2x2xf32>
    %27 = arith.divf %23, %26 : vector<2x2xf32>
    %28 = arith.mulf %27, %22 : vector<2x2xf32>
    %29 = vector.shape_cast %28 : vector<2x2xf32> to vector<1x2x2xf32>
    %cst_9 = arith.constant dense<0.000000e+00> : vector<1xf32>
    %30 = vector.multi_reduction <add>, %29, %cst_9 [1, 2] : vector<1x2x2xf32> to vector<1xf32>
    %31 = vector.shape_cast %30 : vector<1xf32> to vector<1x1x1xf32>
    %32 = vector.extract %31[0, 0, 0] : f32 from vector<1x1x1xf32>
    %cst_10 = arith.constant 0.000000e+00 : f32
    %33 = arith.subf %cst_10, %32 : f32
    %cst_11 = arith.constant 2.000000e+00 : f32
    %34 = arith.divf %33, %cst_11 : f32
    %cst_12 = arith.constant 1.000000e+00 : f32
    %35 = vector.broadcast %cst_12 : f32 to vector<1x1xf32>
    %36 = vector.broadcast %34 : f32 to vector<1x1xf32>
    %37 = arith.mulf %36, %35 : vector<1x1xf32>
    %c0_13 = arith.constant 0 : index
    %c0_14 = arith.constant 0 : index
    %38 = vector.load %arg3[%c0_13, %c0_14] : memref<1x1xf32, #tpu.memory_space<vmem>>, vector<1x1xf32>
    tpu.vector_store %arg3[%c0_13, %c0_14], %37 {strides = array<i32>} : memref<1x1xf32, #tpu.memory_space<vmem>>, vector<1x1xf32>,
    return
  }
  func.func @transform_0(%arg0: i32) -> (i32, i32) {
    %c0_i32 = arith.constant 0 : i32
    %c0_i32_0 = arith.constant 0 : i32
    %c0_i32_1 = arith.constant 0 : i32
    return %c0_i32, %c0_i32_0 : i32, i32
  }
  func.func @transform_1(%arg0: i32) -> (i32, i32) {
    %c0_i32 = arith.constant 0 : i32
    %c0_i32_0 = arith.constant 0 : i32
    %c0_i32_1 = arith.constant 0 : i32
    return %c0_i32, %c0_i32_0 : i32, i32
  }
  func.func @transform_2(%arg0: i32) -> (i32, i32) {
    %c0_i32 = arith.constant 0 : i32
    %c0_i32_0 = arith.constant 0 : i32
    %c0_i32_1 = arith.constant 0 : i32
    return %c0_i32, %c0_i32_0 : i32, i32
  }
}

module attributes {stable_mosaic.version = 11 : i64} {
  func.func @_block_kernel(%arg0: i32, %arg1: memref<1x16x32xf32, #tpu.memory_space<vmem>>, %arg2: memref<1x32xf32, #tpu.memory_space<vmem>>, %arg3: memref<1x32xf32, #tpu.memory_space<vmem>>, %arg4: memref<4x32x8xf32, #tpu.memory_space<vmem>>, %arg5: memref<4x1x8xf32, #tpu.memory_space<vmem>>, %arg6: memref<4x32x8xf32, #tpu.memory_space<vmem>>, %arg7: memref<4x1x8xf32, #tpu.memory_space<vmem>>, %arg8: memref<4x32x8xf32, #tpu.memory_space<vmem>>, %arg9: memref<4x1x8xf32, #tpu.memory_space<vmem>>, %arg10: memref<4x8x32xf32, #tpu.memory_space<vmem>>, %arg11: memref<1x32xf32, #tpu.memory_space<vmem>>, %arg12: memref<1x32xf32, #tpu.memory_space<vmem>>, %arg13: memref<1x32xf32, #tpu.memory_space<vmem>>, %arg14: memref<32x64xf32, #tpu.memory_space<vmem>>, %arg15: memref<1x64xf32, #tpu.memory_space<vmem>>, %arg16: memref<64x32xf32, #tpu.memory_space<vmem>>, %arg17: memref<1x32xf32, #tpu.memory_space<vmem>>, %arg18: memref<1x16x32xf32, #tpu.memory_space<vmem>>) attributes {dimension_semantics = [#tpu.dimension_semantics<parallel>], iteration_bounds = array<i64: 2>, scalar_prefetch = 0 : i64, scratch_operands = 0 : i64, tpu.core_type = #tpu.core_type<tc>, window_params = [{transform_indices = @transform_0, window_bounds = array<i64: 1, 16, 32>}, {pipeline_mode = #tpu.pipeline_mode<synchronous>, transform_indices = @transform_1, window_bounds = array<i64: 1, 32>}, {pipeline_mode = #tpu.pipeline_mode<synchronous>, transform_indices = @transform_2, window_bounds = array<i64: 1, 32>}, {pipeline_mode = #tpu.pipeline_mode<synchronous>, transform_indices = @transform_3, window_bounds = array<i64: 4, 32, 8>}, {pipeline_mode = #tpu.pipeline_mode<synchronous>, transform_indices = @transform_4, window_bounds = array<i64: 4, 1, 8>}, {pipeline_mode = #tpu.pipeline_mode<synchronous>, transform_indices = @transform_5, window_bounds = array<i64: 4, 32, 8>}, {pipeline_mode = #tpu.pipeline_mode<synchronous>, transform_indices = @transform_6, window_bounds = array<i64: 4, 1, 8>}, {pipeline_mode = #tpu.pipeline_mode<synchronous>, transform_indices = @transform_7, window_bounds = array<i64: 4, 32, 8>}, {pipeline_mode = #tpu.pipeline_mode<synchronous>, transform_indices = @transform_8, window_bounds = array<i64: 4, 1, 8>}, {pipeline_mode = #tpu.pipeline_mode<synchronous>, transform_indices = @transform_9, window_bounds = array<i64: 4, 8, 32>}, {pipeline_mode = #tpu.pipeline_mode<synchronous>, transform_indices = @transform_10, window_bounds = array<i64: 1, 32>}, {pipeline_mode = #tpu.pipeline_mode<synchronous>, transform_indices = @transform_11, window_bounds = array<i64: 1, 32>}, {pipeline_mode = #tpu.pipeline_mode<synchronous>, transform_indices = @transform_12, window_bounds = array<i64: 1, 32>}, {pipeline_mode = #tpu.pipeline_mode<synchronous>, transform_indices = @transform_13, window_bounds = array<i64: 32, 64>}, {pipeline_mode = #tpu.pipeline_mode<synchronous>, transform_indices = @transform_14, window_bounds = array<i64: 1, 64>}, {pipeline_mode = #tpu.pipeline_mode<synchronous>, transform_indices = @transform_15, window_bounds = array<i64: 64, 32>}, {pipeline_mode = #tpu.pipeline_mode<synchronous>, transform_indices = @transform_16, window_bounds = array<i64: 1, 32>}, {transform_indices = @transform_17, window_bounds = array<i64: 1, 16, 32>}]} {
    %c0 = arith.constant 0 : index
    %c0_0 = arith.constant 0 : index
    %c0_1 = arith.constant 0 : index
    %0 = vector.load %arg1[%c0, %c0_0, %c0_1] : memref<1x16x32xf32, #tpu.memory_space<vmem>>, vector<1x16x32xf32>
    %1 = vector.shape_cast %0 : vector<1x16x32xf32> to vector<16x32xf32>
    %c0_2 = arith.constant 0 : index
    %c0_3 = arith.constant 0 : index
    %2 = vector.load %arg2[%c0_2, %c0_3] : memref<1x32xf32, #tpu.memory_space<vmem>>, vector<1x32xf32>
    %c0_4 = arith.constant 0 : index
    %c0_5 = arith.constant 0 : index
    %3 = vector.load %arg3[%c0_4, %c0_5] : memref<1x32xf32, #tpu.memory_space<vmem>>, vector<1x32xf32>
    %cst = arith.constant dense<0.000000e+00> : vector<16xf32>
    %4 = vector.multi_reduction <add>, %1, %cst [1] : vector<16x32xf32> to vector<16xf32>
    %5 = vector.shape_cast %4 : vector<16xf32> to vector<16x1xf32>
    %cst_6 = arith.constant 3.200000e+01 : f32
    %6 = vector.broadcast %cst_6 : f32 to vector<16x1xf32>
    %7 = arith.divf %5, %6 : vector<16x1xf32>
    %8 = vector.broadcast %7 : vector<16x1xf32> to vector<16x32xf32>
    %9 = arith.subf %1, %8 : vector<16x32xf32>
    %10 = arith.mulf %9, %9 : vector<16x32xf32>
    %cst_7 = arith.constant dense<0.000000e+00> : vector<16xf32>
    %11 = vector.multi_reduction <add>, %10, %cst_7 [1] : vector<16x32xf32> to vector<16xf32>
    %12 = vector.shape_cast %11 : vector<16xf32> to vector<16x1xf32>
    %cst_8 = arith.constant 3.200000e+01 : f32
    %13 = vector.broadcast %cst_8 : f32 to vector<16x1xf32>
    %14 = arith.divf %12, %13 : vector<16x1xf32>
    %cst_9 = arith.constant 9.99999974E-6 : f32
    %15 = vector.broadcast %cst_9 : f32 to vector<16x1xf32>
    %16 = arith.addf %14, %15 : vector<16x1xf32>
    %17 = math.rsqrt %16 : vector<16x1xf32>
    %18 = vector.broadcast %17 : vector<16x1xf32> to vector<16x32xf32>
    %19 = arith.mulf %9, %18 : vector<16x32xf32>
    %20 = vector.broadcast %2 : vector<1x32xf32> to vector<16x32xf32>
    %21 = arith.mulf %19, %20 : vector<16x32xf32>
    %22 = vector.broadcast %3 : vector<1x32xf32> to vector<16x32xf32>
    %23 = arith.addf %21, %22 : vector<16x32xf32>
    %cst_10 = arith.constant 0.000000e+00 : f32
    %24 = vector.broadcast %cst_10 : f32 to vector<16x32xf32>
    %c0_11 = arith.constant 0 : index
    %c0_12 = arith.constant 0 : index
    %c0_13 = arith.constant 0 : index
    %25 = vector.load %arg4[%c0_11, %c0_12, %c0_13] : memref<4x32x8xf32, #tpu.memory_space<vmem>>, vector<1x32x8xf32>
    %26 = vector.shape_cast %25 : vector<1x32x8xf32> to vector<32x8xf32>
    %cst_14 = arith.constant dense<0.000000e+00> : vector<16x8xf32>
    %27 = tpu.matmul %23, %26, %cst_14 {dimension_numbers = #tpu.dot_dimension_numbers<[1], [0], [0], [1], [0, 0, 1, 1], [], []>} : vector<16x32xf32>, vector<32x8xf32>, vector<16x8xf32> -> vector<16x8xf32>
    %c0_15 = arith.constant 0 : index
    %c0_16 = arith.constant 0 : index
    %c0_17 = arith.constant 0 : index
    %28 = vector.load %arg5[%c0_15, %c0_16, %c0_17] : memref<4x1x8xf32, #tpu.memory_space<vmem>>, vector<1x1x8xf32>
    %29 = vector.shape_cast %28 : vector<1x1x8xf32> to vector<1x8xf32>
    %30 = vector.broadcast %29 : vector<1x8xf32> to vector<16x8xf32>
    %31 = arith.addf %27, %30 : vector<16x8xf32>
    %c0_18 = arith.constant 0 : index
    %c0_19 = arith.constant 0 : index
    %c0_20 = arith.constant 0 : index
    %32 = vector.load %arg6[%c0_18, %c0_19, %c0_20] : memref<4x32x8xf32, #tpu.memory_space<vmem>>, vector<1x32x8xf32>
    %33 = vector.shape_cast %32 : vector<1x32x8xf32> to vector<32x8xf32>
    %cst_21 = arith.constant dense<0.000000e+00> : vector<16x8xf32>
    %34 = tpu.matmul %23, %33, %cst_21 {dimension_numbers = #tpu.dot_dimension_numbers<[1], [0], [0], [1], [0, 0, 1, 1], [], []>} : vector<16x32xf32>, vector<32x8xf32>, vector<16x8xf32> -> vector<16x8xf32>
    %c0_22 = arith.constant 0 : index
    %c0_23 = arith.constant 0 : index
    %c0_24 = arith.constant 0 : index
    %35 = vector.load %arg7[%c0_22, %c0_23, %c0_24] : memref<4x1x8xf32, #tpu.memory_space<vmem>>, vector<1x1x8xf32>
    %36 = vector.shape_cast %35 : vector<1x1x8xf32> to vector<1x8xf32>
    %37 = vector.broadcast %36 : vector<1x8xf32> to vector<16x8xf32>
    %38 = arith.addf %34, %37 : vector<16x8xf32>
    %c0_25 = arith.constant 0 : index
    %c0_26 = arith.constant 0 : index
    %c0_27 = arith.constant 0 : index
    %39 = vector.load %arg8[%c0_25, %c0_26, %c0_27] : memref<4x32x8xf32, #tpu.memory_space<vmem>>, vector<1x32x8xf32>
    %40 = vector.shape_cast %39 : vector<1x32x8xf32> to vector<32x8xf32>
    %cst_28 = arith.constant dense<0.000000e+00> : vector<16x8xf32>
    %41 = tpu.matmul %23, %40, %cst_28 {dimension_numbers = #tpu.dot_dimension_numbers<[1], [0], [0], [1], [0, 0, 1, 1], [], []>} : vector<16x32xf32>, vector<32x8xf32>, vector<16x8xf32> -> vector<16x8xf32>
    %c0_29 = arith.constant 0 : index
    %c0_30 = arith.constant 0 : index
    %c0_31 = arith.constant 0 : index
    %42 = vector.load %arg9[%c0_29, %c0_30, %c0_31] : memref<4x1x8xf32, #tpu.memory_space<vmem>>, vector<1x1x8xf32>
    %43 = vector.shape_cast %42 : vector<1x1x8xf32> to vector<1x8xf32>
    %44 = vector.broadcast %43 : vector<1x8xf32> to vector<16x8xf32>
    %45 = arith.addf %41, %44 : vector<16x8xf32>
    %cst_32 = arith.constant dense<0.000000e+00> : vector<16x16xf32>
    %46 = tpu.matmul %31, %38, %cst_32 {dimension_numbers = #tpu.dot_dimension_numbers<[1], [1], [0], [0], [0, 0, 1, 0], [], []>} : vector<16x8xf32>, vector<16x8xf32>, vector<16x16xf32> -> vector<16x16xf32>
    %cst_33 = arith.constant 0.353553385 : f32
    %47 = vector.broadcast %cst_33 : f32 to vector<16x16xf32>
    %48 = arith.mulf %46, %47 : vector<16x16xf32>
    %cst_34 = arith.constant dense<0xFF800000> : vector<16xf32>
    %49 = vector.multi_reduction <maximumf>, %48, %cst_34 [1] : vector<16x16xf32> to vector<16xf32>
    %50 = vector.shape_cast %49 : vector<16xf32> to vector<16x1xf32>
    %51 = vector.broadcast %50 : vector<16x1xf32> to vector<16x16xf32>
    %52 = arith.subf %48, %51 : vector<16x16xf32>
    %53 = math.exp %52 : vector<16x16xf32>
    %cst_35 = arith.constant dense<0.000000e+00> : vector<16xf32>
    %54 = vector.multi_reduction <add>, %53, %cst_35 [1] : vector<16x16xf32> to vector<16xf32>
    %55 = vector.shape_cast %54 : vector<16xf32> to vector<16x1xf32>
    %56 = tpu.reciprocal %55 {approx = true} : vector<16x1xf32> -> vector<16x1xf32>
    %57 = vector.broadcast %56 : vector<16x1xf32> to vector<16x16xf32>
    %58 = arith.mulf %53, %57 : vector<16x16xf32>
    %cst_36 = arith.constant dense<0.000000e+00> : vector<16x8xf32>
    %59 = tpu.matmul %58, %45, %cst_36 {dimension_numbers = #tpu.dot_dimension_numbers<[1], [0], [0], [1], [0, 0, 1, 1], [], []>} : vector<16x16xf32>, vector<16x8xf32>, vector<16x8xf32> -> vector<16x8xf32>
    %c0_37 = arith.constant 0 : index
    %c0_38 = arith.constant 0 : index
    %c0_39 = arith.constant 0 : index
    %60 = vector.load %arg10[%c0_37, %c0_38, %c0_39] : memref<4x8x32xf32, #tpu.memory_space<vmem>>, vector<1x8x32xf32>
    %61 = vector.shape_cast %60 : vector<1x8x32xf32> to vector<8x32xf32>
    %cst_40 = arith.constant dense<0.000000e+00> : vector<16x32xf32>
    %62 = tpu.matmul %59, %61, %cst_40 {dimension_numbers = #tpu.dot_dimension_numbers<[1], [0], [0], [1], [0, 0, 1, 1], [], []>} : vector<16x8xf32>, vector<8x32xf32>, vector<16x32xf32> -> vector<16x32xf32>
    %63 = arith.addf %24, %62 : vector<16x32xf32>
    %c1 = arith.constant 1 : index
    %c0_41 = arith.constant 0 : index
    %c0_42 = arith.constant 0 : index
    %64 = vector.load %arg4[%c1, %c0_41, %c0_42] : memref<4x32x8xf32, #tpu.memory_space<vmem>>, vector<1x32x8xf32>
    %65 = vector.shape_cast %64 : vector<1x32x8xf32> to vector<32x8xf32>
    %cst_43 = arith.constant dense<0.000000e+00> : vector<16x8xf32>
    %66 = tpu.matmul %23, %65, %cst_43 {dimension_numbers = #tpu.dot_dimension_numbers<[1], [0], [0], [1], [0, 0, 1, 1], [], []>} : vector<16x32xf32>, vector<32x8xf32>, vector<16x8xf32> -> vector<16x8xf32>
    %c1_44 = arith.constant 1 : index
    %c0_45 = arith.constant 0 : index
    %c0_46 = arith.constant 0 : index
    %67 = vector.load %arg5[%c1_44, %c0_45, %c0_46] : memref<4x1x8xf32, #tpu.memory_space<vmem>>, vector<1x1x8xf32>
    %68 = vector.shape_cast %67 : vector<1x1x8xf32> to vector<1x8xf32>
    %69 = vector.broadcast %68 : vector<1x8xf32> to vector<16x8xf32>
    %70 = arith.addf %66, %69 : vector<16x8xf32>
    %c1_47 = arith.constant 1 : index
    %c0_48 = arith.constant 0 : index
    %c0_49 = arith.constant 0 : index
    %71 = vector.load %arg6[%c1_47, %c0_48, %c0_49] : memref<4x32x8xf32, #tpu.memory_space<vmem>>, vector<1x32x8xf32>
    %72 = vector.shape_cast %71 : vector<1x32x8xf32> to vector<32x8xf32>
    %cst_50 = arith.constant dense<0.000000e+00> : vector<16x8xf32>
    %73 = tpu.matmul %23, %72, %cst_50 {dimension_numbers = #tpu.dot_dimension_numbers<[1], [0], [0], [1], [0, 0, 1, 1], [], []>} : vector<16x32xf32>, vector<32x8xf32>, vector<16x8xf32> -> vector<16x8xf32>
    %c1_51 = arith.constant 1 : index
    %c0_52 = arith.constant 0 : index
    %c0_53 = arith.constant 0 : index
    %74 = vector.load %arg7[%c1_51, %c0_52, %c0_53] : memref<4x1x8xf32, #tpu.memory_space<vmem>>, vector<1x1x8xf32>
    %75 = vector.shape_cast %74 : vector<1x1x8xf32> to vector<1x8xf32>
    %76 = vector.broadcast %75 : vector<1x8xf32> to vector<16x8xf32>
    %77 = arith.addf %73, %76 : vector<16x8xf32>
    %c1_54 = arith.constant 1 : index
    %c0_55 = arith.constant 0 : index
    %c0_56 = arith.constant 0 : index
    %78 = vector.load %arg8[%c1_54, %c0_55, %c0_56] : memref<4x32x8xf32, #tpu.memory_space<vmem>>, vector<1x32x8xf32>
    %79 = vector.shape_cast %78 : vector<1x32x8xf32> to vector<32x8xf32>
    %cst_57 = arith.constant dense<0.000000e+00> : vector<16x8xf32>
    %80 = tpu.matmul %23, %79, %cst_57 {dimension_numbers = #tpu.dot_dimension_numbers<[1], [0], [0], [1], [0, 0, 1, 1], [], []>} : vector<16x32xf32>, vector<32x8xf32>, vector<16x8xf32> -> vector<16x8xf32>
    %c1_58 = arith.constant 1 : index
    %c0_59 = arith.constant 0 : index
    %c0_60 = arith.constant 0 : index
    %81 = vector.load %arg9[%c1_58, %c0_59, %c0_60] : memref<4x1x8xf32, #tpu.memory_space<vmem>>, vector<1x1x8xf32>
    %82 = vector.shape_cast %81 : vector<1x1x8xf32> to vector<1x8xf32>
    %83 = vector.broadcast %82 : vector<1x8xf32> to vector<16x8xf32>
    %84 = arith.addf %80, %83 : vector<16x8xf32>
    %cst_61 = arith.constant dense<0.000000e+00> : vector<16x16xf32>
    %85 = tpu.matmul %70, %77, %cst_61 {dimension_numbers = #tpu.dot_dimension_numbers<[1], [1], [0], [0], [0, 0, 1, 0], [], []>} : vector<16x8xf32>, vector<16x8xf32>, vector<16x16xf32> -> vector<16x16xf32>
    %cst_62 = arith.constant 0.353553385 : f32
    %86 = vector.broadcast %cst_62 : f32 to vector<16x16xf32>
    %87 = arith.mulf %85, %86 : vector<16x16xf32>
    %cst_63 = arith.constant dense<0xFF800000> : vector<16xf32>
    %88 = vector.multi_reduction <maximumf>, %87, %cst_63 [1] : vector<16x16xf32> to vector<16xf32>
    %89 = vector.shape_cast %88 : vector<16xf32> to vector<16x1xf32>
    %90 = vector.broadcast %89 : vector<16x1xf32> to vector<16x16xf32>
    %91 = arith.subf %87, %90 : vector<16x16xf32>
    %92 = math.exp %91 : vector<16x16xf32>
    %cst_64 = arith.constant dense<0.000000e+00> : vector<16xf32>
    %93 = vector.multi_reduction <add>, %92, %cst_64 [1] : vector<16x16xf32> to vector<16xf32>
    %94 = vector.shape_cast %93 : vector<16xf32> to vector<16x1xf32>
    %95 = tpu.reciprocal %94 {approx = true} : vector<16x1xf32> -> vector<16x1xf32>
    %96 = vector.broadcast %95 : vector<16x1xf32> to vector<16x16xf32>
    %97 = arith.mulf %92, %96 : vector<16x16xf32>
    %cst_65 = arith.constant dense<0.000000e+00> : vector<16x8xf32>
    %98 = tpu.matmul %97, %84, %cst_65 {dimension_numbers = #tpu.dot_dimension_numbers<[1], [0], [0], [1], [0, 0, 1, 1], [], []>} : vector<16x16xf32>, vector<16x8xf32>, vector<16x8xf32> -> vector<16x8xf32>
    %c1_66 = arith.constant 1 : index
    %c0_67 = arith.constant 0 : index
    %c0_68 = arith.constant 0 : index
    %99 = vector.load %arg10[%c1_66, %c0_67, %c0_68] : memref<4x8x32xf32, #tpu.memory_space<vmem>>, vector<1x8x32xf32>
    %100 = vector.shape_cast %99 : vector<1x8x32xf32> to vector<8x32xf32>
    %cst_69 = arith.constant dense<0.000000e+00> : vector<16x32xf32>
    %101 = tpu.matmul %98, %100, %cst_69 {dimension_numbers = #tpu.dot_dimension_numbers<[1], [0], [0], [1], [0, 0, 1, 1], [], []>} : vector<16x8xf32>, vector<8x32xf32>, vector<16x32xf32> -> vector<16x32xf32>
    %102 = arith.addf %63, %101 : vector<16x32xf32>
    %c2 = arith.constant 2 : index
    %c0_70 = arith.constant 0 : index
    %c0_71 = arith.constant 0 : index
    %103 = vector.load %arg4[%c2, %c0_70, %c0_71] : memref<4x32x8xf32, #tpu.memory_space<vmem>>, vector<1x32x8xf32>
    %104 = vector.shape_cast %103 : vector<1x32x8xf32> to vector<32x8xf32>
    %cst_72 = arith.constant dense<0.000000e+00> : vector<16x8xf32>
    %105 = tpu.matmul %23, %104, %cst_72 {dimension_numbers = #tpu.dot_dimension_numbers<[1], [0], [0], [1], [0, 0, 1, 1], [], []>} : vector<16x32xf32>, vector<32x8xf32>, vector<16x8xf32> -> vector<16x8xf32>
    %c2_73 = arith.constant 2 : index
    %c0_74 = arith.constant 0 : index
    %c0_75 = arith.constant 0 : index
    %106 = vector.load %arg5[%c2_73, %c0_74, %c0_75] : memref<4x1x8xf32, #tpu.memory_space<vmem>>, vector<1x1x8xf32>
    %107 = vector.shape_cast %106 : vector<1x1x8xf32> to vector<1x8xf32>
    %108 = vector.broadcast %107 : vector<1x8xf32> to vector<16x8xf32>
    %109 = arith.addf %105, %108 : vector<16x8xf32>
    %c2_76 = arith.constant 2 : index
    %c0_77 = arith.constant 0 : index
    %c0_78 = arith.constant 0 : index
    %110 = vector.load %arg6[%c2_76, %c0_77, %c0_78] : memref<4x32x8xf32, #tpu.memory_space<vmem>>, vector<1x32x8xf32>
    %111 = vector.shape_cast %110 : vector<1x32x8xf32> to vector<32x8xf32>
    %cst_79 = arith.constant dense<0.000000e+00> : vector<16x8xf32>
    %112 = tpu.matmul %23, %111, %cst_79 {dimension_numbers = #tpu.dot_dimension_numbers<[1], [0], [0], [1], [0, 0, 1, 1], [], []>} : vector<16x32xf32>, vector<32x8xf32>, vector<16x8xf32> -> vector<16x8xf32>
    %c2_80 = arith.constant 2 : index
    %c0_81 = arith.constant 0 : index
    %c0_82 = arith.constant 0 : index
    %113 = vector.load %arg7[%c2_80, %c0_81, %c0_82] : memref<4x1x8xf32, #tpu.memory_space<vmem>>, vector<1x1x8xf32>
    %114 = vector.shape_cast %113 : vector<1x1x8xf32> to vector<1x8xf32>
    %115 = vector.broadcast %114 : vector<1x8xf32> to vector<16x8xf32>
    %116 = arith.addf %112, %115 : vector<16x8xf32>
    %c2_83 = arith.constant 2 : index
    %c0_84 = arith.constant 0 : index
    %c0_85 = arith.constant 0 : index
    %117 = vector.load %arg8[%c2_83, %c0_84, %c0_85] : memref<4x32x8xf32, #tpu.memory_space<vmem>>, vector<1x32x8xf32>
    %118 = vector.shape_cast %117 : vector<1x32x8xf32> to vector<32x8xf32>
    %cst_86 = arith.constant dense<0.000000e+00> : vector<16x8xf32>
    %119 = tpu.matmul %23, %118, %cst_86 {dimension_numbers = #tpu.dot_dimension_numbers<[1], [0], [0], [1], [0, 0, 1, 1], [], []>} : vector<16x32xf32>, vector<32x8xf32>, vector<16x8xf32> -> vector<16x8xf32>
    %c2_87 = arith.constant 2 : index
    %c0_88 = arith.constant 0 : index
    %c0_89 = arith.constant 0 : index
    %120 = vector.load %arg9[%c2_87, %c0_88, %c0_89] : memref<4x1x8xf32, #tpu.memory_space<vmem>>, vector<1x1x8xf32>
    %121 = vector.shape_cast %120 : vector<1x1x8xf32> to vector<1x8xf32>
    %122 = vector.broadcast %121 : vector<1x8xf32> to vector<16x8xf32>
    %123 = arith.addf %119, %122 : vector<16x8xf32>
    %cst_90 = arith.constant dense<0.000000e+00> : vector<16x16xf32>
    %124 = tpu.matmul %109, %116, %cst_90 {dimension_numbers = #tpu.dot_dimension_numbers<[1], [1], [0], [0], [0, 0, 1, 0], [], []>} : vector<16x8xf32>, vector<16x8xf32>, vector<16x16xf32> -> vector<16x16xf32>
    %cst_91 = arith.constant 0.353553385 : f32
    %125 = vector.broadcast %cst_91 : f32 to vector<16x16xf32>
    %126 = arith.mulf %124, %125 : vector<16x16xf32>
    %cst_92 = arith.constant dense<0xFF800000> : vector<16xf32>
    %127 = vector.multi_reduction <maximumf>, %126, %cst_92 [1] : vector<16x16xf32> to vector<16xf32>
    %128 = vector.shape_cast %127 : vector<16xf32> to vector<16x1xf32>
    %129 = vector.broadcast %128 : vector<16x1xf32> to vector<16x16xf32>
    %130 = arith.subf %126, %129 : vector<16x16xf32>
    %131 = math.exp %130 : vector<16x16xf32>
    %cst_93 = arith.constant dense<0.000000e+00> : vector<16xf32>
    %132 = vector.multi_reduction <add>, %131, %cst_93 [1] : vector<16x16xf32> to vector<16xf32>
    %133 = vector.shape_cast %132 : vector<16xf32> to vector<16x1xf32>
    %134 = tpu.reciprocal %133 {approx = true} : vector<16x1xf32> -> vector<16x1xf32>
    %135 = vector.broadcast %134 : vector<16x1xf32> to vector<16x16xf32>
    %136 = arith.mulf %131, %135 : vector<16x16xf32>
    %cst_94 = arith.constant dense<0.000000e+00> : vector<16x8xf32>
    %137 = tpu.matmul %136, %123, %cst_94 {dimension_numbers = #tpu.dot_dimension_numbers<[1], [0], [0], [1], [0, 0, 1, 1], [], []>} : vector<16x16xf32>, vector<16x8xf32>, vector<16x8xf32> -> vector<16x8xf32>
    %c2_95 = arith.constant 2 : index
    %c0_96 = arith.constant 0 : index
    %c0_97 = arith.constant 0 : index
    %138 = vector.load %arg10[%c2_95, %c0_96, %c0_97] : memref<4x8x32xf32, #tpu.memory_space<vmem>>, vector<1x8x32xf32>
    %139 = vector.shape_cast %138 : vector<1x8x32xf32> to vector<8x32xf32>
    %cst_98 = arith.constant dense<0.000000e+00> : vector<16x32xf32>
    %140 = tpu.matmul %137, %139, %cst_98 {dimension_numbers = #tpu.dot_dimension_numbers<[1], [0], [0], [1], [0, 0, 1, 1], [], []>} : vector<16x8xf32>, vector<8x32xf32>, vector<16x32xf32> -> vector<16x32xf32>
    %141 = arith.addf %102, %140 : vector<16x32xf32>
    %c3 = arith.constant 3 : index
    %c0_99 = arith.constant 0 : index
    %c0_100 = arith.constant 0 : index
    %142 = vector.load %arg4[%c3, %c0_99, %c0_100] : memref<4x32x8xf32, #tpu.memory_space<vmem>>, vector<1x32x8xf32>
    %143 = vector.shape_cast %142 : vector<1x32x8xf32> to vector<32x8xf32>
    %cst_101 = arith.constant dense<0.000000e+00> : vector<16x8xf32>
    %144 = tpu.matmul %23, %143, %cst_101 {dimension_numbers = #tpu.dot_dimension_numbers<[1], [0], [0], [1], [0, 0, 1, 1], [], []>} : vector<16x32xf32>, vector<32x8xf32>, vector<16x8xf32> -> vector<16x8xf32>
    %c3_102 = arith.constant 3 : index
    %c0_103 = arith.constant 0 : index
    %c0_104 = arith.constant 0 : index
    %145 = vector.load %arg5[%c3_102, %c0_103, %c0_104] : memref<4x1x8xf32, #tpu.memory_space<vmem>>, vector<1x1x8xf32>
    %146 = vector.shape_cast %145 : vector<1x1x8xf32> to vector<1x8xf32>
    %147 = vector.broadcast %146 : vector<1x8xf32> to vector<16x8xf32>
    %148 = arith.addf %144, %147 : vector<16x8xf32>
    %c3_105 = arith.constant 3 : index
    %c0_106 = arith.constant 0 : index
    %c0_107 = arith.constant 0 : index
    %149 = vector.load %arg6[%c3_105, %c0_106, %c0_107] : memref<4x32x8xf32, #tpu.memory_space<vmem>>, vector<1x32x8xf32>
    %150 = vector.shape_cast %149 : vector<1x32x8xf32> to vector<32x8xf32>
    %cst_108 = arith.constant dense<0.000000e+00> : vector<16x8xf32>
    %151 = tpu.matmul %23, %150, %cst_108 {dimension_numbers = #tpu.dot_dimension_numbers<[1], [0], [0], [1], [0, 0, 1, 1], [], []>} : vector<16x32xf32>, vector<32x8xf32>, vector<16x8xf32> -> vector<16x8xf32>
    %c3_109 = arith.constant 3 : index
    %c0_110 = arith.constant 0 : index
    %c0_111 = arith.constant 0 : index
    %152 = vector.load %arg7[%c3_109, %c0_110, %c0_111] : memref<4x1x8xf32, #tpu.memory_space<vmem>>, vector<1x1x8xf32>
    %153 = vector.shape_cast %152 : vector<1x1x8xf32> to vector<1x8xf32>
    %154 = vector.broadcast %153 : vector<1x8xf32> to vector<16x8xf32>
    %155 = arith.addf %151, %154 : vector<16x8xf32>
    %c3_112 = arith.constant 3 : index
    %c0_113 = arith.constant 0 : index
    %c0_114 = arith.constant 0 : index
    %156 = vector.load %arg8[%c3_112, %c0_113, %c0_114] : memref<4x32x8xf32, #tpu.memory_space<vmem>>, vector<1x32x8xf32>
    %157 = vector.shape_cast %156 : vector<1x32x8xf32> to vector<32x8xf32>
    %cst_115 = arith.constant dense<0.000000e+00> : vector<16x8xf32>
    %158 = tpu.matmul %23, %157, %cst_115 {dimension_numbers = #tpu.dot_dimension_numbers<[1], [0], [0], [1], [0, 0, 1, 1], [], []>} : vector<16x32xf32>, vector<32x8xf32>, vector<16x8xf32> -> vector<16x8xf32>
    %c3_116 = arith.constant 3 : index
    %c0_117 = arith.constant 0 : index
    %c0_118 = arith.constant 0 : index
    %159 = vector.load %arg9[%c3_116, %c0_117, %c0_118] : memref<4x1x8xf32, #tpu.memory_space<vmem>>, vector<1x1x8xf32>
    %160 = vector.shape_cast %159 : vector<1x1x8xf32> to vector<1x8xf32>
    %161 = vector.broadcast %160 : vector<1x8xf32> to vector<16x8xf32>
    %162 = arith.addf %158, %161 : vector<16x8xf32>
    %cst_119 = arith.constant dense<0.000000e+00> : vector<16x16xf32>
    %163 = tpu.matmul %148, %155, %cst_119 {dimension_numbers = #tpu.dot_dimension_numbers<[1], [1], [0], [0], [0, 0, 1, 0], [], []>} : vector<16x8xf32>, vector<16x8xf32>, vector<16x16xf32> -> vector<16x16xf32>
    %cst_120 = arith.constant 0.353553385 : f32
    %164 = vector.broadcast %cst_120 : f32 to vector<16x16xf32>
    %165 = arith.mulf %163, %164 : vector<16x16xf32>
    %cst_121 = arith.constant dense<0xFF800000> : vector<16xf32>
    %166 = vector.multi_reduction <maximumf>, %165, %cst_121 [1] : vector<16x16xf32> to vector<16xf32>
    %167 = vector.shape_cast %166 : vector<16xf32> to vector<16x1xf32>
    %168 = vector.broadcast %167 : vector<16x1xf32> to vector<16x16xf32>
    %169 = arith.subf %165, %168 : vector<16x16xf32>
    %170 = math.exp %169 : vector<16x16xf32>
    %cst_122 = arith.constant dense<0.000000e+00> : vector<16xf32>
    %171 = vector.multi_reduction <add>, %170, %cst_122 [1] : vector<16x16xf32> to vector<16xf32>
    %172 = vector.shape_cast %171 : vector<16xf32> to vector<16x1xf32>
    %173 = tpu.reciprocal %172 {approx = true} : vector<16x1xf32> -> vector<16x1xf32>
    %174 = vector.broadcast %173 : vector<16x1xf32> to vector<16x16xf32>
    %175 = arith.mulf %170, %174 : vector<16x16xf32>
    %cst_123 = arith.constant dense<0.000000e+00> : vector<16x8xf32>
    %176 = tpu.matmul %175, %162, %cst_123 {dimension_numbers = #tpu.dot_dimension_numbers<[1], [0], [0], [1], [0, 0, 1, 1], [], []>} : vector<16x16xf32>, vector<16x8xf32>, vector<16x8xf32> -> vector<16x8xf32>
    %c3_124 = arith.constant 3 : index
    %c0_125 = arith.constant 0 : index
    %c0_126 = arith.constant 0 : index
    %177 = vector.load %arg10[%c3_124, %c0_125, %c0_126] : memref<4x8x32xf32, #tpu.memory_space<vmem>>, vector<1x8x32xf32>
    %178 = vector.shape_cast %177 : vector<1x8x32xf32> to vector<8x32xf32>
    %cst_127 = arith.constant dense<0.000000e+00> : vector<16x32xf32>
    %179 = tpu.matmul %176, %178, %cst_127 {dimension_numbers = #tpu.dot_dimension_numbers<[1], [0], [0], [1], [0, 0, 1, 1], [], []>} : vector<16x8xf32>, vector<8x32xf32>, vector<16x32xf32> -> vector<16x32xf32>
    %180 = arith.addf %141, %179 : vector<16x32xf32>
    %181 = arith.addf %1, %180 : vector<16x32xf32>
    %c0_128 = arith.constant 0 : index
    %c0_129 = arith.constant 0 : index
    %182 = vector.load %arg11[%c0_128, %c0_129] : memref<1x32xf32, #tpu.memory_space<vmem>>, vector<1x32xf32>
    %183 = vector.broadcast %182 : vector<1x32xf32> to vector<16x32xf32>
    %184 = arith.addf %181, %183 : vector<16x32xf32>
    %c0_130 = arith.constant 0 : index
    %c0_131 = arith.constant 0 : index
    %185 = vector.load %arg12[%c0_130, %c0_131] : memref<1x32xf32, #tpu.memory_space<vmem>>, vector<1x32xf32>
    %c0_132 = arith.constant 0 : index
    %c0_133 = arith.constant 0 : index
    %186 = vector.load %arg13[%c0_132, %c0_133] : memref<1x32xf32, #tpu.memory_space<vmem>>, vector<1x32xf32>
    %cst_134 = arith.constant dense<0.000000e+00> : vector<16xf32>
    %187 = vector.multi_reduction <add>, %184, %cst_134 [1] : vector<16x32xf32> to vector<16xf32>
    %188 = vector.shape_cast %187 : vector<16xf32> to vector<16x1xf32>
    %cst_135 = arith.constant 3.200000e+01 : f32
    %189 = vector.broadcast %cst_135 : f32 to vector<16x1xf32>
    %190 = arith.divf %188, %189 : vector<16x1xf32>
    %191 = vector.broadcast %190 : vector<16x1xf32> to vector<16x32xf32>
    %192 = arith.subf %184, %191 : vector<16x32xf32>
    %193 = arith.mulf %192, %192 : vector<16x32xf32>
    %cst_136 = arith.constant dense<0.000000e+00> : vector<16xf32>
    %194 = vector.multi_reduction <add>, %193, %cst_136 [1] : vector<16x32xf32> to vector<16xf32>
    %195 = vector.shape_cast %194 : vector<16xf32> to vector<16x1xf32>
    %cst_137 = arith.constant 3.200000e+01 : f32
    %196 = vector.broadcast %cst_137 : f32 to vector<16x1xf32>
    %197 = arith.divf %195, %196 : vector<16x1xf32>
    %cst_138 = arith.constant 9.99999974E-6 : f32
    %198 = vector.broadcast %cst_138 : f32 to vector<16x1xf32>
    %199 = arith.addf %197, %198 : vector<16x1xf32>
    %200 = math.rsqrt %199 : vector<16x1xf32>
    %201 = vector.broadcast %200 : vector<16x1xf32> to vector<16x32xf32>
    %202 = arith.mulf %192, %201 : vector<16x32xf32>
    %203 = vector.broadcast %185 : vector<1x32xf32> to vector<16x32xf32>
    %204 = arith.mulf %202, %203 : vector<16x32xf32>
    %205 = vector.broadcast %186 : vector<1x32xf32> to vector<16x32xf32>
    %206 = arith.addf %204, %205 : vector<16x32xf32>
    %c0_139 = arith.constant 0 : index
    %c0_140 = arith.constant 0 : index
    %207 = vector.load %arg14[%c0_139, %c0_140] : memref<32x64xf32, #tpu.memory_space<vmem>>, vector<32x64xf32>
    %cst_141 = arith.constant dense<0.000000e+00> : vector<16x64xf32>
    %208 = tpu.matmul %206, %207, %cst_141 {dimension_numbers = #tpu.dot_dimension_numbers<[1], [0], [0], [1], [0, 0, 1, 1], [], []>} : vector<16x32xf32>, vector<32x64xf32>, vector<16x64xf32> -> vector<16x64xf32>
    %c0_142 = arith.constant 0 : index
    %c0_143 = arith.constant 0 : index
    %209 = vector.load %arg15[%c0_142, %c0_143] : memref<1x64xf32, #tpu.memory_space<vmem>>, vector<1x64xf32>
    %210 = vector.broadcast %209 : vector<1x64xf32> to vector<16x64xf32>
    %211 = arith.addf %208, %210 : vector<16x64xf32>
    %212 = arith.mulf %211, %211 : vector<16x64xf32>
    %213 = arith.mulf %211, %212 : vector<16x64xf32>
    %cst_144 = arith.constant 4.471500e-02 : f32
    %214 = vector.broadcast %cst_144 : f32 to vector<16x64xf32>
    %215 = arith.mulf %214, %213 : vector<16x64xf32>
    %216 = arith.addf %211, %215 : vector<16x64xf32>
    %cst_145 = arith.constant 0.797884583 : f32
    %217 = vector.broadcast %cst_145 : f32 to vector<16x64xf32>
    %218 = arith.mulf %217, %216 : vector<16x64xf32>
    %219 = math.tanh %218 : vector<16x64xf32>
    %cst_146 = arith.constant 1.000000e+00 : f32
    %220 = vector.broadcast %cst_146 : f32 to vector<16x64xf32>
    %221 = arith.addf %220, %219 : vector<16x64xf32>
    %cst_147 = arith.constant 5.000000e-01 : f32
    %222 = vector.broadcast %cst_147 : f32 to vector<16x64xf32>
    %223 = arith.mulf %222, %221 : vector<16x64xf32>
    %224 = arith.mulf %211, %223 : vector<16x64xf32>
    %c0_148 = arith.constant 0 : index
    %c0_149 = arith.constant 0 : index
    %225 = vector.load %arg16[%c0_148, %c0_149] : memref<64x32xf32, #tpu.memory_space<vmem>>, vector<64x32xf32>
    %cst_150 = arith.constant dense<0.000000e+00> : vector<16x32xf32>
    %226 = tpu.matmul %224, %225, %cst_150 {dimension_numbers = #tpu.dot_dimension_numbers<[1], [0], [0], [1], [0, 0, 1, 1], [], []>} : vector<16x64xf32>, vector<64x32xf32>, vector<16x32xf32> -> vector<16x32xf32>
    %c0_151 = arith.constant 0 : index
    %c0_152 = arith.constant 0 : index
    %227 = vector.load %arg17[%c0_151, %c0_152] : memref<1x32xf32, #tpu.memory_space<vmem>>, vector<1x32xf32>
    %228 = vector.broadcast %227 : vector<1x32xf32> to vector<16x32xf32>
    %229 = arith.addf %226, %228 : vector<16x32xf32>
    %230 = arith.addf %184, %229 : vector<16x32xf32>
    %c0_153 = arith.constant 0 : index
    %c0_154 = arith.constant 0 : index
    %c0_155 = arith.constant 0 : index
    %231 = vector.load %arg18[%c0_153, %c0_154, %c0_155] : memref<1x16x32xf32, #tpu.memory_space<vmem>>, vector<1x16x32xf32>
    %232 = vector.shape_cast %231 : vector<1x16x32xf32> to vector<16x32xf32>
    %233 = vector.shape_cast %230 : vector<16x32xf32> to vector<1x16x32xf32>
    tpu.vector_store %arg18[%c0_153, %c0_154, %c0_155], %233 {strides = array<i32>} : memref<1x16x32xf32, #tpu.memory_space<vmem>>, vector<1x16x32xf32>,
    return
  }
  func.func @transform_0(%arg0: i32) -> (i32, i32, i32) {
    %c0_i32 = arith.constant 0 : i32
    %c0_i32_0 = arith.constant 0 : i32
    %c0_i32_1 = arith.constant 0 : i32
    return %arg0, %c0_i32, %c0_i32_0 : i32, i32, i32
  }
  func.func @transform_1(%arg0: i32) -> (i32, i32) {
    %c0_i32 = arith.constant 0 : i32
    %c0_i32_0 = arith.constant 0 : i32
    %c0_i32_1 = arith.constant 0 : i32
    return %c0_i32, %c0_i32_0 : i32, i32
  }
  func.func @transform_2(%arg0: i32) -> (i32, i32) {
    %c0_i32 = arith.constant 0 : i32
    %c0_i32_0 = arith.constant 0 : i32
    %c0_i32_1 = arith.constant 0 : i32
    return %c0_i32, %c0_i32_0 : i32, i32
  }
  func.func @transform_3(%arg0: i32) -> (i32, i32, i32) {
    %c0_i32 = arith.constant 0 : i32
    %c0_i32_0 = arith.constant 0 : i32
    %c0_i32_1 = arith.constant 0 : i32
    %c0_i32_2 = arith.constant 0 : i32
    return %c0_i32, %c0_i32_0, %c0_i32_1 : i32, i32, i32
  }
  func.func @transform_4(%arg0: i32) -> (i32, i32, i32) {
    %c0_i32 = arith.constant 0 : i32
    %c0_i32_0 = arith.constant 0 : i32
    %c0_i32_1 = arith.constant 0 : i32
    %c0_i32_2 = arith.constant 0 : i32
    return %c0_i32, %c0_i32_0, %c0_i32_1 : i32, i32, i32
  }
  func.func @transform_5(%arg0: i32) -> (i32, i32, i32) {
    %c0_i32 = arith.constant 0 : i32
    %c0_i32_0 = arith.constant 0 : i32
    %c0_i32_1 = arith.constant 0 : i32
    %c0_i32_2 = arith.constant 0 : i32
    return %c0_i32, %c0_i32_0, %c0_i32_1 : i32, i32, i32
  }
  func.func @transform_6(%arg0: i32) -> (i32, i32, i32) {
    %c0_i32 = arith.constant 0 : i32
    %c0_i32_0 = arith.constant 0 : i32
    %c0_i32_1 = arith.constant 0 : i32
    %c0_i32_2 = arith.constant 0 : i32
    return %c0_i32, %c0_i32_0, %c0_i32_1 : i32, i32, i32
  }
  func.func @transform_7(%arg0: i32) -> (i32, i32, i32) {
    %c0_i32 = arith.constant 0 : i32
    %c0_i32_0 = arith.constant 0 : i32
    %c0_i32_1 = arith.constant 0 : i32
    %c0_i32_2 = arith.constant 0 : i32
    return %c0_i32, %c0_i32_0, %c0_i32_1 : i32, i32, i32
  }
  func.func @transform_8(%arg0: i32) -> (i32, i32, i32) {
    %c0_i32 = arith.constant 0 : i32
    %c0_i32_0 = arith.constant 0 : i32
    %c0_i32_1 = arith.constant 0 : i32
    %c0_i32_2 = arith.constant 0 : i32
    return %c0_i32, %c0_i32_0, %c0_i32_1 : i32, i32, i32
  }
  func.func @transform_9(%arg0: i32) -> (i32, i32, i32) {
    %c0_i32 = arith.constant 0 : i32
    %c0_i32_0 = arith.constant 0 : i32
    %c0_i32_1 = arith.constant 0 : i32
    %c0_i32_2 = arith.constant 0 : i32
    return %c0_i32, %c0_i32_0, %c0_i32_1 : i32, i32, i32
  }
  func.func @transform_10(%arg0: i32) -> (i32, i32) {
    %c0_i32 = arith.constant 0 : i32
    %c0_i32_0 = arith.constant 0 : i32
    %c0_i32_1 = arith.constant 0 : i32
    return %c0_i32, %c0_i32_0 : i32, i32
  }
  func.func @transform_11(%arg0: i32) -> (i32, i32) {
    %c0_i32 = arith.constant 0 : i32
    %c0_i32_0 = arith.constant 0 : i32
    %c0_i32_1 = arith.constant 0 : i32
    return %c0_i32, %c0_i32_0 : i32, i32
  }
  func.func @transform_12(%arg0: i32) -> (i32, i32) {
    %c0_i32 = arith.constant 0 : i32
    %c0_i32_0 = arith.constant 0 : i32
    %c0_i32_1 = arith.constant 0 : i32
    return %c0_i32, %c0_i32_0 : i32, i32
  }
  func.func @transform_13(%arg0: i32) -> (i32, i32) {
    %c0_i32 = arith.constant 0 : i32
    %c0_i32_0 = arith.constant 0 : i32
    %c0_i32_1 = arith.constant 0 : i32
    return %c0_i32, %c0_i32_0 : i32, i32
  }
  func.func @transform_14(%arg0: i32) -> (i32, i32) {
    %c0_i32 = arith.constant 0 : i32
    %c0_i32_0 = arith.constant 0 : i32
    %c0_i32_1 = arith.constant 0 : i32
    return %c0_i32, %c0_i32_0 : i32, i32
  }
  func.func @transform_15(%arg0: i32) -> (i32, i32) {
    %c0_i32 = arith.constant 0 : i32
    %c0_i32_0 = arith.constant 0 : i32
    %c0_i32_1 = arith.constant 0 : i32
    return %c0_i32, %c0_i32_0 : i32, i32
  }
  func.func @transform_16(%arg0: i32) -> (i32, i32) {
    %c0_i32 = arith.constant 0 : i32
    %c0_i32_0 = arith.constant 0 : i32
    %c0_i32_1 = arith.constant 0 : i32
    return %c0_i32, %c0_i32_0 : i32, i32
  }
  func.func @transform_17(%arg0: i32) -> (i32, i32, i32) {
    %c0_i32 = arith.constant 0 : i32
    %c0_i32_0 = arith.constant 0 : i32
    %c0_i32_1 = arith.constant 0 : i32
    return %arg0, %c0_i32, %c0_i32_0 : i32, i32, i32
  }
}

module attributes {stable_mosaic.version = 11 : i64} {
  func.func @_dec_tail_kernel(%arg0: i32, %arg1: memref<32x32xf32, #tpu.memory_space<vmem>>, %arg2: memref<1x32xf32, #tpu.memory_space<vmem>>, %arg3: memref<1x32xf32, #tpu.memory_space<vmem>>, %arg4: memref<32x64xf32, #tpu.memory_space<vmem>>, %arg5: memref<1x64xf32, #tpu.memory_space<vmem>>, %arg6: memref<32x64xf32, #tpu.memory_space<vmem>>, %arg7: memref<1x32xf32, #tpu.memory_space<vmem>>, %arg8: memref<32x64xf32, #tpu.memory_space<vmem>>, %arg9: memref<1x1xf32, #tpu.memory_space<vmem>>) attributes {dimension_semantics = [#tpu.dimension_semantics<arbitrary>], iteration_bounds = array<i64: 1>, scalar_prefetch = 0 : i64, scratch_operands = 0 : i64, tpu.core_type = #tpu.core_type<tc>, window_params = [{pipeline_mode = #tpu.pipeline_mode<synchronous>, transform_indices = @transform_0, window_bounds = array<i64: 32, 32>}, {pipeline_mode = #tpu.pipeline_mode<synchronous>, transform_indices = @transform_1, window_bounds = array<i64: 1, 32>}, {pipeline_mode = #tpu.pipeline_mode<synchronous>, transform_indices = @transform_2, window_bounds = array<i64: 1, 32>}, {pipeline_mode = #tpu.pipeline_mode<synchronous>, transform_indices = @transform_3, window_bounds = array<i64: 32, 64>}, {pipeline_mode = #tpu.pipeline_mode<synchronous>, transform_indices = @transform_4, window_bounds = array<i64: 1, 64>}, {pipeline_mode = #tpu.pipeline_mode<synchronous>, transform_indices = @transform_5, window_bounds = array<i64: 32, 64>}, {pipeline_mode = #tpu.pipeline_mode<synchronous>, transform_indices = @transform_6, window_bounds = array<i64: 1, 32>}, {pipeline_mode = #tpu.pipeline_mode<synchronous>, transform_indices = @transform_7, window_bounds = array<i64: 32, 64>}, {pipeline_mode = #tpu.pipeline_mode<synchronous>, transform_indices = @transform_8, window_bounds = array<i64: 1, 1>}]} {
    %c0 = arith.constant 0 : index
    %c0_0 = arith.constant 0 : index
    %0 = vector.load %arg1[%c0, %c0_0] : memref<32x32xf32, #tpu.memory_space<vmem>>, vector<32x32xf32>
    %c0_1 = arith.constant 0 : index
    %c0_2 = arith.constant 0 : index
    %1 = vector.load %arg2[%c0_1, %c0_2] : memref<1x32xf32, #tpu.memory_space<vmem>>, vector<1x32xf32>
    %c0_3 = arith.constant 0 : index
    %c0_4 = arith.constant 0 : index
    %2 = vector.load %arg3[%c0_3, %c0_4] : memref<1x32xf32, #tpu.memory_space<vmem>>, vector<1x32xf32>
    %cst = arith.constant dense<0.000000e+00> : vector<32xf32>
    %3 = vector.multi_reduction <add>, %0, %cst [1] : vector<32x32xf32> to vector<32xf32>
    %4 = vector.shape_cast %3 : vector<32xf32> to vector<32x1xf32>
    %cst_5 = arith.constant 3.200000e+01 : f32
    %5 = vector.broadcast %cst_5 : f32 to vector<32x1xf32>
    %6 = arith.divf %4, %5 : vector<32x1xf32>
    %7 = vector.broadcast %6 : vector<32x1xf32> to vector<32x32xf32>
    %8 = arith.subf %0, %7 : vector<32x32xf32>
    %9 = arith.mulf %8, %8 : vector<32x32xf32>
    %cst_6 = arith.constant dense<0.000000e+00> : vector<32xf32>
    %10 = vector.multi_reduction <add>, %9, %cst_6 [1] : vector<32x32xf32> to vector<32xf32>
    %11 = vector.shape_cast %10 : vector<32xf32> to vector<32x1xf32>
    %cst_7 = arith.constant 3.200000e+01 : f32
    %12 = vector.broadcast %cst_7 : f32 to vector<32x1xf32>
    %13 = arith.divf %11, %12 : vector<32x1xf32>
    %cst_8 = arith.constant 9.99999974E-6 : f32
    %14 = vector.broadcast %cst_8 : f32 to vector<32x1xf32>
    %15 = arith.addf %13, %14 : vector<32x1xf32>
    %16 = math.rsqrt %15 : vector<32x1xf32>
    %17 = vector.broadcast %16 : vector<32x1xf32> to vector<32x32xf32>
    %18 = arith.mulf %8, %17 : vector<32x32xf32>
    %19 = vector.broadcast %1 : vector<1x32xf32> to vector<32x32xf32>
    %20 = arith.mulf %18, %19 : vector<32x32xf32>
    %21 = vector.broadcast %2 : vector<1x32xf32> to vector<32x32xf32>
    %22 = arith.addf %20, %21 : vector<32x32xf32>
    %c0_9 = arith.constant 0 : index
    %c0_10 = arith.constant 0 : index
    %23 = vector.load %arg4[%c0_9, %c0_10] : memref<32x64xf32, #tpu.memory_space<vmem>>, vector<32x64xf32>
    %cst_11 = arith.constant dense<0.000000e+00> : vector<32x64xf32>
    %24 = tpu.matmul %22, %23, %cst_11 {dimension_numbers = #tpu.dot_dimension_numbers<[1], [0], [0], [1], [0, 0, 1, 1], [], []>} : vector<32x32xf32>, vector<32x64xf32>, vector<32x64xf32> -> vector<32x64xf32>
    %c0_12 = arith.constant 0 : index
    %c0_13 = arith.constant 0 : index
    %25 = vector.load %arg5[%c0_12, %c0_13] : memref<1x64xf32, #tpu.memory_space<vmem>>, vector<1x64xf32>
    %26 = vector.broadcast %25 : vector<1x64xf32> to vector<32x64xf32>
    %27 = arith.addf %24, %26 : vector<32x64xf32>
    %c0_14 = arith.constant 0 : index
    %c0_15 = arith.constant 0 : index
    %28 = vector.load %arg8[%c0_14, %c0_15] : memref<32x64xf32, #tpu.memory_space<vmem>>, vector<32x64xf32>
    tpu.vector_store %arg8[%c0_14, %c0_15], %27 {strides = array<i32>} : memref<32x64xf32, #tpu.memory_space<vmem>>, vector<32x64xf32>,
    %c0_16 = arith.constant 0 : index
    %c0_17 = arith.constant 0 : index
    %29 = vector.load %arg6[%c0_16, %c0_17] : memref<32x64xf32, #tpu.memory_space<vmem>>, vector<32x64xf32>
    %30 = arith.subf %27, %29 : vector<32x64xf32>
    %31 = arith.mulf %30, %30 : vector<32x64xf32>
    %c0_18 = arith.constant 0 : index
    %c0_19 = arith.constant 0 : index
    %32 = vector.load %arg7[%c0_18, %c0_19] : memref<1x32xf32, #tpu.memory_space<vmem>>, vector<1x32xf32>
    %cst_20 = arith.constant dense<0.000000e+00> : vector<1x64xf32>
    %33 = tpu.matmul %32, %31, %cst_20 {dimension_numbers = #tpu.dot_dimension_numbers<[1], [0], [0], [1], [0, 0, 1, 1], [], []>} : vector<1x32xf32>, vector<32x64xf32>, vector<1x64xf32> -> vector<1x64xf32>
    %34 = vector.shape_cast %33 : vector<1x64xf32> to vector<1x1x64xf32>
    %cst_21 = arith.constant dense<0.000000e+00> : vector<1xf32>
    %35 = vector.multi_reduction <add>, %34, %cst_21 [1, 2] : vector<1x1x64xf32> to vector<1xf32>
    %36 = vector.shape_cast %35 : vector<1xf32> to vector<1x1x1xf32>
    %37 = vector.extract %36[0, 0, 0] : f32 from vector<1x1x1xf32>
    %cst_22 = arith.constant 6.400000e+01 : f32
    %38 = arith.divf %37, %cst_22 : f32
    %cst_23 = arith.constant 1.000000e+00 : f32
    %39 = vector.broadcast %cst_23 : f32 to vector<1x1xf32>
    %40 = vector.broadcast %38 : f32 to vector<1x1xf32>
    %41 = arith.mulf %40, %39 : vector<1x1xf32>
    %c0_24 = arith.constant 0 : index
    %c0_25 = arith.constant 0 : index
    %42 = vector.load %arg9[%c0_24, %c0_25] : memref<1x1xf32, #tpu.memory_space<vmem>>, vector<1x1xf32>
    tpu.vector_store %arg9[%c0_24, %c0_25], %41 {strides = array<i32>} : memref<1x1xf32, #tpu.memory_space<vmem>>, vector<1x1xf32>,
    return
  }
  func.func @transform_0(%arg0: i32) -> (i32, i32) {
    %c0_i32 = arith.constant 0 : i32
    %c0_i32_0 = arith.constant 0 : i32
    %c0_i32_1 = arith.constant 0 : i32
    return %c0_i32, %c0_i32_0 : i32, i32
  }
  func.func @transform_1(%arg0: i32) -> (i32, i32) {
    %c0_i32 = arith.constant 0 : i32
    %c0_i32_0 = arith.constant 0 : i32
    %c0_i32_1 = arith.constant 0 : i32
    return %c0_i32, %c0_i32_0 : i32, i32
  }
  func.func @transform_2(%arg0: i32) -> (i32, i32) {
    %c0_i32 = arith.constant 0 : i32
    %c0_i32_0 = arith.constant 0 : i32
    %c0_i32_1 = arith.constant 0 : i32
    return %c0_i32, %c0_i32_0 : i32, i32
  }
  func.func @transform_3(%arg0: i32) -> (i32, i32) {
    %c0_i32 = arith.constant 0 : i32
    %c0_i32_0 = arith.constant 0 : i32
    %c0_i32_1 = arith.constant 0 : i32
    return %c0_i32, %c0_i32_0 : i32, i32
  }
  func.func @transform_4(%arg0: i32) -> (i32, i32) {
    %c0_i32 = arith.constant 0 : i32
    %c0_i32_0 = arith.constant 0 : i32
    %c0_i32_1 = arith.constant 0 : i32
    return %c0_i32, %c0_i32_0 : i32, i32
  }
  func.func @transform_5(%arg0: i32) -> (i32, i32) {
    %c0_i32 = arith.constant 0 : i32
    %c0_i32_0 = arith.constant 0 : i32
    %c0_i32_1 = arith.constant 0 : i32
    return %c0_i32, %c0_i32_0 : i32, i32
  }
  func.func @transform_6(%arg0: i32) -> (i32, i32) {
    %c0_i32 = arith.constant 0 : i32
    %c0_i32_0 = arith.constant 0 : i32
    %c0_i32_1 = arith.constant 0 : i32
    return %c0_i32, %c0_i32_0 : i32, i32
  }
  func.func @transform_7(%arg0: i32) -> (i32, i32) {
    %c0_i32 = arith.constant 0 : i32
    %c0_i32_0 = arith.constant 0 : i32
    %c0_i32_1 = arith.constant 0 : i32
    return %c0_i32, %c0_i32_0 : i32, i32
  }
  func.func @transform_8(%arg0: i32) -> (i32, i32) {
    %c0_i32 = arith.constant 0 : i32
    %c0_i32_0 = arith.constant 0 : i32
    %c0_i32_1 = arith.constant 0 : i32
    return %c0_i32, %c0_i32_0 : i32, i32
  }
}

</mosaic_0001>

<bundles_post_ra>
// kernel: _forward_contrast_impl.6
= control target key start
LH: loop header
LB: loop body
LE: loop exit
PB: predicated region body
PF: predicated region fallthrough
CT: control target
= control target key end

     0   :  { %s526_s18 = smov 0   ;;  %s583_s0 = inlined_call_operand.vmem [shape: f32[2,16,64], index: 0, kind: input, shape index: {}]   ;;  %s584_s1 = inlined_call_operand.vmem [shape: f32[64,32], index: 1, kind: input, shape index: {}]   ;;  %s585_s2 = inlined_call_operand.vmem [shape: f32[1,32], index: 2, kind: input, shape index: {}]   ;;  %s586_s3 = inlined_call_operand.vmem [shape: f32[16,32], index: 3, kind: input, shape index: {}]   ;;  %s587_s4 = inlined_call_operand.vmem [shape: f32[2,1,32], index: 4, kind: input, shape index: {}]   ;;  %s588_s5 = inlined_call_operand.vmem [shape: f32[2,16,32], index: 5, kind: output, shape index: {}]  }
   0x1 LB: > { %s418_s19 = sadd.s32 4294967295, %s494_s18   ;;  %p422_p0 = scmp.ge.s32.totalorder %s494_s18, 1  ;;  %s494_s18 = sphi %s526_s18, %s15_s18  }
   0x2   : > { %p195_p1 = scmp.lt.s32.totalorder %s494_s18, 3 }
   0x4   : > { %p196_p2 = pnand %p422_p0, %p195_p1 }
   0x5   : > { %v241_v0 = vld [vmem:[%s584_s1] sm:$0xff] (!%p196_p2)  ;;  %v242_v1 = vld [vmem:[%s584_s1 + $0x8] sm:$0xff] (!%p196_p2)  ;;  %v243_v2 = vld [vmem:[%s584_s1 + $0x10] sm:$0xff] (!%p196_p2)  ;;  %p226_p3 = scmp.lt.s32.totalorder (!%p196_p2), %s418_s19, 1  ;;  %vm256_vm0 = vcmask (!%p196_p2), 523264   ;;  %vm351_vm1 = vcmask (!%p196_p2), 261120  }
   0x6   : > { %199 = sbr.rel (%p196_p2) target bundleno = 244 (0xf4), region = 40  ;;  %v464_v3 = vpack.c.bf16 (!%p196_p2), %v242_v1, %v241_v0  ;;  %v244_v4 = vld [vmem:[%s584_s1 + $0x18] sm:$0xff] (!%p196_p2)  ;;  %v245_v6 = vld [vmem:[%s584_s1 + $0x20] sm:$0xff] (!%p196_p2)  ;;  %v246_v7 = vld [vmem:[%s584_s1 + $0x28] sm:$0xff] (!%p196_p2) }
   0x7   : > { %v468_v5 = vpack.c.bf16 (!%p196_p2), %v244_v4, %v243_v2  ;;  %v472_v8 = vpack.c.bf16 (!%p196_p2), %v246_v7, %v245_v6  ;;  %v247_v9 = vld [vmem:[%s584_s1 + $0x30] sm:$0xff] (!%p196_p2)  ;;  %v248_v10 = vld [vmem:[%s584_s1 + $0x38] sm:$0xff] (!%p196_p2)  ;;  %v427_v14 = vld [vmem:[%s585_s2] ss:$0 sm:$0xff] (!%p196_p2) }
   0x8   : > { %465 = vmatprep.subr.bf16.mxu0 (!%p196_p2), %v464_v3  ;;  %v476_v12 = vpack.c.bf16 (!%p196_p2), %v248_v10, %v247_v9  ;;  %v339_v16 = vld [vmem:[%s586_s3 + $0x8] sm:$0xff] (!%p196_p2)  ;;  %v338_v19 = vld [vmem:[%s586_s3] sm:$0xff] (!%p196_p2) }
   0x9   : > { %467 = vmatpush3.bf16.msra.mxu0 (!%p196_p2), %v464_v3 }
   0xa   : > { %469 = vmatprep.subr.bf16.mxu0 (!%p196_p2), %v468_v5 }
   0xd   : > { %s590_s19 = smov (!%p226_p3, %s418_s19), 1  ;;  %471 = vmatpush3.bf16.msra.mxu0 %v468_v5 }
   0xe   : > { %s433_s7 = sshll.u32 %s590_s19, 4  ;;  %473 = vmatprep.subr.bf16.mxu0 %v472_v8  ;;  %s233_s21 = scalar_lea.vmem %s587_s4, %s590_s19 }
   0xf   : > { %s230_s10 = scalar_lea.vmem %s583_s0, %s433_s7  ;;  %v430_v20 = vld [vmem:[%s233_s21] ss:$0 sm:$0xff]  ;;  %s238_s28 = scalar_lea.vmem %s588_s5, %s433_s7 }
  0x10   : > { %v239_v11 = vld [vmem:[%s230_s10] sm:$0xff]  ;;  %v240_v13 = vld [vmem:[%s230_s10 + $0x8] sm:$0xff] }
  0x11   : > { %461 = vmatprep.mubr.msk.f32.mxu0 %vm256_vm0, %v239_v11  ;;  %475 = vmatpush3.bf16.msra.mxu0 %v472_v8 }
  0x12   : > { %477 = vmatprep.subr.bf16.mxu0 %v476_v12 }
  0x15   : > { %479 = vmatpush3.bf16.msra.mxu0 %v476_v12 }
  0x18   : > { %462 = vmatmul.mubr.msk.f32.vlgmr.msra.gmra.mrb[0].mxu0 %vm256_vm0, %v240_v13 }
  0xeb   : > { %v463_v15 = vpop.f32.mrb[0].mxu0 }
  0xec   : > { %v335_v17 = vadd.f32 %v463_v15, %v427_v14  ;;  %v329_v18 = vpop.f32.mrb[1].mxu0 }
  0xed   : > { %v330_v21 = vadd.f32 %v427_v14, %v329_v18 }
  0xee   : > { %v341_v22 = vadd.f32 %v339_v16, %v335_v17 }
  0xef   : > { %v340_v23 = vadd.f32 %v338_v19, %v330_v21 }
  0xf0   : > { %v350_v24 = vadd.f32 %v430_v20, %v341_v22 }
  0xf1   : > { %v349_v25 = vadd.f32 %v430_v20, %v340_v23 }
  0xf2   : > { %353 = vst.msk [vmem:[%s238_s28 + $0x8] sm:$0xff] %vm351_vm1, %v350_v24 }
  0xf3   : > { %352 = vst.msk [vmem:[%s238_s28] sm:$0xff] %vm351_vm1, %v349_v25 }
  0xf4 PF: > { %s15_s18 = sadd.s32 1, %s494_s18  }
  0xf5   : > { %p12_p4 = scmp.ge.s32.totalorder %s15_s18, 4  }
  0xf7   :  { %14 = sbr.rel (!%p12_p4) target bundleno = 1 (0x1), region = 73 }

// kernel: _forward_contrast_impl.8
= control target key start
LH: loop header
LB: loop body
LE: loop exit
PB: predicated region body
PF: predicated region fallthrough
CT: control target
= control target key end

     0   :  { %s796_s27 = smov 0   ;;  %s868_s0 = inlined_call_operand.vmem [shape: f32[2,8,32], index: 0, kind: input, shape index: {}]   ;;  %s869_s1 = inlined_call_operand.vmem [shape: f32[1,32], index: 1, kind: input, shape index: {}]   ;;  %s870_s2 = inlined_call_operand.vmem [shape: f32[1,32], index: 2, kind: input, shape index: {}, may-alias: {2,4,6}]   ;;  %s871_s3 = inlined_call_operand.vmem [shape: f32[32,32], index: 3, kind: input, shape index: {}]   ;;  %s872_s4 = inlined_call_operand.vmem [shape: f32[1,32], index: 4, kind: input, shape index: {}, may-alias: {2,4,6}]   ;;  %s873_s5 = inlined_call_operand.vmem [shape: f32[32,32], index: 5, kind: input, shape index: {}]   ;;  %s874_s6 = inlined_call_operand.vmem [shape: f32[1,32], index: 6, kind: input, shape index: {}, may-alias: {2,4,6}]   ;;  %s875_s7 = inlined_call_operand.vmem [shape: f32[2,8,32], index: 7, kind: output, shape index: {0}]   ;;  %s876_s8 = inlined_call_operand.vmem [shape: f32[2,1,32], index: 8, kind: output, shape index: {1}]  }
   0x1 LB: > { %s659_s28 = sadd.s32 4294967295, %s745_s27   ;;  %p663_p0 = scmp.ge.s32.totalorder %s745_s27, 1  ;;  %s745_s27 = sphi %s796_s27, %s19_s27  }
   0x2   : > { %p264_p1 = scmp.lt.s32.totalorder %s745_s27, 3 }
   0x4   : > { %p265_p2 = pnand %p663_p0, %p264_p1 }
   0x5   : > { %p299_p3 = scmp.lt.s32.totalorder (!%p265_p2), %s659_s28, 1  ;;  %vm313_vm0 = vcmask (!%p265_p2), 261120   ;;  %v342_v7 = vld [vmem:[%s871_s3] sm:$0xff] (!%p265_p2)  ;;  %v343_v8 = vld [vmem:[%s871_s3 + $0x8] sm:$0xff] (!%p265_p2)  ;;  %v344_v9 = vld [vmem:[%s871_s3 + $0x10] sm:$0xff] (!%p265_p2)  ;;  %v747_v10 = vmov (!%p265_p2), 0.0|0.0  }
   0x6   : > { %268 = sbr.rel (%p265_p2) target bundleno = 758 (0x2f6), region = 48  ;;  %713 = vmatprep.subr.bf16.mxu0 (!%p265_p2), %v747_v10  ;;  %v714_v11 = vpack.c.bf16 (!%p265_p2), %v343_v8, %v342_v7  ;;  %v345_v12 = vld [vmem:[%s871_s3 + $0x18] sm:$0xff] (!%p265_p2)  ;;  %vm748_vm1 = vmmov (!%p265_p2), 0   ;;  %v749_v13 = vmov (!%p265_p2), 0.0   ;;  %v666_v19 = vld [vmem:[%s869_s1] ss:$0 sm:$0xff] (!%p265_p2) }
   0x7   : > { %694 = vmatprep.mubr.msk.f32.mxu0 (!%p265_p2), %vm748_vm1, %v749_v13  ;;  %697 = vmatprep.subr.mxu1 (!%p265_p2), %v749_v13  ;;  %v717_v14 = vpack.c.bf16 (!%p265_p2), %v345_v12, %v344_v9  ;;  %v667_v21 = vld [vmem:[%s870_s2] ss:$0 sm:$0xff] (!%p265_p2)  ;;  %v502_v23 = vld [vmem:[%s873_s5 + $0x8] sm:$0xff] (!%p265_p2)  ;;  %vm427_vm2 = vcmask (!%p265_p2), 64512   ;;  %v503_v27 = vld [vmem:[%s873_s5 + $0x10] sm:$0xff] (!%p265_p2)  ;;  %v750_v29 = vmov (!%p265_p2), 0.125  }
   0x8   : > { %699 = vmatprep.mubr.msk.f32.mxu1 (!%p265_p2), %vm748_vm1, %v749_v13  ;;  %715 = vmatpush3.bf16.msra.mxu0 (!%p265_p2), %v714_v11  ;;  %v501_v22 = vld [vmem:[%s873_s5] sm:$0xff] (!%p265_p2)  ;;  %v504_v28 = vld [vmem:[%s873_s5 + $0x18] sm:$0xff] (!%p265_p2)  ;;  %vm579_vm3 = vcmask (!%p265_p2), 253952  }
   0x9   : > { %716 = vmatprep.subr.bf16.mxu0 (!%p265_p2), %v747_v10  ;;  %v720_v26 = vpack.c.bf16 (!%p265_p2), %v502_v23, %v501_v22  ;;  %v723_v30 = vpack.c.bf16 (!%p265_p2), %v504_v28, %v503_v27  ;;  %v668_v31 = vld [vmem:[%s872_s4] ss:$0 sm:$0xff] (!%p265_p2) }
   0xa   : > { %v505_v37 = vld [vmem:[%s874_s6] sm:$0x1] (!%p265_p2) }
   0xc   : > { %718 = vmatpush3.bf16.msra.mxu0 (!%p265_p2), %v717_v14 }
   0xd   : > { %s878_s28 = smov (!%p299_p3, %s659_s28), 1 }
   0xe   : > { %s664_s29 = sshll.u32 %s878_s28, 3  ;;  %s309_s21 = scalar_lea.vmem %s876_s8, %s878_s28 }
   0xf   : > { %s302_s10 = scalar_lea.vmem %s868_s0, %s664_s29  ;;  %s306_s16 = scalar_lea.vmem %s875_s7, %s664_s29 }
  0x10   : > { %v310_v0 = vld [vmem:[%s302_s10] sm:$0xff] }
  0x11   : > { %v314_v1 = vsel %vm313_vm0, %v310_v0, 0.0 }
  0x12   : > { %315 = vadd.xlane.f32.xlu0 %v314_v1 }
  0x9f   : > { %v316_v2 = vpop.xlane.xlu0 %315 }
  0xa0   : > { %v318_v3 = vmul.f32 0.03125, %v316_v2 }
  0xa2   : > { %v319_v4 = vsub.f32 %v310_v0, %v318_v3 }
  0xa4   : > { %v320_v5 = vmul.f32 %v319_v4, %v319_v4 }
  0xa6   : > { %v321_v6 = vsel %vm313_vm0, %v320_v5, 0.0 }
  0xa7   : > { %322 = vadd.xlane.f32.xlu0 %v321_v6 }
 0x134   : > { %v323_v15 = vpop.xlane.xlu0 %322 }
 0x135   : > { %v324_v16 = vmul.f32 0.03125, %v323_v15 }
 0x137   : > { %v325_v17 = vadd.f32 1e-05, %v324_v16 }
 0x139   : > { %737 = vrsqrt.f32 %v325_v17 }
 0x143   : > { %v738_v18 = vpop.eup %737 }
 0x144   : > { %v327_v20 = vmul.f32 %v738_v18, %v319_v4 }
 0x146   : > { %v334_v24 = vmul.f32 %v666_v19, %v327_v20 }
 0x148   : > { %v341_v25 = vadd.f32 %v667_v21, %v334_v24 }
 0x14a   : > { %695 = vmatmul.mubr.msk.f32.vlgmr.msra.gmra.mrb[0].mxu0 %vm313_vm0, %v341_v25  ;;  %698 = vmatpush3.msra.mxu1 %v341_v25 }
 0x14b   : > { %700 = vmatmul.mubr.msk.f32.vlgmr.msra.gmra.mrb[0].mxu1 %vm427_vm2, %v750_v29  ;;  %719 = vmatprep.subr.bf16.mxu1 %v747_v10 }
 0x14c   : > { %721 = vmatpush3.bf16.msra.mxu1 %v720_v26  ;;  %710 = vmatprep.mubr.msk.f32.mxu1 %vm748_vm1, %v749_v13 }
 0x14d   : > { %722 = vmatprep.subr.bf16.mxu1 %v747_v10 }
 0x150   : > { %724 = vmatpush3.bf16.msra.mxu1 %v723_v30 }
 0x21d   : > { %v422_v32 = vpop.f32.mrb[0].mxu0 }
 0x21e   : > { %v423_v33 = vadd.f32 %v668_v31, %v422_v32  ;;  %v696_v34 = vpop.f32.mrb[1].mxu0  ;;  %v497_v35 = vpop.f32.mrb[0].mxu1 }
 0x21f   : > { %v701_v36 = vpop.f32.mrb[1].mxu1  ;;  %711 = vmatmul.mubr.msk.f32.vlgmr.msra.gmra.mrb[2].mxu1 %vm313_vm0, %v497_v35 }
 0x220   : > { %426 = vst.msk [vmem:[%s306_s16] sm:$0xff] %vm313_vm0, %v423_v33 }
 0x2f2   : > { %v575_v38 = vpop.f32.mrb[2].mxu1 }
 0x2f3   : > { %v576_v39 = vadd.f32 %v575_v38, %v505_v37  ;;  %v712_v40 = vpop.f32.mrb[3].mxu1 }
 0x2f5   : > { %580 = vst.msk [vmem:[%s309_s21] sm:$0x1] %vm579_vm3, %v576_v39 }
 0x2f6 PF: > { %s19_s27 = sadd.s32 1, %s745_s27  }
 0x2f7   : > { %p16_p4 = scmp.ge.s32.totalorder %s19_s27, 4  }
 0x2f9   :  { %18 = sbr.rel (!%p16_p4) target bundleno = 1 (0x1), region = 90 }

// kernel: _forward_contrast_impl.7
= control target key start
LH: loop header
LB: loop body
LE: loop exit
PB: predicated region body
PF: predicated region fallthrough
CT: control target
= control target key end

     0   :  { %s3440_s24 = smov 0   ;;  %s3876_s0 = inlined_call_operand.vmem [shape: f32[2,8,32], index: 0, kind: input, shape index: {}]   ;;  %s3877_s1 = inlined_call_operand.vmem [shape: f32[1,32], index: 1, kind: input, shape index: {}, may-alias: {1,11}]   ;;  %s3878_s2 = inlined_call_operand.vmem [shape: f32[1,32], index: 2, kind: input, shape index: {}, may-alias: {2,10,12,16}]   ;;  %s3879_s3 = inlined_call_operand.vmem [shape: f32[4,32,8], index: 3, kind: input, shape index: {}]   ;;  %s3880_s4 = inlined_call_operand.vmem [shape: f32[4,1,8], index: 4, kind: input, shape index: {}, may-alias: {4,6,8}]   ;;  %s3881_s5 = inlined_call_operand.vmem [shape: f32[4,32,8], index: 5, kind: input, shape index: {}]   ;;  %s3882_s6 = inlined_call_operand.vmem [shape: f32[4,1,8], index: 6, kind: input, shape index: {}, may-alias: {4,6,8}]   ;;  %s3883_s7 = inlined_call_operand.vmem [shape: f32[4,32,8], index: 7, kind: input, shape index: {}]   ;;  %s3884_s8 = inlined_call_operand.vmem [shape: f32[4,1,8], index: 8, kind: input, shape index: {}, may-alias: {4,6,8}]   ;;  %s3885_s9 = inlined_call_operand.vmem [shape: f32[4,8,32], index: 9, kind: input, shape index: {}]   ;;  %s3886_s10 = inlined_call_operand.vmem [shape: f32[1,32], index: 10, kind: input, shape index: {}, may-alias: {2,10,12,16}]   ;;  %s3887_s11 = inlined_call_operand.vmem [shape: f32[1,32], index: 11, kind: input, shape index: {}, may-alias: {1,11}]   ;;  %s3888_s12 = inlined_call_operand.vmem [shape: f32[1,32], index: 12, kind: input, shape index: {}, may-alias: {2,10,12,16}]   ;;  %s3889_s13 = inlined_call_operand.vmem [shape: f32[32,64], index: 13, kind: input, shape index: {}]   ;;  %s3890_s14 = inlined_call_operand.vmem [shape: f32[1,64], index: 14, kind: input, shape index: {}]   ;;  %s3891_s15 = inlined_call_operand.vmem [shape: f32[64,32], index: 15, kind: input, shape index: {}]   ;;  %s3892_s16 = inlined_call_operand.vmem [shape: f32[1,32], index: 16, kind: input, shape index: {}, may-alias: {2,10,12,16}]   ;;  %s3893_s17 = inlined_call_operand.vmem [shape: f32[2,8,32], index: 17, kind: output, shape index: {}]  }
   0x1   :  { %3894 = sst [smem:[#allocation2_spill]] %s3876_s0 }
   0x2   :  { %3895 = sst [smem:[#allocation3_spill]] %s3877_s1 }
   0x3 LB: > { %s2790_s25 = sadd.s32 4294967295, %s3345_s24   ;;  %p2794_p0 = scmp.ge.s32.totalorder %s3345_s24, 1  ;;  %s3345_s24 = sphi %s3440_s24, %s27_s24  }
   0x4   : > { %p486_p1 = scmp.lt.s32.totalorder %s3345_s24, 3 }
   0x6   : > { %p487_p2 = pnand %p2794_p0, %p486_p1 }
   0x7   : > { %p536_p3 = scmp.lt.s32.totalorder (!%p487_p2), %s2790_s25, 1  ;;  %vm547_vm0 = vcmask (!%p487_p2), 261120   ;;  %s3896_s29 = sld [smem:[#allocation2_spill]] (!%p487_p2)  ;;  %v576_v7 = vld [vmem:[%s3879_s3] sm:$0xff] (!%p487_p2)  ;;  %v577_v8 = vld [vmem:[%s3879_s3 + $0x8] sm:$0xff] (!%p487_p2)  ;;  %v3347_v12 = vmov (!%p487_p2), 0.0|0.0  }
   0x8   : > { %490 = sbr.rel (%p487_p2) target bundleno = 4958 (0x135e), region = 88  ;;  %v3217_v9 = vpack.c.bf16 (!%p487_p2), %v577_v8, %v576_v7  ;;  %v660_v10 = vld [vmem:[%s3881_s5] sm:$0xff] (!%p487_p2)  ;;  %v661_v11 = vld [vmem:[%s3881_s5 + $0x8] sm:$0xff] (!%p487_p2)  ;;  %3216 = vmatprep.subr.bf16.mxu0 (!%p487_p2), %v3347_v12  ;;  %3222 = vmatprep.subr.bf16.mxu1 (!%p487_p2), %v3347_v12  ;;  %v578_v14 = vld [vmem:[%s3879_s3 + $0x10] sm:$0xff] (!%p487_p2)  ;;  %vm3348_vm1 = vmmov (!%p487_p2), 0   ;;  %v3349_v20 = vmov (!%p487_p2), 0.0  }
   0x9   : > { %v3223_v13 = vpack.c.bf16 (!%p487_p2), %v661_v11, %v660_v10  ;;  %v579_v15 = vld [vmem:[%s3879_s3 + $0x18] sm:$0xff] (!%p487_p2)  ;;  %v662_v17 = vld [vmem:[%s3881_s5 + $0x10] sm:$0xff] (!%p487_p2)  ;;  %3002 = vmatprep.mubr.msk.f32.mxu0 (!%p487_p2), %vm3348_vm1, %v3349_v20  ;;  %3013 = vmatprep.mubr.msk.f32.mxu1 (!%p487_p2), %vm3348_vm1, %v3349_v20  ;;  %s3897_s22 = sld [smem:[#allocation3_spill]] (!%p487_p2)  ;;  %v741_v27 = vld [vmem:[%s3883_s7] sm:$0xff] (!%p487_p2)  ;;  %vm822_vm2 = vcmask (!%p487_p2), 64512   ;;  %vm2661_vm3 = vcmask (!%p487_p2), 523264  }
   0xa   : > { %3218 = vmatpush3.bf16.msra.mxu0 (!%p487_p2), %v3217_v9  ;;  %v3220_v16 = vpack.c.bf16 (!%p487_p2), %v579_v15, %v578_v14  ;;  %v663_v18 = vld [vmem:[%s3881_s5 + $0x18] sm:$0xff] (!%p487_p2)  ;;  %v742_v28 = vld [vmem:[%s3883_s7 + $0x8] sm:$0xff] (!%p487_p2)  ;;  %v2798_v29 = vld [vmem:[%s3878_s2] ss:$0 sm:$0xff] (!%p487_p2) }
   0xb   : > { %3224 = vmatpush3.bf16.msra.mxu1 (!%p487_p2), %v3223_v13  ;;  %3219 = vmatprep.subr.bf16.mxu0 (!%p487_p2), %v3347_v12  ;;  %v3226_v19 = vpack.c.bf16 (!%p487_p2), %v663_v18, %v662_v17  ;;  %v3229_v31 = vpack.c.bf16 (!%p487_p2), %v742_v28, %v741_v27  ;;  %v743_v33 = vld [vmem:[%s3883_s7 + $0x10] sm:$0xff] (!%p487_p2)  ;;  %v744_v34 = vld [vmem:[%s3883_s7 + $0x18] sm:$0xff] (!%p487_p2)  ;;  %v2801_v36 = vld [vmem:[%s3882_s6] ss:$0 sm:$0xff] (!%p487_p2) }
   0xc   : > { %3225 = vmatprep.subr.bf16.mxu1 (!%p487_p2), %v3347_v12  ;;  %v3232_v35 = vpack.c.bf16 (!%p487_p2), %v744_v34, %v743_v33  ;;  %v2808_v39 = vld [vmem:[%s3879_s3 + $0x20] sm:$0xff] (!%p487_p2)  ;;  %v2809_v40 = vld [vmem:[%s3879_s3 + $0x28] sm:$0xff] (!%p487_p2)  ;;  %v2810_v47 = vld [vmem:[%s3879_s3 + $0x30] sm:$0xff] (!%p487_p2) }
   0xd   : > { %v2799_v41 = vld [vmem:[%s3880_s4] ss:$0 sm:$0xff] (!%p487_p2)  ;;  %v3235_v45 = vpack.c.bf16 (!%p487_p2), %v2809_v40, %v2808_v39  ;;  %v2811_v48 = vld [vmem:[%s3879_s3 + $0x38] sm:$0xff] (!%p487_p2)  ;;  %v2823_v53 = vld [vmem:[%s3883_s7 + $0x28] sm:$0xff] (!%p487_p2) }
   0xe   : > { %3221 = vmatpush3.bf16.msra.mxu0 (!%p487_p2), %v3220_v16  ;;  %v2803_v49 = vld [vmem:[%s3884_s8] ss:$0 sm:$0xff] (!%p487_p2)  ;;  %v3238_v50 = vpack.c.bf16 (!%p487_p2), %v2811_v48, %v2810_v47  ;;  %v2824_v57 = vld [vmem:[%s3883_s7 + $0x30] sm:$0xff] (!%p487_p2)  ;;  %v2825_v58 = vld [vmem:[%s3883_s7 + $0x38] sm:$0xff] (!%p487_p2) }
   0xf   : > { %s3899_s25 = smov (!%p536_p3, %s2790_s25), 1  ;;  %3227 = vmatpush3.bf16.msra.mxu1 %v3226_v19  ;;  %3228 = vmatprep.subr.bf16.mxu0 %v3347_v12  ;;  %v2797_v25 = vld [vmem:[%s3897_s22] ss:$0 sm:$0xff]  ;;  %v3250_v59 = vpack.c.bf16 %v2825_v58, %v2824_v57  ;;  %v2816_v13 = vld [vmem:[%s3881_s5 + $0x28] sm:$0xff]  ;;  %v2817_v17 = vld [vmem:[%s3881_s5 + $0x30] sm:$0xff] }
  0x10   : > { %s2795_s26 = sshll.u32 %s3899_s25, 3  ;;  %3032 = vmatprep.subr.mxu1 %v3349_v20  ;;  %v2822_v52 = vld [vmem:[%s3883_s7 + $0x20] sm:$0xff]  ;;  %v2818_v18 = vld [vmem:[%s3881_s5 + $0x38] sm:$0xff]  ;;  %v2843_v47 = vld [vmem:[%s3881_s5 + $0x48] sm:$0xff] }
  0x11   : > { %s539_s0 = scalar_lea.vmem %s3896_s29, %s2795_s26  ;;  %v3247_v56 = vpack.c.bf16 %v2823_v53, %v2822_v52  ;;  %v2815_v11 = vld [vmem:[%s3881_s5 + $0x20] sm:$0xff]  ;;  %v3244_v19 = vpack.c.bf16 %v2818_v18, %v2817_v17  ;;  %v2836_v53 = vld [vmem:[%s3879_s3 + $0x48] sm:$0xff]  ;;  %s543_s18 = scalar_lea.vmem %s3893_s17, %s2795_s26 }
  0x12   : > { %v3456_v0 = vld [vmem:[%s539_s0] sm:$0xff]  ;;  %v3241_v15 = vpack.c.bf16 %v2816_v13, %v2815_v11 }
  0x13   : > { %v548_v1 = vsel %vm547_vm0, %v3456_v0, 0.0  ;;  %v2827_v28 = vld [vmem:[%s3884_s8 + $0x1] ss:$0 sm:$0xff]  ;;  %v2840_v13 = vld [vmem:[%s3880_s4 + $0x2] ss:$0 sm:$0xff] }
  0x14   : > { %549 = vadd.xlane.f32.xlu0 %v548_v1  ;;  %v2835_v52 = vld [vmem:[%s3879_s3 + $0x40] sm:$0xff] }
  0x15   : > { %v2854_v17 = vld [vmem:[%s3884_s8 + $0x2] ss:$0 sm:$0xff] }
  0xa1   : > { %v550_v2 = vpop.xlane.xlu0 %549 }
  0xa2   : > { %v552_v3 = vmul.f32 0.03125, %v550_v2 }
  0xa4   : > { %v553_v4 = vsub.f32 %v3456_v0, %v552_v3 }
  0xa6   : > { %v554_v5 = vmul.f32 %v553_v4, %v553_v4 }
  0xa8   : > { %v555_v6 = vsel %vm547_vm0, %v554_v5, 0.0 }
  0xa9   : > { %556 = vadd.xlane.f32.xlu0 %v555_v6 }
 0x136   : > { %v557_v21 = vpop.xlane.xlu0 %556 }
 0x137   : > { %v558_v22 = vmul.f32 0.03125, %v557_v21 }
 0x139   : > { %v559_v23 = vadd.f32 1e-05, %v558_v22 }
 0x13b   : > { %3317 = vrsqrt.f32 %v559_v23  ;;  %v2820_v23 = vld [vmem:[%s3882_s6 + $0x1] ss:$0 sm:$0xff] }
 0x145   : > { %v3318_v24 = vpop.eup %3317 }
 0x146   : > { %v561_v26 = vmul.f32 %v3318_v24, %v553_v4 }
 0x148   : > { %v568_v30 = vmul.f32 %v2797_v25, %v561_v26  ;;  %v2813_v25 = vld [vmem:[%s3880_s4 + $0x1] ss:$0 sm:$0xff] }
 0x14a   : > { %v3508_v32 = vadd.f32 %v2798_v29, %v568_v30 }
 0x14c   : > { %3003 = vmatmul.mubr.msk.f32.vlgmr.msra.gmra.mrb[0].mxu0 %vm547_vm0, %v3508_v32  ;;  %3014 = vmatmul.mubr.msk.f32.vlgmr.msra.gmra.mrb[0].mxu1 %vm547_vm0, %v3508_v32 }
 0x14d   : > { %3230 = vmatpush3.bf16.msra.mxu0 %v3229_v31  ;;  %3024 = vmatprep.mubr.msk.f32.mxu0 %vm3348_vm1, %v3349_v20 }
 0x14e   : > { %3231 = vmatprep.subr.bf16.mxu0 %v3347_v12  ;;  %3034 = vmatprep.mubr.msk.f32.mxu1 %vm3348_vm1, %v3349_v20 }
 0x151   : > { %3233 = vmatpush3.bf16.msra.mxu0 %v3232_v35 }
 0x152   : > { %3027 = vmatprep.subr.mxu0 %v3349_v20 }
 0x154   : > { %3025 = vmatmul.mubr.msk.f32.vlgmr.msra.gmra.mrb[2].mxu0 %vm547_vm0, %v3508_v32 }
 0x155   : > { %3029 = vmatprep.mubr.msk.f32.mxu0 %vm3348_vm1, %v3349_v20 }
 0x21f   : > { %v656_v37 = vpop.f32.mrb[0].mxu0  ;;  %v737_v38 = vpop.f32.mrb[0].mxu1 }
 0x220   : > { %v738_v42 = vadd.f32 %v2801_v36, %v737_v38  ;;  %v3004_v43 = vpop.f32.mrb[1].mxu0  ;;  %v3015_v44 = vpop.f32.mrb[1].mxu1  ;;  %v657_v46 = vadd.f32 %v2799_v41, %v656_v37  ;;  %v2832_v41 = vld [vmem:[%s3885_s9 + $0x8] sm:$0xff] }
 0x222   : > { %3028 = vmatpush3.xpose.msk.msra.mxu0 %vm822_vm2, %v738_v42 }
 0x223   : > { %3234 = vmatprep.subr.bf16.mxu0 %v3347_v12 }
 0x225   : > { %3030 = vmatmul.mubr.msk.f32.vlgmr.msra.gmra.mrb[4].mxu0 %vm822_vm2, %v657_v46  ;;  %v2842_v46 = vld [vmem:[%s3881_s5 + $0x40] sm:$0xff] }
 0x226   : > { %3236 = vmatpush3.bf16.msra.mxu0 %v3235_v45  ;;  %3045 = vmatprep.mubr.msk.f32.mxu0 %vm3348_vm1, %v3349_v20  ;;  %v984_v45 = vld [vmem:[%s3885_s9] sm:$0xff]  ;;  %v3259_v48 = vpack.c.bf16 %v2843_v47, %v2842_v46  ;;  %v2878_v46 = vld [vmem:[%s3883_s7 + $0x78] sm:$0xff] }
 0x227   : > { %v818_v51 = vpop.f32.mrb[2].mxu0  ;;  %3237 = vmatprep.subr.bf16.mxu0 %v3347_v12 }
 0x228   : > { %v819_v54 = vadd.f32 %v2803_v49, %v818_v51  ;;  %v3026_v55 = vpop.f32.mrb[3].mxu0  ;;  %v2844_v49 = vld [vmem:[%s3881_s5 + $0x50] sm:$0xff] }
 0x229   : > { %v2837_v55 = vld [vmem:[%s3879_s3 + $0x50] sm:$0xff] }
 0x22a   : > { %3033 = vmatpush3.msra.mxu1 %v819_v54  ;;  %3239 = vmatpush3.bf16.msra.mxu0 %v3238_v50  ;;  %v2845_v50 = vld [vmem:[%s3881_s5 + $0x58] sm:$0xff]  ;;  %v3253_v54 = vpack.c.bf16 %v2836_v53, %v2835_v52 }
 0x22b   : > { %3246 = vmatprep.subr.bf16.mxu0 %v3347_v12  ;;  %3240 = vmatprep.subr.bf16.mxu1 %v3347_v12  ;;  %v3262_v51 = vpack.c.bf16 %v2845_v50, %v2844_v49  ;;  %v2869_v49 = vld [vmem:[%s3881_s5 + $0x68] sm:$0xff]  ;;  %v2871_v52 = vld [vmem:[%s3881_s5 + $0x78] sm:$0xff] }
 0x22d   : > { %3046 = vmatmul.mubr.msk.f32.vlgmr.msra.gmra.mrb[6].mxu0 %vm547_vm0, %v3508_v32 }
 0x22e   : > { %3248 = vmatpush3.bf16.msra.mxu0 %v3247_v56  ;;  %3067 = vmatprep.mubr.msk.f32.mxu0 %vm3348_vm1, %v3349_v20  ;;  %v2838_v56 = vld [vmem:[%s3879_s3 + $0x58] sm:$0xff] }
 0x22f   : > { %3249 = vmatprep.subr.bf16.mxu0 %v3347_v12 }
 0x232   : > { %3251 = vmatpush3.bf16.msra.mxu0 %v3250_v59  ;;  %v3256_v59 = vpack.c.bf16 %v2838_v56, %v2837_v55 }
 0x233   : > { %3080 = vmatprep.subr.mxu0 %v3349_v20 }
 0x235   : > { %3068 = vmatmul.mubr.msk.f32.vlgmr.msra.gmra.mrb[8].mxu0 %vm547_vm0, %v3508_v32 }
 0x236   : > { %3082 = vmatprep.mubr.msk.f32.mxu0 %vm3348_vm1, %v3349_v20  ;;  %3081 = vmatpush3.msra.mxu0 %v2832_v41 }
 0x237   : > { %3252 = vmatprep.subr.bf16.mxu0 %v3347_v12 }
 0x2f8   : > { %v895_v60 = vpop.f32.mrb[4].mxu0 }
 0x2f9   : > { %v899_v61 = vmul.f32 0.35355338, %v895_v60  ;;  %v3031_v62 = vpop.f32.mrb[5].mxu0  ;;  %v2849_v60 = vld [vmem:[%s3883_s7 + $0x40] sm:$0xff] }
 0x2fb   : > { %v900_v63 = vsel %vm822_vm2, %v899_v61, -inf }
 0x2fc   : > { %901 = vmax.xlane.f32.xlu1 %v900_v63 }
 0x300   : > { %v1064_v1 = vpop.f32.mrb[6].mxu0 }
 0x301   : > { %v3047_v2 = vpop.f32.mrb[7].mxu0  ;;  %v1065_v29 = vadd.f32 %v2813_v25, %v1064_v1 }
 0x302   : > { %v2851_v2 = vld [vmem:[%s3883_s7 + $0x50] sm:$0xff] }
 0x308   : > { %v1230_v3 = vpop.f32.mrb[8].mxu0 }
 0x309   : > { %v3069_v4 = vpop.f32.mrb[9].mxu0  ;;  %v1231_v30 = vadd.f32 %v2827_v28, %v1230_v3  ;;  %v2852_v3 = vld [vmem:[%s3883_s7 + $0x58] sm:$0xff] }
 0x30a   : > { %v2847_v4 = vld [vmem:[%s3882_s6 + $0x2] ss:$0 sm:$0xff] }
 0x389   : > { %v902_v5 = vpop.xlane.xlu1 %901 }
 0x38a   : > { %v903_v6 = vsub.f32 %v899_v61, %v902_v5  ;;  %v2850_v61 = vld [vmem:[%s3883_s7 + $0x48] sm:$0xff]  ;;  %v3268_v5 = vpack.c.bf16 %v2852_v3, %v2851_v2  ;;  %v2866_v2 = vld [vmem:[%s3880_s4 + $0x3] ss:$0 sm:$0xff] }
 0x38b   : > { %v3265_v1 = vpack.c.bf16 %v2850_v61, %v2849_v60 }
 0x38c   : > { %v904_v7 = vmul.f32 1.442695, %v903_v6 }
 0x38e   : > { %3319 = vpow2.f32 %v904_v7 }
 0x398   : > { %v3320_v8 = vpop.eup %3319 }
 0x399   : > { %v906_v9 = vsel %vm822_vm2, %v3320_v8, 0.0 }
 0x39a   : > { %907 = vadd.xlane.f32.xlu1 %v906_v9 }
 0x427   : > { %v908_v10 = vpop.xlane.xlu1 %907 }
 0x428   : > { %3321 = vrcp.f32 %v908_v10 }
 0x432   : > { %v3322_v14 = vpop.eup %3321 }
 0x433   : > { %v910_v16 = vmul.f32 %v3322_v14, %v3320_v8 }
 0x435   : > { %3035 = vmatmul.mubr.msk.f32.vlgmr.msra.gmra.mrb[2].mxu1 %vm822_vm2, %v910_v16 }
 0x436   : > { %3242 = vmatpush3.bf16.msra.mxu1 %v3241_v15  ;;  %3056 = vmatprep.mubr.msk.f32.mxu1 %vm3348_vm1, %v3349_v20 }
 0x437   : > { %3243 = vmatprep.subr.bf16.mxu1 %v3347_v12 }
 0x43a   : > { %3245 = vmatpush3.bf16.msra.mxu1 %v3244_v19 }
 0x43b   : > { %3070 = vmatprep.subr.mxu1 %v3349_v20 }
 0x43d   : > { %3057 = vmatmul.mubr.msk.f32.vlgmr.msra.gmra.mrb[4].mxu1 %vm547_vm0, %v3508_v32 }
 0x43e   : > { %3072 = vmatprep.mubr.msk.f32.mxu1 %vm3348_vm1, %v3349_v20 }
 0x508   : > { %v980_v21 = vpop.f32.mrb[2].mxu1 }
 0x509   : > { %v3036_v22 = vpop.f32.mrb[3].mxu1 }
 0x510   : > { %v1147_v24 = vpop.f32.mrb[4].mxu1 }
 0x511   : > { %v1148_v26 = vadd.f32 %v2820_v23, %v1147_v24  ;;  %v3058_v27 = vpop.f32.mrb[5].mxu1 }
 0x513   : > { %3071 = vmatpush3.xpose.msk.msra.mxu1 %vm822_vm2, %v1148_v26 }
 0x514   : > { %3075 = vmatprep.subr.mxu1 %v3349_v20 }
 0x516   : > { %3073 = vmatmul.mubr.msk.f32.vlgmr.msra.gmra.mrb[6].mxu1 %vm822_vm2, %v1065_v29 }
 0x517   : > { %3076 = vmatpush3.msra.mxu1 %v1231_v30  ;;  %3077 = vmatprep.mubr.msk.f32.mxu1 %vm3348_vm1, %v3349_v20 }
 0x518   : > { %3085 = vmatprep.subr.mxu1 %v3349_v20 }
 0x5e9   : > { %v1306_v31 = vpop.f32.mrb[6].mxu1 }
 0x5ea   : > { %v1310_v33 = vmul.f32 0.35355338, %v1306_v31  ;;  %v3074_v34 = vpop.f32.mrb[7].mxu1  ;;  %v2859_v31 = vld [vmem:[%s3885_s9 + $0x10] sm:$0xff] }
 0x5eb   : > { %v2861_v34 = vld [vmem:[%s3879_s3 + $0x60] sm:$0xff] }
 0x5ec   : > { %v1311_v35 = vsel %vm822_vm2, %v1310_v33, -inf }
 0x5ed   : > { %1312 = vmax.xlane.f32.xlu0 %v1311_v35  ;;  %v2862_v35 = vld [vmem:[%s3879_s3 + $0x68] sm:$0xff] }
 0x67a   : > { %v1313_v36 = vpop.xlane.xlu0 %1312 }
 0x67b   : > { %v1314_v37 = vsub.f32 %v1310_v33, %v1313_v36 }
 0x67d   : > { %v1315_v38 = vmul.f32 1.442695, %v1314_v37  ;;  %v3271_v37 = vpack.c.bf16 %v2862_v35, %v2861_v34 }
 0x67f   : > { %3323 = vpow2.f32 %v1315_v38 }
 0x689   : > { %v3324_v39 = vpop.eup %3323 }
 0x68a   : > { %v1317_v40 = vsel %vm822_vm2, %v3324_v39, 0.0 }
 0x68b   : > { %1318 = vadd.xlane.f32.xlu1 %v1317_v40  ;;  %v2864_v40 = vld [vmem:[%s3879_s3 + $0x78] sm:$0xff] }
 0x718   : > { %v1319_v42 = vpop.xlane.xlu1 %1318 }
 0x719   : > { %3325 = vrcp.f32 %v1319_v42  ;;  %v2875_v42 = vld [vmem:[%s3883_s7 + $0x60] sm:$0xff] }
 0x723   : > { %v3326_v43 = vpop.eup %3325 }
 0x724   : > { %v1321_v44 = vmul.f32 %v3326_v43, %v3324_v39  ;;  %v2863_v39 = vld [vmem:[%s3879_s3 + $0x70] sm:$0xff]  ;;  %v2876_v43 = vld [vmem:[%s3883_s7 + $0x68] sm:$0xff] }
 0x725   : > { %v3274_v41 = vpack.c.bf16 %v2864_v40, %v2863_v39  ;;  %v2556_v39 = vld [vmem:[%s3889_s13 + $0x18] sm:$0xff] }
 0x726   : > { %3078 = vmatmul.mubr.msk.f32.vlgmr.msra.gmra.mrb[8].mxu1 %vm822_vm2, %v1321_v44  ;;  %v3283_v44 = vpack.c.bf16 %v2876_v43, %v2875_v42 }
 0x727   : > { %3086 = vmatpush3.msra.mxu1 %v984_v45  ;;  %3087 = vmatprep.mubr.msk.f32.mxu1 %vm3348_vm1, %v3349_v20  ;;  %v2877_v45 = vld [vmem:[%s3883_s7 + $0x70] sm:$0xff] }
 0x728   : > { %3258 = vmatprep.subr.bf16.mxu1 %v3347_v12  ;;  %v3286_v47 = vpack.c.bf16 %v2878_v46, %v2877_v45  ;;  %v2888_v45 = vld [vmem:[%s3887_s11] ss:$0 sm:$0xff] }
 0x72a   : > { %3088 = vmatmul.mubr.msk.f32.vlgmr.msra.gmra.mrb[10].mxu1 %vm822_vm2, %v980_v21 }
 0x72b   : > { %3260 = vmatpush3.bf16.msra.mxu1 %v3259_v48  ;;  %3109 = vmatprep.mubr.msk.f32.mxu1 %vm3348_vm1, %v3349_v20  ;;  %v2868_v48 = vld [vmem:[%s3881_s5 + $0x60] sm:$0xff] }
 0x72c   : > { %3261 = vmatprep.subr.bf16.mxu1 %v3347_v12  ;;  %v3277_v50 = vpack.c.bf16 %v2869_v49, %v2868_v48 }
 0x72f   : > { %3263 = vmatpush3.bf16.msra.mxu1 %v3262_v51  ;;  %v2870_v51 = vld [vmem:[%s3881_s5 + $0x70] sm:$0xff] }
 0x730   : > { %3123 = vmatprep.subr.mxu1 %v3349_v20  ;;  %v3280_v55 = vpack.c.bf16 %v2871_v52, %v2870_v51  ;;  %v2647_v51 = vld [vmem:[%s3891_s15 + $0x8] sm:$0xff] }
 0x732   : > { %3110 = vmatmul.mubr.msk.f32.vlgmr.msra.gmra.mrb[12].mxu1 %vm547_vm0, %v3508_v32 }
 0x733   : > { %3125 = vmatprep.mubr.msk.f32.mxu1 %vm3348_vm1, %v3349_v20 }
 0x7f9   : > { %v1391_v57 = vpop.f32.mrb[8].mxu1 }
 0x7fa   : > { %v3079_v58 = vpop.f32.mrb[9].mxu1  ;;  %3083 = vmatmul.mubr.msk.f32.vlgmr.msra.gmra.mrb[10].mxu0 %vm822_vm2, %v1391_v57 }
 0x7fb   : > { %3254 = vmatpush3.bf16.msra.mxu0 %v3253_v54  ;;  %3098 = vmatprep.mubr.msk.f32.mxu0 %vm3348_vm1, %v3349_v20 }
 0x7fc   : > { %3255 = vmatprep.subr.bf16.mxu0 %v3347_v12 }
 0x7fd   : > { %v1539_v62 = vpop.f32.mrb[10].mxu1 }
 0x7fe   : > { %v3089_v63 = vpop.f32.mrb[11].mxu1 }
 0x7ff   : > { %3257 = vmatpush3.bf16.msra.mxu0 %v3256_v59  ;;  %v2873_v63 = vld [vmem:[%s3882_s6 + $0x3] ss:$0 sm:$0xff] }
 0x800   : > { %3264 = vmatprep.subr.bf16.mxu0 %v3347_v12 }
 0x802   : > { %3099 = vmatmul.mubr.msk.f32.vlgmr.msra.gmra.mrb[12].mxu0 %vm547_vm0, %v3508_v32 }
 0x803   : > { %3266 = vmatpush3.bf16.msra.mxu0 %v3265_v1  ;;  %3120 = vmatprep.mubr.msk.f32.mxu0 %vm3348_vm1, %v3349_v20 }
 0x804   : > { %3267 = vmatprep.subr.bf16.mxu0 %v3347_v12 }
 0x805   : > { %v1705_v6 = vpop.f32.mrb[12].mxu1 }
 0x806   : > { %v1706_v7 = vadd.f32 %v2847_v4, %v1705_v6  ;;  %v3111_v8 = vpop.f32.mrb[13].mxu1  ;;  %v2880_v4 = vld [vmem:[%s3884_s8 + $0x3] ss:$0 sm:$0xff] }
 0x807   : > { %3269 = vmatpush3.bf16.msra.mxu0 %v3268_v5 }
 0x808   : > { %3124 = vmatpush3.xpose.msk.msra.mxu1 %vm822_vm2, %v1706_v7  ;;  %3133 = vmatprep.subr.mxu0 %v3349_v20 }
 0x809   : > { %3128 = vmatprep.subr.mxu1 %v3349_v20 }
 0x80a   : > { %3121 = vmatmul.mubr.msk.f32.vlgmr.msra.gmra.mrb[14].mxu0 %vm547_vm0, %v3508_v32 }
 0x80b   : > { %3135 = vmatprep.mubr.msk.f32.mxu0 %vm3348_vm1, %v3349_v20  ;;  %3134 = vmatpush3.msra.mxu0 %v2859_v31 }
 0x80c   : > { %3276 = vmatprep.subr.bf16.mxu0 %v3347_v12 }
 0x8cd   : > { %v1466_v9 = vpop.f32.mrb[10].mxu0 }
 0x8ce   : > { %v3697_v10 = vadd.f32 %v1539_v62, %v1466_v9  ;;  %v3084_v11 = vpop.f32.mrb[11].mxu0 }
 0x8d5   : > { %v1622_v14 = vpop.f32.mrb[12].mxu0 }
 0x8d6   : > { %v1623_v15 = vadd.f32 %v2840_v13, %v1622_v14  ;;  %v3100_v16 = vpop.f32.mrb[13].mxu0 }
 0x8d8   : > { %3126 = vmatmul.mubr.msk.f32.vlgmr.msra.gmra.mrb[14].mxu1 %vm822_vm2, %v1623_v15 }
 0x8d9   : > { %3130 = vmatprep.mubr.msk.f32.mxu1 %vm3348_vm1, %v3349_v20 }
 0x8dd   : > { %v1788_v18 = vpop.f32.mrb[14].mxu0 }
 0x8de   : > { %v1789_v19 = vadd.f32 %v2854_v17, %v1788_v18  ;;  %v3122_v21 = vpop.f32.mrb[15].mxu0  ;;  %v2885_v17 = vld [vmem:[%s3885_s9 + $0x18] sm:$0xff] }
 0x8e0   : > { %3129 = vmatpush3.msra.mxu1 %v1789_v19 }
 0x8e1   : > { %3270 = vmatprep.subr.bf16.mxu1 %v3347_v12 }
 0x9ab   : > { %v1864_v22 = vpop.f32.mrb[14].mxu1 }
 0x9ac   : > { %v1868_v23 = vmul.f32 0.35355338, %v1864_v22  ;;  %v3127_v24 = vpop.f32.mrb[15].mxu1 }
 0x9ae   : > { %v1869_v25 = vsel %vm822_vm2, %v1868_v23, -inf }
 0x9af   : > { %1870 = vmax.xlane.f32.xlu0 %v1869_v25 }
 0xa3c   : > { %v1871_v26 = vpop.xlane.xlu0 %1870 }
 0xa3d   : > { %v1872_v27 = vsub.f32 %v1868_v23, %v1871_v26 }
 0xa3f   : > { %v1873_v28 = vmul.f32 1.442695, %v1872_v27  ;;  %v2887_v27 = vld [vmem:[%s3886_s10] ss:$0 sm:$0xff] }
 0xa41   : > { %3327 = vpow2.f32 %v1873_v28 }
 0xa4b   : > { %v3328_v29 = vpop.eup %3327 }
 0xa4c   : > { %v1875_v30 = vsel %vm822_vm2, %v3328_v29, 0.0 }
 0xa4d   : > { %1876 = vadd.xlane.f32.xlu1 %v1875_v30 }
 0xada   : > { %v1877_v33 = vpop.xlane.xlu1 %1876 }
 0xadb   : > { %3329 = vrcp.f32 %v1877_v33 }
 0xae5   : > { %v3330_v36 = vpop.eup %3329 }
 0xae6   : > { %v1879_v38 = vmul.f32 %v3330_v36, %v3328_v29  ;;  %v2553_v36 = vld [vmem:[%s3889_s13] sm:$0xff] }
 0xae8   : > { %3131 = vmatmul.mubr.msk.f32.vlgmr.msra.gmra.mrb[16].mxu1 %vm822_vm2, %v1879_v38  ;;  %v2555_v38 = vld [vmem:[%s3889_s13 + $0x10] sm:$0xff] }
 0xae9   : > { %3272 = vmatpush3.bf16.msra.mxu1 %v3271_v37  ;;  %3146 = vmatprep.mubr.msk.f32.mxu1 %vm3348_vm1, %v3349_v20  ;;  %v3292_v40 = vpack.c.bf16 %v2556_v39, %v2555_v38 }
 0xaea   : > { %3273 = vmatprep.subr.bf16.mxu1 %v3347_v12 }
 0xaed   : > { %3275 = vmatpush3.bf16.msra.mxu1 %v3274_v41 }
 0xaee   : > { %3282 = vmatprep.subr.bf16.mxu1 %v3347_v12 }
 0xaf0   : > { %3147 = vmatmul.mubr.msk.f32.vlgmr.msra.gmra.mrb[18].mxu1 %vm547_vm0, %v3508_v32 }
 0xaf1   : > { %3284 = vmatpush3.bf16.msra.mxu1 %v3283_v44  ;;  %3168 = vmatprep.mubr.msk.f32.mxu1 %vm3348_vm1, %v3349_v20 }
 0xaf2   : > { %3285 = vmatprep.subr.bf16.mxu1 %v3347_v12 }
 0xaf5   : > { %3287 = vmatpush3.bf16.msra.mxu1 %v3286_v47  ;;  %v2889_v47 = vld [vmem:[%s3888_s12] ss:$0 sm:$0xff] }
 0xaf6   : > { %3181 = vmatprep.subr.mxu1 %v3349_v20 }
 0xaf8   : > { %3169 = vmatmul.mubr.msk.f32.vlgmr.msra.gmra.mrb[20].mxu1 %vm547_vm0, %v3508_v32 }
 0xaf9   : > { %3183 = vmatprep.mubr.msk.f32.mxu1 %vm3348_vm1, %v3349_v20  ;;  %3182 = vmatpush3.msra.mxu1 %v2885_v17 }
 0xafa   : > { %3294 = vmatprep.subr.bf16.mxu1 %v3347_v12 }
 0xbbb   : > { %v1949_v53 = vpop.f32.mrb[16].mxu1 }
 0xbbc   : > { %v3132_v54 = vpop.f32.mrb[17].mxu1  ;;  %3136 = vmatmul.mubr.msk.f32.vlgmr.msra.gmra.mrb[16].mxu0 %vm822_vm2, %v1949_v53  ;;  %v2648_v53 = vld [vmem:[%s3891_s15 + $0x10] sm:$0xff] }
 0xbbd   : > { %3278 = vmatpush3.bf16.msra.mxu0 %v3277_v50  ;;  %3157 = vmatprep.mubr.msk.f32.mxu0 %vm3348_vm1, %v3349_v20  ;;  %v2646_v50 = vld [vmem:[%s3891_s15] sm:$0xff]  ;;  %v2649_v54 = vld [vmem:[%s3891_s15 + $0x18] sm:$0xff] }
 0xbbe   : > { %3279 = vmatprep.subr.bf16.mxu0 %v3347_v12  ;;  %v3295_v52 = vpack.c.bf16 %v2647_v51, %v2646_v50 }
 0xbc1   : > { %3281 = vmatpush3.bf16.msra.mxu0 %v3280_v55  ;;  %v3298_v55 = vpack.c.bf16 %v2649_v54, %v2648_v53 }
 0xbc2   : > { %3171 = vmatprep.subr.mxu0 %v3349_v20 }
 0xbc3   : > { %v2108_v56 = vpop.f32.mrb[18].mxu1 }
 0xbc4   : > { %v3148_v57 = vpop.f32.mrb[19].mxu1  ;;  %3158 = vmatmul.mubr.msk.f32.vlgmr.msra.gmra.mrb[18].mxu0 %vm547_vm0, %v3508_v32  ;;  %v2109_v5 = vadd.f32 %v2866_v2, %v2108_v56  ;;  %v2650_v56 = vld [vmem:[%s3891_s15 + $0x20] sm:$0xff] }
 0xbc5   : > { %3173 = vmatprep.mubr.msk.f32.mxu0 %vm3348_vm1, %v3349_v20  ;;  %v2651_v57 = vld [vmem:[%s3891_s15 + $0x28] sm:$0xff] }
 0xbcb   : > { %v2274_v58 = vpop.f32.mrb[20].mxu1 }
 0xbcc   : > { %v3170_v59 = vpop.f32.mrb[21].mxu1  ;;  %v2275_v6 = vadd.f32 %v2880_v4, %v2274_v58  ;;  %v3301_v58 = vpack.c.bf16 %v2651_v57, %v2650_v56 }
 0xbcd   : > { %v2652_v59 = vld [vmem:[%s3891_s15 + $0x30] sm:$0xff] }
 0xc8f   : > { %v2024_v60 = vpop.f32.mrb[16].mxu0 }
 0xc90   : > { %v2028_v61 = vadd.f32 %v2024_v60, %v3697_v10  ;;  %v3137_v62 = vpop.f32.mrb[17].mxu0  ;;  %v2653_v60 = vld [vmem:[%s3891_s15 + $0x38] sm:$0xff] }
 0xc91   : > { %v2890_v62 = vld [vmem:[%s3890_s14] ss:$0 sm:$0xff] }
 0xc97   : > { %v2191_v1 = vpop.f32.mrb[18].mxu0 }
 0xc98   : > { %v2192_v3 = vadd.f32 %v2873_v63, %v2191_v1  ;;  %v3159_v32 = vpop.f32.mrb[19].mxu0 }
 0xc9a   : > { %3172 = vmatpush3.xpose.msk.msra.mxu0 %vm822_vm2, %v2192_v3 }
 0xc9b   : > { %3176 = vmatprep.subr.mxu0 %v3349_v20 }
 0xc9d   : > { %3174 = vmatmul.mubr.msk.f32.vlgmr.msra.gmra.mrb[20].mxu0 %vm822_vm2, %v2109_v5 }
 0xc9e   : > { %3177 = vmatpush3.msra.mxu0 %v2275_v6  ;;  %3178 = vmatprep.mubr.msk.f32.mxu0 %vm3348_vm1, %v3349_v20 }
 0xc9f   : > { %3288 = vmatprep.subr.bf16.mxu0 %v3347_v12 }
 0xd70   : > { %v2350_v7 = vpop.f32.mrb[20].mxu0 }
 0xd71   : > { %v2354_v8 = vmul.f32 0.35355338, %v2350_v7  ;;  %v3175_v9 = vpop.f32.mrb[21].mxu0 }
 0xd73   : > { %v2355_v10 = vsel %vm822_vm2, %v2354_v8, -inf }
 0xd74   : > { %2356 = vmax.xlane.f32.xlu0 %v2355_v10  ;;  %v2892_v10 = vld [vmem:[%s3892_s16] ss:$0 sm:$0xff] }
 0xe01   : > { %v2357_v11 = vpop.xlane.xlu0 %2356 }
 0xe02   : > { %v2358_v13 = vsub.f32 %v2354_v8, %v2357_v11 }
 0xe04   : > { %v2359_v14 = vmul.f32 1.442695, %v2358_v13 }
 0xe06   : > { %3331 = vpow2.f32 %v2359_v14 }
 0xe10   : > { %v3332_v15 = vpop.eup %3331 }
 0xe11   : > { %v2361_v16 = vsel %vm822_vm2, %v3332_v15, 0.0 }
 0xe12   : > { %2362 = vadd.xlane.f32.xlu1 %v2361_v16 }
 0xe9f   : > { %v2363_v18 = vpop.xlane.xlu1 %2362 }
 0xea0   : > { %3333 = vrcp.f32 %v2363_v18 }
 0xeaa   : > { %v3334_v19 = vpop.eup %3333 }
 0xeab   : > { %v2365_v21 = vmul.f32 %v3334_v19, %v3332_v15 }
 0xead   : > { %3179 = vmatmul.mubr.msk.f32.vlgmr.msra.gmra.mrb[22].mxu0 %vm822_vm2, %v2365_v21 }
 0xeae   : > { %3194 = vmatprep.mubr.msk.f32.mxu0 %vm3348_vm1, %v3349_v20 }
 0xf80   : > { %v2435_v22 = vpop.f32.mrb[22].mxu0 }
 0xf81   : > { %v3180_v23 = vpop.f32.mrb[23].mxu0  ;;  %3184 = vmatmul.mubr.msk.f32.vlgmr.msra.gmra.mrb[22].mxu1 %vm822_vm2, %v2435_v22 }
 0xf82   : > { %3213 = vmatprep.mubr.msk.f32.mxu1 %vm3348_vm1, %v3349_v20  ;;  %3296 = vmatpush3.bf16.msra.mxu1 %v3295_v52 }
 0xf83   : > { %3297 = vmatprep.subr.bf16.mxu1 %v3347_v12 }
 0xf86   : > { %3299 = vmatpush3.bf16.msra.mxu1 %v3298_v55 }
 0xf87   : > { %3300 = vmatprep.subr.bf16.mxu1 %v3347_v12 }
 0xf8a   : > { %3302 = vmatpush3.bf16.msra.mxu1 %v3301_v58 }
 0xf8b   : > { %3303 = vmatprep.subr.bf16.mxu1 %v3347_v12 }
0x1054   : > { %v2510_v24 = vpop.f32.mrb[22].mxu1 }
0x1055   : > { %v2514_v25 = vadd.f32 %v2510_v24, %v2028_v61  ;;  %v3185_v26 = vpop.f32.mrb[23].mxu1  ;;  %v3304_v61 = vpack.c.bf16 %v2653_v60, %v2652_v59 }
0x1057   : > { %v2515_v28 = vadd.f32 %v2514_v25, %v3456_v0  ;;  %v2554_v0 = vld [vmem:[%s3889_s13 + $0x8] sm:$0xff]  ;;  %3305 = vmatpush3.bf16.msra.mxu1 %v3304_v61 }
0x1058   : > { %v3289_v37 = vpack.c.bf16 %v2554_v0, %v2553_v36 }
0x1059   : > { %v3807_v29 = vadd.f32 %v2887_v27, %v2515_v28 }
0x105a   : > { %3290 = vmatpush3.bf16.msra.mxu0 %v3289_v37 }
0x105b   : > { %v2526_v30 = vsel %vm547_vm0, %v3807_v29, 0.0  ;;  %3291 = vmatprep.subr.bf16.mxu0 %v3347_v12 }
0x105c   : > { %2527 = vadd.xlane.f32.xlu0 %v2526_v30 }
0x105e   : > { %3293 = vmatpush3.bf16.msra.mxu0 %v3292_v40 }
0x10e9   : > { %v2528_v31 = vpop.xlane.xlu0 %2527 }
0x10ea   : > { %v2529_v33 = vmul.f32 0.03125, %v2528_v31 }
0x10ec   : > { %v2530_v34 = vsub.f32 %v3807_v29, %v2529_v33 }
0x10ee   : > { %v2531_v20 = vmul.f32 %v2530_v34, %v2530_v34 }
0x10f0   : > { %v2532_v35 = vsel %vm547_vm0, %v2531_v20, 0.0 }
0x10f1   : > { %2533 = vadd.xlane.f32.xlu1 %v2532_v35 }
0x117e   : > { %v2534_v41 = vpop.xlane.xlu1 %2533 }
0x117f   : > { %v2535_v42 = vmul.f32 0.03125, %v2534_v41 }
0x1181   : > { %v2536_v43 = vadd.f32 1e-05, %v2535_v42 }
0x1183   : > { %3335 = vrsqrt.f32 %v2536_v43 }
0x118d   : > { %v3336_v44 = vpop.eup %3335 }
0x118e   : > { %v2538_v46 = vmul.f32 %v3336_v44, %v2530_v34 }
0x1190   : > { %v2545_v48 = vmul.f32 %v2888_v45, %v2538_v46 }
0x1192   : > { %v2552_v49 = vadd.f32 %v2889_v47, %v2545_v48 }
0x1194   : > { %3195 = vmatmul.mubr.msk.f32.vlgmr.msra.gmra.mrb[24].mxu0 %vm547_vm0, %v2552_v49 }
0x1267   : > { %v2633_v63 = vpop.f32.mrb[24].mxu0 }
0x1268   : > { %v2634_v1 = vadd.f32 %v2890_v62, %v2633_v63  ;;  %v3196_v2 = vpop.f32.mrb[25].mxu0 }
0x126a   : > { %v2637_v3 = vmul.f32 %v2634_v1, %v2634_v1 }
0x126c   : > { %v2638_v12 = vmul.f32 %v2637_v3, %v2634_v1 }
0x126e   : > { %v2639_v32 = vmul.f32 0.044715, %v2638_v12 }
0x1270   : > { %v2640_v4 = vadd.f32 %v2639_v32, %v2634_v1 }
0x1272   : > { %v2641_v5 = vmul.f32 0.7978846, %v2640_v4 }
0x1274   : > { %3337 = vtanh.f32 %v2641_v5 }
0x127e   : > { %v3338_v6 = vpop.eup %3337 }
0x127f   : > { %v2643_v7 = vadd.f32 1.0, %v3338_v6 }
0x1281   : > { %v2644_v8 = vmul.f32 0.5, %v2643_v7 }
0x1283   : > { %v2645_v9 = vmul.f32 %v2644_v8, %v2634_v1 }
0x1285   : > { %3214 = vmatmul.mubr.msk.f32.vlgmr.msra.gmra.mrb[24].mxu1 %vm2661_vm3, %v2645_v9 }
0x1358   : > { %v2731_v11 = vpop.f32.mrb[24].mxu1 }
0x1359   : > { %v2732_v13 = vadd.f32 %v2892_v10, %v2731_v11  ;;  %v3215_v14 = vpop.f32.mrb[25].mxu1 }
0x135b   : > { %v2735_v15 = vadd.f32 %v2732_v13, %v3807_v29 }
0x135d   : > { %2736 = vst.msk [vmem:[%s543_s18] sm:$0xff] %vm547_vm0, %v2735_v15 }
0x135e PF: > { %s27_s24 = sadd.s32 1, %s3345_s24  }
0x135f   : > { %p24_p4 = scmp.ge.s32.totalorder %s27_s24, 4  }
0x1361   :  { %26 = sbr.rel (!%p24_p4) target bundleno = 3 (0x3), region = 139 }

// kernel: _forward_contrast_impl.11
= control target key start
LH: loop header
LB: loop body
LE: loop exit
PB: predicated region body
PF: predicated region fallthrough
CT: control target
= control target key end

     0   :  { %vm14_vm0 = vcmask 254976   ;;  %s234_s0 = inlined_call_operand.vmem [shape: f32[2,32], index: 0, kind: input, shape index: {}]   ;;  %s235_s1 = inlined_call_operand.vmem [shape: f32[2,2], index: 1, kind: input, shape index: {}]   ;;  %s236_s2 = inlined_call_operand.hbm [shape: f32[1,1], index: 2, kind: output, shape index: {}]  }
   0x1   :  { %v12_v0 = vld [vmem:[%s234_s0] sm:$0x3] }
   0x2   :  { %7 = vsyncpa [#allocation3], 0  ;;  %v13_v1 = vmul.f32 %v12_v0, %v12_v0  ;;  %v194_v3 = vmov 0.0   ;;  %vm195_vm1 = vmmov 0   ;;  %vm21_vm2 = vcmask 261120   ;;  %s196_s13 = smov [#allocation2]  }
   0x3   :  { %152 = vmatprep.subr.mxu0 %v194_v3  ;;  %154 = vmatprep.mubr.msk.f32.mxu0 %vm195_vm1, %v194_v3  ;;  %vm96_vm3 = vcmask 9216   ;;  %v110_v16 = vld [vmem:[%s235_s1] sm:$0x3]  ;;  %s140_s14 = sshll.u32 %s196_s13, 4  ;;  %vm132_vm4 = vcmask 0   ;;  %s141_s14 = int_to_ptr.vmem [resolvable:$true] %s140_s14 }
   0x4   :  { %v15_v2 = vsel %vm14_vm0, %v13_v1, 0.0  ;;  %v111_v18 = vsel %vm96_vm3, %v110_v16, 0.0  ;;  %s170_s16 = scalar_lea.vmem %s141_s14, 16  ;;  %s174_s17 = scalar_lea.vmem %s141_s14, 32 }
   0x5   :  { %16 = vadd.xlane.f32.xlu0 %v15_v2  ;;  %p171_p0 = scmp.ne.s32.totalorder %s141_s14, %s170_s16  ;;  %p175_p1 = scmp.lt.s32.totalorder %s141_s14, %s141_s14 }
   0x6   :  { %p176_p2 = scmp.lt.s32.totalorder %s174_s17, %s170_s16 }
   0x8   :  { %p177_p3 = por %p176_p2, %p175_p1 }
   0xa   :  { %p178_p4 = pnand %p177_p3, %p171_p0 }
  0x92   :  { %v17_v4 = vpop.xlane.xlu0 %16 }
  0x93   :  { %v18_v5 = vadd.f32 1e-06, %v17_v4 }
  0x95   :  { %162 = vrsqrt.f32 %v18_v5 }
  0x9f   :  { %v163_v6 = vpop.eup %162 }
  0xa0   :  { %v20_v7 = vmul.f32 %v163_v6, %v12_v0 }
  0xa2   :  { %153 = vmatpush3.xpose.msk.msra.mxu0 %vm21_vm2, %v20_v7 }
  0xa5   :  { %155 = vmatmul.mubr.msk.f32.vlgmr.msra.gmra.mrb[0].mxu0 %vm21_vm2, %v20_v7 }
 0x178   :  { %v91_v8 = vpop.f32.mrb[0].mxu0 }
 0x179   :  { %v95_v9 = vmul.f32 14.285714, %v91_v8  ;;  %v156_v10 = vpop.f32.mrb[1].mxu0 }
 0x17b   :  { %v97_v11 = vsel %vm96_vm3, %v95_v9, -inf }
 0x17c   :  { %98 = vmax.xlane.f32.xlu0 %v97_v11 }
 0x209   :  { %v99_v12 = vpop.xlane.xlu0 %98 }
 0x20a   :  { %v100_v13 = vsub.f32 %v95_v9, %v99_v12 }
 0x20c   :  { %v101_v14 = vmul.f32 1.442695, %v100_v13 }
 0x20e   :  { %164 = vpow2.f32 %v101_v14 }
 0x218   :  { %v165_v15 = vpop.eup %164 }
 0x219   :  { %v103_v17 = vsel %vm96_vm3, %v165_v15, 0.0 }
 0x21a   :  { %104 = vadd.xlane.f32.xlu1 %v103_v17 }
 0x21e   :  { %112 = vadd.xlane.f32.xlu1 %v111_v18 }
 0x2a7   :  { %v105_v19 = vpop.xlane.xlu1 %104 }
 0x2a8   :  { %166 = vlog2.f32 %v105_v19 }
 0x2ab   :  { %v113_v20 = vpop.xlane.xlu1 %112 }
 0x2ac   :  { %168 = vrcp.f32 %v113_v20 }
 0x2b2   :  { %v167_v21 = vpop.eup %166 }
 0x2b3   :  { %v107_v22 = vmul.f32 0.6931472, %v167_v21 }
 0x2b5   :  { %v108_v23 = vadd.f32 %v107_v22, %v99_v12 }
 0x2b6   :  { %v169_v24 = vpop.eup %168 }
 0x2b7   :  { %v109_v25 = vsub.f32 %v95_v9, %v108_v23  ;;  %v115_v26 = vmul.f32 %v169_v24, %v110_v16 }
 0x2b9   :  { %v116_v27 = vmul.f32 %v115_v26, %v109_v25 }
 0x2bb   :  { %v117_v28 = vsel %vm96_vm3, %v116_v27, 0.0 }
 0x2bc   :  { %118 = vadd.xlane.f32.xlu0 %v117_v28 }
 0x349   :  { %v119_v29 = vpop.xlane.xlu0 %118 }
 0x34a   :  { %v120_v30 = vrot.slane %v119_v29, 4 }
 0x34c   :  { %v121_v31 = vadd.f32 %v120_v30, %v119_v29 }
 0x34e   :  { %v122_v32 = vrot.slane %v121_v31, 2 }
 0x350   :  { %v123_v33 = vadd.f32 %v122_v32, %v121_v31 }
 0x352   :  { %v124_v34 = vrot.slane %v123_v33, 1 }
 0x354   :  { %v125_v35 = vadd.f32 %v124_v34, %v123_v33 }
 0x356   :  { %157 = vpush %v125_v35 }
 0x387   :  { %s158_s1 = spop %157 }
 0x388   :  { %s127_s12 = ssub.f32 0.0, %s158_s1 }
 0x38a   :  { %s130_s15 = smul.f32 0.5, %s127_s12 }
 0x38c   :  { %v131_v36 = vstv %s130_s15 }
 0x38d   :  { %133 = vst.msk [vmem:[#allocation2] sm:$0x1] %vm132_vm4, %v131_v36 }
 0x38e   :  { %181 = shalt.err (!%p178_p4)
}
 0x38f   :  { %s182_s20 = scalar_lea.hbm %s236_s2, 16 }
 0x390   :  { %p183_p5 = scmp.ne.s32.totalorder %s236_s2, %s182_s20  ;;  %p186_p6 = scmp.lt.u32.totalorder %s182_s20, %s236_s2 }
 0x392   :  { %p188_p7 = pnand %p186_p6, %p183_p5 }
 0x394   :  { %191 = shalt.err (!%p188_p7)
}
 0x395   :  { %143 = dma.vmem_to_hbm [thread:$0]  %s141_s14, 16, %s236_s2, [#allocation3]  }
 0x396   :  { %192 = dma.done.wait [#allocation3], 16  }
 0x397   :  { %193 = vsyncadd [#allocation3], 4294967280 }
 0x398   :  { %147 = vsyncpa [#allocation3], 1 }

// kernel: _forward_contrast_impl.10
= control target key start
LH: loop header
LB: loop body
LE: loop exit
PB: predicated region body
PF: predicated region fallthrough
CT: control target
= control target key end

     0   :  { %14 = vsyncpa [#allocation3], 0  ;;  %vm36_vm0 = vcmask 261120   ;;  %s622_s0 = inlined_call_operand.vmem [shape: f32[32,32], index: 0, kind: input, shape index: {}]   ;;  %s623_s1 = inlined_call_operand.vmem [shape: f32[1,32], index: 1, kind: input, shape index: {}]   ;;  %s624_s2 = inlined_call_operand.vmem [shape: f32[1,32], index: 2, kind: input, shape index: {}]   ;;  %s625_s3 = inlined_call_operand.vmem [shape: f32[32,64], index: 3, kind: input, shape index: {}]   ;;  %s626_s4 = inlined_call_operand.vmem [shape: f32[1,64], index: 4, kind: input, shape index: {}]   ;;  %s627_s5 = inlined_call_operand.vmem [shape: f32[32,64], index: 5, kind: input, shape index: {}]   ;;  %s628_s6 = inlined_call_operand.vmem [shape: f32[1,32], index: 6, kind: input, shape index: {}]   ;;  %s629_s7 = inlined_call_operand.hbm [shape: f32[32,64], index: 7, kind: output, shape index: {0}]   ;;  %s630_s8 = inlined_call_operand.hbm [shape: f32[1,1], index: 8, kind: output, shape index: {1}]  }
   0x1   :  { %v30_v0 = vld [vmem:[%s622_s0] sm:$0xff]  ;;  %v32_v1 = vld [vmem:[%s622_s0 + $0x10] sm:$0xff]  ;;  %v31_v2 = vld [vmem:[%s622_s0 + $0x8] sm:$0xff] }
   0x2   :  { %v37_v3 = vsel %vm36_vm0, %v30_v0, 0.0  ;;  %v43_v4 = vsel %vm36_vm0, %v32_v1, 0.0  ;;  %v33_v5 = vld [vmem:[%s622_s0 + $0x18] sm:$0xff] }
   0x3   :  { %15 = vsyncpa [#allocation5], 0  ;;  %38 = vadd.xlane.f32.xlu0 %v37_v3  ;;  %44 = vadd.xlane.f32.xlu1 %v43_v4  ;;  %v40_v6 = vsel %vm36_vm0, %v31_v2, 0.0  ;;  %v46_v7 = vsel %vm36_vm0, %v33_v5, 0.0  ;;  %v110_v28 = vld [vmem:[%s625_s3] sm:$0xff]  ;;  %v111_v29 = vld [vmem:[%s625_s3 + $0x8] sm:$0xff] }
   0x4   :  { %v112_v30 = vld [vmem:[%s625_s3 + $0x10] sm:$0xff]  ;;  %v402_v31 = vpack.c.bf16 %v111_v29, %v110_v28  ;;  %v113_v32 = vld [vmem:[%s625_s3 + $0x18] sm:$0xff]  ;;  %v356_v47 = vld [vmem:[%s623_s1] ss:$0 sm:$0xff]  ;;  %vm482_vm1 = vmmov 0   ;;  %vm218_vm2 = vcmask 523264  }
   0x5   :  { %v406_v33 = vpack.c.bf16 %v113_v32, %v112_v30  ;;  %v357_v49 = vld [vmem:[%s624_s2] ss:$0 sm:$0xff]  ;;  %v224_v4 = vld [vmem:[%s627_s5 + $0x8] sm:$0xff]  ;;  %vm309_vm3 = vcmask 516096  }
   0x6   :  { %403 = vmatprep.subr.bf16.mxu0 %v402_v31 }
   0x7   :  { %41 = vadd.xlane.f32.xlu0 %v40_v6  ;;  %47 = vadd.xlane.f32.xlu1 %v46_v7  ;;  %v223_v7 = vld [vmem:[%s627_s5] sm:$0xff] }
   0x8   :  { %405 = vmatpush3.bf16.msra.mxu0 %v402_v31 }
   0x9   :  { %407 = vmatprep.subr.bf16.mxu0 %v406_v33 }
   0xc   :  { %409 = vmatpush3.bf16.msra.mxu0 %v406_v33 }
  0x90   :  { %v39_v8 = vpop.xlane.xlu0 %38  ;;  %v45_v9 = vpop.xlane.xlu1 %44 }
  0x91   :  { %v50_v10 = vmul.f32 0.03125, %v39_v8  ;;  %v52_v11 = vmul.f32 0.03125, %v45_v9 }
  0x93   :  { %v54_v12 = vsub.f32 %v30_v0, %v50_v10  ;;  %v56_v13 = vsub.f32 %v32_v1, %v52_v11  ;;  %v481_v0 = vmov 0.0|0.0   ;;  %v483_v1 = vmov 0.0  }
  0x94   :  { %v42_v14 = vpop.xlane.xlu0 %41  ;;  %v48_v15 = vpop.xlane.xlu1 %47  ;;  %410 = vmatprep.subr.bf16.mxu1 %v481_v0  ;;  %399 = vmatprep.mubr.msk.f32.mxu1 %vm482_vm1, %v483_v1 }
  0x95   :  { %v51_v16 = vmul.f32 0.03125, %v42_v14  ;;  %v53_v17 = vmul.f32 0.03125, %v48_v15  ;;  %v58_v18 = vmul.f32 %v54_v12, %v54_v12  ;;  %v60_v19 = vmul.f32 %v56_v13, %v56_v13 }
  0x97   :  { %v55_v20 = vsub.f32 %v31_v2, %v51_v16  ;;  %v57_v21 = vsub.f32 %v33_v5, %v53_v17  ;;  %v62_v22 = vsel %vm36_vm0, %v58_v18, 0.0  ;;  %v68_v23 = vsel %vm36_vm0, %v60_v19, 0.0  ;;  %v358_v2 = vld [vmem:[%s626_s4] ss:$0 sm:$0xff]  ;;  %v225_v16 = vld [vmem:[%s627_s5 + $0x10] sm:$0xff] }
  0x98   :  { %63 = vadd.xlane.f32.xlu0 %v62_v22 }
  0x99   :  { %v59_v24 = vmul.f32 %v55_v20, %v55_v20  ;;  %v61_v25 = vmul.f32 %v57_v21, %v57_v21 }
  0x9b   :  { %v65_v26 = vsel %vm36_vm0, %v59_v24, 0.0  ;;  %v71_v27 = vsel %vm36_vm0, %v61_v25, 0.0  ;;  %v235_v25 = vld [vmem:[%s628_s6] sm:$0x1] }
  0x9c   :  { %69 = vadd.xlane.f32.xlu0 %v68_v23  ;;  %66 = vadd.xlane.f32.xlu1 %v65_v26 }
  0xa0   :  { %72 = vadd.xlane.f32.xlu1 %v71_v27 }
 0x125   :  { %v64_v34 = vpop.xlane.xlu0 %63 }
 0x126   :  { %v74_v35 = vmul.f32 0.03125, %v64_v34 }
 0x128   :  { %v78_v36 = vadd.f32 1e-05, %v74_v35 }
 0x129   :  { %v67_v37 = vpop.xlane.xlu1 %66  ;;  %v70_v38 = vpop.xlane.xlu0 %69 }
 0x12a   :  { %425 = vrsqrt.f32 %v78_v36  ;;  %v75_v39 = vmul.f32 0.03125, %v67_v37  ;;  %v76_v40 = vmul.f32 0.03125, %v70_v38 }
 0x12c   :  { %v79_v41 = vadd.f32 1e-05, %v75_v39  ;;  %v80_v42 = vadd.f32 1e-05, %v76_v40 }
 0x12d   :  { %v73_v43 = vpop.xlane.xlu1 %72 }
 0x12e   :  { %427 = vrsqrt.f32 %v79_v41  ;;  %v77_v44 = vmul.f32 0.03125, %v73_v43 }
 0x12f   :  { %429 = vrsqrt.f32 %v80_v42 }
 0x130   :  { %v81_v45 = vadd.f32 1e-05, %v77_v44 }
 0x132   :  { %431 = vrsqrt.f32 %v81_v45 }
 0x134   :  { %v426_v46 = vpop.eup %425 }
 0x135   :  { %v86_v48 = vmul.f32 %v426_v46, %v54_v12  ;;  %v226_v12 = vld [vmem:[%s627_s5 + $0x18] sm:$0xff]  ;;  %s484_s5 = smov [#allocation2]  }
 0x136   :  { %s331_s10 = sshll.u32 %s484_s5, 4  ;;  %s332_s10 = int_to_ptr.vmem [resolvable:$true] %s331_s10 }
 0x137   :  { %v96_v50 = vmul.f32 %v356_v47, %v86_v48  ;;  %s433_s11 = scalar_lea.vmem %s332_s10, 512  ;;  %p438_p1 = scmp.lt.s32.totalorder %s332_s10, %s332_s10 }
 0x138   :  { %v428_v51 = vpop.eup %427  ;;  %p434_p0 = scmp.ne.s32.totalorder %s332_s10, %s433_s11  ;;  %p439_p2 = scmp.lt.s32.totalorder %s433_s11, %s433_s11 }
 0x139   :  { %v430_v52 = vpop.eup %429  ;;  %v106_v53 = vadd.f32 %v357_v49, %v96_v50  ;;  %v87_v54 = vmul.f32 %v428_v51, %v55_v20 }
 0x13a   :  { %v88_v55 = vmul.f32 %v430_v52, %v56_v13  ;;  %p440_p3 = por %p439_p2, %p438_p1 }
 0x13b   :  { %385 = vmatprep.mubr.msk.f32.mxu0 %vm36_vm0, %v106_v53  ;;  %v97_v56 = vmul.f32 %v356_v47, %v87_v54 }
 0x13c   :  { %v432_v57 = vpop.eup %431  ;;  %v98_v58 = vmul.f32 %v356_v47, %v88_v55  ;;  %p441_p4 = pnand %p440_p3, %p434_p0 }
 0x13d   :  { %v107_v59 = vadd.f32 %v357_v49, %v97_v56  ;;  %v89_v60 = vmul.f32 %v432_v57, %v57_v21 }
 0x13e   :  { %v108_v61 = vadd.f32 %v357_v49, %v98_v58 }
 0x13f   :  { %386 = vmatmul.mubr.msk.f32.vlgmr.msra.gmra.mrb[0].mxu0 %vm36_vm0, %v107_v59  ;;  %v99_v62 = vmul.f32 %v356_v47, %v89_v60 }
 0x140   :  { %388 = vmatprep.mubr.msk.f32.mxu0 %vm36_vm0, %v108_v61 }
 0x141   :  { %v109_v63 = vadd.f32 %v357_v49, %v99_v62 }
 0x143   :  { %389 = vmatmul.mubr.msk.f32.gmra.mrb[2].mxu0 %vm36_vm0, %v109_v63 }
 0x212   :  { %v387_v3 = vpop.f32.mrb[0].mxu0 }
 0x213   :  { %v205_v5 = vadd.f32 %v387_v3, %v358_v2  ;;  %v199_v6 = vpop.f32.mrb[1].mxu0 }
 0x214   :  { %v200_v8 = vadd.f32 %v358_v2, %v199_v6 }
 0x215   :  { %220 = vst.msk [vmem:[#allocation2 + $0x8] sm:$0xff] %vm218_vm2, %v205_v5  ;;  %v228_v9 = vsub.f32 %v205_v5, %v224_v4 }
 0x216   :  { %219 = vst.msk [vmem:[#allocation2] sm:$0xff] %vm218_vm2, %v200_v8  ;;  %v227_v10 = vsub.f32 %v200_v8, %v223_v7  ;;  %v390_v11 = vpop.f32.mrb[2].mxu0 }
 0x217   :  { %v232_v13 = vmul.f32 %v228_v9, %v228_v9  ;;  %v215_v14 = vadd.f32 %v390_v11, %v358_v2  ;;  %v209_v15 = vpop.f32.mrb[3].mxu0 }
 0x218   :  { %v231_v17 = vmul.f32 %v227_v10, %v227_v10  ;;  %v210_v18 = vadd.f32 %v358_v2, %v209_v15 }
 0x219   :  { %222 = vst.msk [vmem:[#allocation2 + $0x18] sm:$0xff] %vm218_vm2, %v215_v14  ;;  %v230_v19 = vsub.f32 %v215_v14, %v226_v12 }
 0x21a   :  { %221 = vst.msk [vmem:[#allocation2 + $0x10] sm:$0xff] %vm218_vm2, %v210_v18  ;;  %v229_v20 = vsub.f32 %v210_v18, %v225_v16  ;;  %v411_v21 = vpack.c.bf16 %v232_v13, %v231_v17 }
 0x21b   :  { %v234_v22 = vmul.f32 %v230_v19, %v230_v19 }
 0x21c   :  { %v233_v23 = vmul.f32 %v229_v20, %v229_v20  ;;  %412 = vmatpush3.bf16.msra.mxu1 %v411_v21 }
 0x21d   :  { %413 = vmatprep.subr.bf16.mxu1 %v481_v0 }
 0x21e   :  { %v414_v24 = vpack.c.bf16 %v234_v22, %v233_v23 }
 0x220   :  { %415 = vmatpush3.bf16.msra.mxu1 %v414_v24 }
 0x223   :  { %400 = vmatmul.mubr.msk.f32.vlgmr.msra.gmra.mrb[0].mxu1 %vm36_vm0, %v235_v25 }
 0x2f6   :  { %v305_v26 = vpop.f32.mrb[0].mxu1 }
 0x2f7   :  { %v401_v27 = vpop.f32.mrb[1].mxu1  ;;  %v310_v28 = vsel %vm309_vm3, %v305_v26, 0.0 }
 0x2f8   :  { %311 = vadd.xlane.f32.xlu0 %v310_v28 }
 0x2f9   :  { %444 = shalt.err (!%p441_p4)
}
 0x2fa   :  { %s445_s6 = scalar_lea.hbm %s629_s7, 512 }
 0x2fb   :  { %p446_p5 = scmp.ne.s32.totalorder %s629_s7, %s445_s6  ;;  %p449_p6 = scmp.lt.u32.totalorder %s445_s6, %s629_s7 }
 0x2fd   :  { %p451_p7 = pnand %p449_p6, %p446_p5 }
 0x2ff   :  { %454 = shalt.err (!%p451_p7)
}
 0x300   :  { %s485_s17 = smov 128   ;;  %s486_s18 = smov 8   ;;  %vm324_vm4 = vcmask 0  }
 0x301   :  { %337 = dma.vmem_to_hbm [thread:$0]  %s332_s10, 512, %s629_s7, [#allocation3], %s485_s17, %s485_s17, %s486_s18  }
 0x302   :  { %s487_s20 = smov [#allocation4]  }
 0x303   :  { %s344_s21 = sshll.u32 %s487_s20, 4  ;;  %s345_s21 = int_to_ptr.vmem [resolvable:$true] %s344_s21 }
 0x304   :  { %s455_s2 = scalar_lea.vmem %s345_s21, 16  ;;  %s459_s23 = scalar_lea.vmem %s345_s21, 32 }
 0x305   :  { %p456_p8 = scmp.ne.s32.totalorder %s345_s21, %s455_s2  ;;  %p460_p9 = scmp.lt.s32.totalorder %s345_s21, %s345_s21 }
 0x306   :  { %p461_p10 = scmp.lt.s32.totalorder %s459_s23, %s455_s2 }
 0x308   :  { %p462_p11 = por %p461_p10, %p460_p9 }
 0x30a   :  { %p463_p12 = pnand %p462_p11, %p456_p8 }
 0x385   :  { %v312_v29 = vpop.xlane.xlu0 %311 }
 0x386   :  { %v313_v30 = vrot.slane %v312_v29, 4 }
 0x388   :  { %v314_v31 = vadd.f32 %v313_v30, %v312_v29 }
 0x38a   :  { %v315_v32 = vrot.slane %v314_v31, 2 }
 0x38c   :  { %v316_v33 = vadd.f32 %v315_v32, %v314_v31 }
 0x38e   :  { %v317_v34 = vrot.slane %v316_v33, 1 }
 0x390   :  { %v318_v35 = vadd.f32 %v317_v34, %v316_v33 }
 0x392   :  { %416 = vpush %v318_v35 }
 0x3c3   :  { %s417_s22 = spop %416 }
 0x3c4   :  { %s322_s1 = smul.f32 0.015625, %s417_s22 }
 0x3c6   :  { %v323_v36 = vstv %s322_s1 }
 0x3c7   :  { %325 = vst.msk [vmem:[#allocation4] sm:$0x1] %vm324_vm4, %v323_v36 }
 0x3c8   :  { %466 = shalt.err (!%p463_p12)
}
 0x3c9   :  { %s467_s25 = scalar_lea.hbm %s630_s8, 16 }
 0x3ca   :  { %p468_p13 = scmp.ne.s32.totalorder %s630_s8, %s467_s25  ;;  %p471_p0 = scmp.lt.u32.totalorder %s467_s25, %s630_s8 }
 0x3cc   :  { %p473_p1 = pnand %p471_p0, %p468_p13 }
 0x3ce   :  { %476 = shalt.err (!%p473_p1)
}
 0x3cf   :  { %347 = dma.vmem_to_hbm [thread:$0]  %s345_s21, 16, %s630_s8, [#allocation5]  }
 0x3d0   :  { %477 = dma.done.wait [#allocation3], 512  }
 0x3d1   :  { %478 = vsyncadd [#allocation3], 4294966784 }
 0x3d2   :  { %479 = dma.done.wait [#allocation5], 16  }
 0x3d3   :  { %480 = vsyncadd [#allocation5], 4294967280 }
 0x3d4   :  { %354 = vsyncpa [#allocation3], 1 }
 0x3d5   :  { %355 = vsyncpa [#allocation5], 1 }

// kernel: _forward_contrast_impl.9
= control target key start
LH: loop header
LB: loop body
LE: loop exit
PB: predicated region body
PF: predicated region fallthrough
CT: control target
= control target key end

     0   :  { %s3905_s24 = smov 0   ;;  %s4330_s0 = inlined_call_operand.vmem [shape: f32[2,16,32], index: 0, kind: input, shape index: {}]   ;;  %s4331_s1 = inlined_call_operand.vmem [shape: f32[1,32], index: 1, kind: input, shape index: {}, may-alias: {1,11}]   ;;  %s4332_s2 = inlined_call_operand.vmem [shape: f32[1,32], index: 2, kind: input, shape index: {}, may-alias: {2,10,12,16}]   ;;  %s4333_s3 = inlined_call_operand.vmem [shape: f32[4,32,8], index: 3, kind: input, shape index: {}]   ;;  %s4334_s4 = inlined_call_operand.vmem [shape: f32[4,1,8], index: 4, kind: input, shape index: {}, may-alias: {4,6,8}]   ;;  %s4335_s5 = inlined_call_operand.vmem [shape: f32[4,32,8], index: 5, kind: input, shape index: {}]   ;;  %s4336_s6 = inlined_call_operand.vmem [shape: f32[4,1,8], index: 6, kind: input, shape index: {}, may-alias: {4,6,8}]   ;;  %s4337_s7 = inlined_call_operand.vmem [shape: f32[4,32,8], index: 7, kind: input, shape index: {}]   ;;  %s4338_s8 = inlined_call_operand.vmem [shape: f32[4,1,8], index: 8, kind: input, shape index: {}, may-alias: {4,6,8}]   ;;  %s4339_s9 = inlined_call_operand.vmem [shape: f32[4,8,32], index: 9, kind: input, shape index: {}]   ;;  %s4340_s10 = inlined_call_operand.vmem [shape: f32[1,32], index: 10, kind: input, shape index: {}, may-alias: {2,10,12,16}]   ;;  %s4341_s11 = inlined_call_operand.vmem [shape: f32[1,32], index: 11, kind: input, shape index: {}, may-alias: {1,11}]   ;;  %s4342_s12 = inlined_call_operand.vmem [shape: f32[1,32], index: 12, kind: input, shape index: {}, may-alias: {2,10,12,16}]   ;;  %s4343_s13 = inlined_call_operand.vmem [shape: f32[32,64], index: 13, kind: input, shape index: {}]   ;;  %s4344_s14 = inlined_call_operand.vmem [shape: f32[1,64], index: 14, kind: input, shape index: {}]   ;;  %s4345_s15 = inlined_call_operand.vmem [shape: f32[64,32], index: 15, kind: input, shape index: {}]   ;;  %s4346_s16 = inlined_call_operand.vmem [shape: f32[1,32], index: 16, kind: input, shape index: {}, may-alias: {2,10,12,16}]   ;;  %s4347_s17 = inlined_call_operand.vmem [shape: f32[2,16,32], index: 17, kind: output, shape index: {}]  }
   0x1   :  { %4348 = sst [smem:[#allocation2_spill]] %s4330_s0 }
   0x2   :  { %4349 = sst [smem:[#allocation3_spill]] %s4331_s1 }
   0x3 LB: > { %s3079_s25 = sadd.s32 4294967295, %s3813_s24   ;;  %p3083_p0 = scmp.ge.s32.totalorder %s3813_s24, 1  ;;  %s3813_s24 = sphi %s3905_s24, %s27_s24  }
   0x4   : > { %p487_p1 = scmp.lt.s32.totalorder %s3813_s24, 3 }
   0x6   : > { %p488_p2 = pnand %p3083_p0, %p487_p1 }
   0x7   : > { %p539_p3 = scmp.lt.s32.totalorder (!%p488_p2), %s3079_s25, 1  ;;  %vm553_vm0 = vcmask (!%p488_p2), 261120   ;;  %s4350_s29 = sld [smem:[#allocation2_spill]] (!%p488_p2)  ;;  %v597_v14 = vld [vmem:[%s4333_s3] sm:$0xff] (!%p488_p2)  ;;  %v598_v15 = vld [vmem:[%s4333_s3 + $0x8] sm:$0xff] (!%p488_p2)  ;;  %v599_v20 = vld [vmem:[%s4333_s3 + $0x10] sm:$0xff] (!%p488_p2) }
   0x8   : > { %491 = sbr.rel (%p488_p2) target bundleno = 5030 (0x13a6), region = 88  ;;  %v3589_v16 = vpack.c.bf16 (!%p488_p2), %v598_v15, %v597_v14  ;;  %v775_v17 = vld [vmem:[%s4337_s7] sm:$0xff] (!%p488_p2)  ;;  %v776_v18 = vld [vmem:[%s4337_s7 + $0x8] sm:$0xff] (!%p488_p2)  ;;  %v600_v21 = vld [vmem:[%s4333_s3 + $0x18] sm:$0xff] (!%p488_p2)  ;;  %vm861_vm1 = vcmask (!%p488_p2), 64512   ;;  %vm951_vm3 = vcmask (!%p488_p2), 130048  }
   0x9   : > { %v3605_v19 = vpack.c.bf16 (!%p488_p2), %v776_v18, %v775_v17  ;;  %v3593_v22 = vpack.c.bf16 (!%p488_p2), %v600_v21, %v599_v20  ;;  %v777_v23 = vld [vmem:[%s4337_s7 + $0x10] sm:$0xff] (!%p488_p2)  ;;  %v778_v24 = vld [vmem:[%s4337_s7 + $0x18] sm:$0xff] (!%p488_p2)  ;;  %v689_v26 = vld [vmem:[%s4335_s5] sm:$0xff] (!%p488_p2)  ;;  %vm2938_vm4 = vcmask (!%p488_p2), 523264  }
   0xa   : > { %3590 = vmatprep.subr.bf16.mxu1 (!%p488_p2), %v3589_v16  ;;  %v3609_v25 = vpack.c.bf16 (!%p488_p2), %v778_v24, %v777_v23  ;;  %v690_v27 = vld [vmem:[%s4335_s5 + $0x8] sm:$0xff] (!%p488_p2)  ;;  %v3089_v38 = vld [vmem:[%s4332_s2] ss:$0 sm:$0xff] (!%p488_p2)  ;;  %v691_v43 = vld [vmem:[%s4335_s5 + $0x10] sm:$0xff] (!%p488_p2) }
   0xb   : > { %3592 = vmatpush3.bf16.msra.mxu1 (!%p488_p2), %v3589_v16  ;;  %3606 = vmatprep.subr.bf16.mxu0 (!%p488_p2), %v3605_v19  ;;  %v3597_v28 = vpack.c.bf16 (!%p488_p2), %v690_v27, %v689_v26  ;;  %v692_v44 = vld [vmem:[%s4335_s5 + $0x18] sm:$0xff] (!%p488_p2)  ;;  %v3096_v48 = vld [vmem:[%s4338_s8] ss:$0 sm:$0xff] (!%p488_p2)  ;;  %v3106_v63 = vld [vmem:[%s4333_s3 + $0x28] sm:$0xff] (!%p488_p2) }
   0xc   : > { %3608 = vmatpush3.bf16.msra.mxu0 (!%p488_p2), %v3605_v19  ;;  %3594 = vmatprep.subr.bf16.mxu1 (!%p488_p2), %v3593_v22  ;;  %v3601_v47 = vpack.c.bf16 (!%p488_p2), %v692_v44, %v691_v43  ;;  %v3090_v49 = vld [vmem:[%s4334_s4] ss:$0 sm:$0xff] (!%p488_p2)  ;;  %vm4009_vm2 = vmpackc.low (!%p488_p2), %vm861_vm1, %vm861_vm1  ;;  %v3124_v14 = vld [vmem:[%s4337_s7 + $0x38] sm:$0xff] (!%p488_p2) }
   0xd   : > { %3610 = vmatprep.subr.bf16.mxu0 (!%p488_p2), %v3609_v25  ;;  %v3093_v58 = vld [vmem:[%s4336_s6] ss:$0 sm:$0xff] (!%p488_p2)  ;;  %v3126_v26 = vld [vmem:[%s4338_s8 + $0x1] ss:$0 sm:$0xff] (!%p488_p2)  ;;  %v3114_v44 = vld [vmem:[%s4335_s5 + $0x28] sm:$0xff] (!%p488_p2) }
   0xe   : > { %v3105_v62 = vld [vmem:[%s4333_s3 + $0x20] sm:$0xff] (!%p488_p2) }
   0xf   : > { %s4355_s25 = smov (!%p539_p3, %s3079_s25), 1  ;;  %3596 = vmatpush3.bf16.msra.mxu1 %v3593_v22  ;;  %v3110_v22 = vld [vmem:[%s4334_s4 + $0x1] ss:$0 sm:$0xff] }
  0x10   : > { %s3217_s26 = sshll.u32 %s4355_s25, 4  ;;  %3612 = vmatpush3.bf16.msra.mxu0 %v3609_v25  ;;  %3598 = vmatprep.subr.bf16.mxu1 %v3597_v28  ;;  %v3113_v43 = vld [vmem:[%s4335_s5 + $0x20] sm:$0xff] }
  0x11   : > { %s543_s0 = scalar_lea.vmem %s4350_s29, %s3217_s26  ;;  %s4351_s29 = sld [smem:[#allocation3_spill]] }
  0x12   : > { %v3921_v0 = vld [vmem:[%s543_s0] sm:$0xff]  ;;  %v3923_v1 = vld [vmem:[%s543_s0 + $0x8] sm:$0xff]  ;;  %s548_s18 = scalar_lea.vmem %s4347_s17, %s3217_s26 }
  0x13   : > { %v554_v2 = vsel %vm553_vm0, %v3921_v0, 0.0  ;;  %v557_v3 = vsel %vm553_vm0, %v3923_v1, 0.0 }
  0x14   : > { %555 = vadd.xlane.f32.xlu0 %v554_v2 }
  0x17   : > { %v3088_v36 = vld [vmem:[%s4351_s29] ss:$0 sm:$0xff] }
  0x18   : > { %558 = vadd.xlane.f32.xlu0 %v557_v3 }
  0xa1   : > { %v556_v4 = vpop.xlane.xlu0 %555 }
  0xa2   : > { %v561_v5 = vmul.f32 0.03125, %v556_v4 }
  0xa4   : > { %v563_v6 = vsub.f32 %v3921_v0, %v561_v5  ;;  %v3623_v5 = vpack.c.bf16 %v3106_v63, %v3105_v62 }
  0xa5   : > { %v559_v7 = vpop.xlane.xlu0 %558 }
  0xa6   : > { %v562_v8 = vmul.f32 0.03125, %v559_v7  ;;  %v565_v9 = vmul.f32 %v563_v6, %v563_v6  ;;  %v3108_v7 = vld [vmem:[%s4333_s3 + $0x38] sm:$0xff] }
  0xa8   : > { %v564_v10 = vsub.f32 %v3923_v1, %v562_v8  ;;  %v567_v11 = vsel %vm553_vm0, %v565_v9, 0.0 }
  0xa9   : > { %568 = vadd.xlane.f32.xlu1 %v567_v11  ;;  %v3122_v11 = vld [vmem:[%s4337_s7 + $0x28] sm:$0xff] }
  0xaa   : > { %v566_v12 = vmul.f32 %v564_v10, %v564_v10 }
  0xac   : > { %v570_v13 = vsel %vm553_vm0, %v566_v12, 0.0 }
  0xad   : > { %571 = vadd.xlane.f32.xlu1 %v570_v13  ;;  %v3123_v13 = vld [vmem:[%s4337_s7 + $0x30] sm:$0xff] }
  0xae   : > { %v3643_v15 = vpack.c.bf16 %v3124_v14, %v3123_v13 }
 0x136   : > { %v569_v29 = vpop.xlane.xlu1 %568 }
 0x137   : > { %v573_v30 = vmul.f32 0.03125, %v569_v29 }
 0x139   : > { %v575_v31 = vadd.f32 1e-05, %v573_v30 }
 0x13a   : > { %v572_v32 = vpop.xlane.xlu1 %571 }
 0x13b   : > { %3763 = vrsqrt.f32 %v575_v31  ;;  %v574_v33 = vmul.f32 0.03125, %v572_v32 }
 0x13d   : > { %v576_v34 = vadd.f32 1e-05, %v574_v33 }
 0x13f   : > { %3765 = vrsqrt.f32 %v576_v34 }
 0x145   : > { %v3764_v35 = vpop.eup %3763 }
 0x146   : > { %v579_v37 = vmul.f32 %v3764_v35, %v563_v6  ;;  %v3107_v6 = vld [vmem:[%s4333_s3 + $0x30] sm:$0xff] }
 0x147   : > { %v3627_v9 = vpack.c.bf16 %v3108_v7, %v3107_v6 }
 0x148   : > { %v587_v39 = vmul.f32 %v3088_v36, %v579_v37 }
 0x149   : > { %v3766_v40 = vpop.eup %3765 }
 0x14a   : > { %v3969_v41 = vadd.f32 %v3089_v38, %v587_v39  ;;  %v580_v42 = vmul.f32 %v3766_v40, %v564_v10  ;;  %v3121_v10 = vld [vmem:[%s4337_s7 + $0x20] sm:$0xff] }
 0x14b   : > { %v3639_v12 = vpack.c.bf16 %v3122_v11, %v3121_v10 }
 0x14c   : > { %v588_v45 = vmul.f32 %v3088_v36, %v580_v42  ;;  %3359 = vmatprep.mubr.msk.f32.mxu1 %vm553_vm0, %v3969_v41  ;;  %3381 = vmatprep.mubr.msk.f32.mxu0 %vm553_vm0, %v3969_v41 }
 0x14e   : > { %v3981_v46 = vadd.f32 %v3089_v38, %v588_v45  ;;  %v3631_v45 = vpack.c.bf16 %v3114_v44, %v3113_v43 }
 0x150   : > { %3360 = vmatmul.mubr.msk.f32.vlgmr.msra.gmra.mrb[0].mxu1 %vm553_vm0, %v3981_v46  ;;  %3382 = vmatmul.mubr.msk.f32.vlgmr.msra.gmra.mrb[0].mxu0 %vm553_vm0, %v3981_v46 }
 0x151   : > { %3600 = vmatpush3.bf16.msra.mxu1 %v3597_v28  ;;  %3370 = vmatprep.mubr.msk.f32.mxu1 %vm553_vm0, %v3969_v41 }
 0x152   : > { %3602 = vmatprep.subr.bf16.mxu1 %v3601_v47 }
 0x155   : > { %3604 = vmatpush3.bf16.msra.mxu1 %v3601_v47 }
 0x158   : > { %3371 = vmatmul.mubr.msk.f32.vlgmr.msra.gmra.mrb[2].mxu1 %vm553_vm0, %v3981_v46 }
 0x223   : > { %v3361_v50 = vpop.f32.mrb[0].mxu1  ;;  %v3383_v51 = vpop.f32.mrb[0].mxu0 }
 0x224   : > { %v858_v52 = vadd.f32 %v3383_v51, %v3096_v48  ;;  %v680_v53 = vpop.f32.mrb[1].mxu1  ;;  %v852_v54 = vpop.f32.mrb[1].mxu0  ;;  %v686_v8 = vadd.f32 %v3361_v50, %v3090_v49  ;;  %v3115_v50 = vld [vmem:[%s4335_s5 + $0x30] sm:$0xff]  ;;  %v3116_v51 = vld [vmem:[%s4335_s5 + $0x38] sm:$0xff] }
 0x225   : > { %v681_v55 = vadd.f32 %v3090_v49, %v680_v53  ;;  %v853_v56 = vadd.f32 %v3096_v48, %v852_v54 }
 0x227   : > { %v3619_v57 = vpack.c.bf16 %v858_v52, %v853_v56  ;;  %3388 = vmatprep.mubr.msk.f32.mxu1 %vm861_vm1, %v681_v55  ;;  %v3635_v55 = vpack.c.bf16 %v3116_v51, %v3115_v50 }
 0x229   : > { %3620 = vmatprep.subr.bf16.mxu0 %v3619_v57 }
 0x22a   : > { %3622 = vmatpush3.bf16.msra.mxu0 %v3619_v57 }
 0x22b   : > { %v3372_v59 = vpop.f32.mrb[2].mxu1  ;;  %3632 = vmatprep.subr.bf16.mxu0 %v3631_v45 }
 0x22c   : > { %v772_v60 = vadd.f32 %v3372_v59, %v3093_v58  ;;  %v766_v61 = vpop.f32.mrb[3].mxu1  ;;  %v3118_v59 = vld [vmem:[%s4336_s6 + $0x1] ss:$0 sm:$0xff] }
 0x22d   : > { %v767_v2 = vadd.f32 %v3093_v58, %v766_v61 }
 0x22f   : > { %v3613_v4 = vpack.c.bf16 %v772_v60, %v767_v2 }
 0x231   : > { %3615 = vmatprep.subr.msk.bf16.mxu1 %vm4009_vm2, %v3613_v4 }
 0x232   : > { %3618 = vmatpush3.bf16.xpose.msk.msra.mxu1 %vm4009_vm2, %v3613_v4 }
 0x233   : > { %3624 = vmatprep.subr.bf16.mxu1 %v3623_v5 }
 0x239   : > { %3389 = vmatmul.mubr.msk.f32.vlgmr.msra.gmra.mrb[4].mxu1 %vm861_vm1, %v686_v8 }
 0x23a   : > { %3626 = vmatpush3.bf16.msra.mxu1 %v3623_v5  ;;  %3406 = vmatprep.mubr.msk.f32.mxu1 %vm553_vm0, %v3969_v41 }
 0x23b   : > { %3628 = vmatprep.subr.bf16.mxu1 %v3627_v9 }
 0x23e   : > { %3630 = vmatpush3.bf16.msra.mxu1 %v3627_v9 }
 0x23f   : > { %3640 = vmatprep.subr.bf16.mxu1 %v3639_v12 }
 0x241   : > { %3407 = vmatmul.mubr.msk.f32.vlgmr.msra.gmra.mrb[6].mxu1 %vm553_vm0, %v3981_v46 }
 0x242   : > { %3642 = vmatpush3.bf16.msra.mxu1 %v3639_v12  ;;  %3428 = vmatprep.mubr.msk.f32.mxu1 %vm553_vm0, %v3969_v41 }
 0x243   : > { %3644 = vmatprep.subr.bf16.mxu1 %v3643_v15 }
 0x246   : > { %3646 = vmatpush3.bf16.msra.mxu1 %v3643_v15 }
 0x249   : > { %3429 = vmatmul.mubr.msk.f32.vlgmr.msra.gmra.mrb[8].mxu1 %vm553_vm0, %v3981_v46 }
 0x30c   : > { %v3390_v16 = vpop.f32.mrb[4].mxu1 }
 0x30d   : > { %v950_v17 = vmul.f32 0.35355338, %v3390_v16  ;;  %v940_v18 = vpop.f32.mrb[5].mxu1 }
 0x30e   : > { %v949_v19 = vmul.f32 0.35355338, %v940_v18 }
 0x30f   : > { %v955_v20 = vsel %vm951_vm3, %v950_v17, -inf }
 0x310   : > { %956 = vmax.xlane.f32.xlu1 %v955_v20  ;;  %v952_v21 = vsel %vm951_vm3, %v949_v19, -inf  ;;  %v3140_v20 = vld [vmem:[%s4333_s3 + $0x40] sm:$0xff] }
 0x311   : > { %953 = vmax.xlane.f32.xlu0 %v952_v21  ;;  %v3141_v21 = vld [vmem:[%s4333_s3 + $0x48] sm:$0xff] }
 0x314   : > { %v3408_v23 = vpop.f32.mrb[6].mxu1 }
 0x315   : > { %v1141_v24 = vadd.f32 %v3408_v23, %v3110_v22  ;;  %v1135_v25 = vpop.f32.mrb[7].mxu1  ;;  %v3135_v23 = vld [vmem:[%s4339_s9 + $0x8] sm:$0xff] }
 0x316   : > { %v1136_v56 = vadd.f32 %v3110_v22, %v1135_v25  ;;  %v3657_v22 = vpack.c.bf16 %v3141_v21, %v3140_v20 }
 0x31c   : > { %v3430_v27 = vpop.f32.mrb[8].mxu1 }
 0x31d   : > { %v1317_v28 = vadd.f32 %v3430_v27, %v3126_v26  ;;  %v1311_v29 = vpop.f32.mrb[9].mxu1  ;;  %v3142_v27 = vld [vmem:[%s4333_s3 + $0x50] sm:$0xff] }
 0x31e   : > { %v1312_v30 = vadd.f32 %v3126_v26, %v1311_v29 }
 0x320   : > { %v3653_v31 = vpack.c.bf16 %v1317_v28, %v1312_v30  ;;  %v3143_v28 = vld [vmem:[%s4333_s3 + $0x58] sm:$0xff] }
 0x322   : > { %3654 = vmatprep.subr.bf16.mxu1 %v3653_v31 }
 0x323   : > { %3656 = vmatpush3.bf16.msra.mxu1 %v3653_v31 }
 0x324   : > { %3658 = vmatprep.subr.bf16.mxu1 %v3657_v22 }
 0x39d   : > { %v957_v32 = vpop.xlane.xlu1 %956 }
 0x39e   : > { %v959_v33 = vsub.f32 %v950_v17, %v957_v32  ;;  %v954_v34 = vpop.xlane.xlu0 %953  ;;  %v3661_v32 = vpack.c.bf16 %v3143_v28, %v3142_v27 }
 0x39f   : > { %v958_v35 = vsub.f32 %v949_v19, %v954_v34  ;;  %v3157_v34 = vld [vmem:[%s4337_s7 + $0x48] sm:$0xff] }
 0x3a0   : > { %v962_v36 = vmul.f32 1.442695, %v959_v33  ;;  %v3156_v33 = vld [vmem:[%s4337_s7 + $0x40] sm:$0xff] }
 0x3a1   : > { %v960_v37 = vmul.f32 1.442695, %v958_v35  ;;  %v3673_v35 = vpack.c.bf16 %v3157_v34, %v3156_v33 }
 0x3a2   : > { %3767 = vpow2.f32 %v962_v36  ;;  %v3158_v36 = vld [vmem:[%s4337_s7 + $0x50] sm:$0xff] }
 0x3a3   : > { %3769 = vpow2.f32 %v960_v37  ;;  %v3159_v37 = vld [vmem:[%s4337_s7 + $0x58] sm:$0xff] }
 0x3ac   : > { %v3768_v38 = vpop.eup %3767 }
 0x3ad   : > { %v3770_v39 = vpop.eup %3769  ;;  %v967_v40 = vsel %vm951_vm3, %v3768_v38, 0.0 }
 0x3ae   : > { %968 = vadd.xlane.f32.xlu1 %v967_v40  ;;  %v964_v42 = vsel %vm951_vm3, %v3770_v39, 0.0  ;;  %v3148_v40 = vld [vmem:[%s4335_s5 + $0x40] sm:$0xff] }
 0x3af   : > { %965 = vadd.xlane.f32.xlu0 %v964_v42  ;;  %v3149_v42 = vld [vmem:[%s4335_s5 + $0x48] sm:$0xff] }
 0x43b   : > { %v969_v47 = vpop.xlane.xlu1 %968 }
 0x43c   : > { %3771 = vrcp.f32 %v969_v47  ;;  %v966_v48 = vpop.xlane.xlu0 %965  ;;  %v3145_v47 = vld [vmem:[%s4334_s4 + $0x2] ss:$0 sm:$0xff] }
 0x43d   : > { %3773 = vrcp.f32 %v966_v48  ;;  %v3150_v48 = vld [vmem:[%s4335_s5 + $0x50] sm:$0xff] }
 0x446   : > { %v3772_v49 = vpop.eup %3771 }
 0x447   : > { %v3774_v52 = vpop.eup %3773  ;;  %v973_v54 = vmul.f32 %v3772_v49, %v3768_v38  ;;  %v3677_v38 = vpack.c.bf16 %v3159_v37, %v3158_v36  ;;  %v3151_v49 = vld [vmem:[%s4335_s5 + $0x58] sm:$0xff]  ;;  %v3190_v36 = vld [vmem:[%s4337_s7 + $0x68] sm:$0xff] }
 0x448   : > { %v972_v53 = vmul.f32 %v3774_v52, %v3770_v39  ;;  %v1055_v39 = vld [vmem:[%s4339_s9] sm:$0xff] }
 0x44a   : > { %3395 = vmatprep.mubr.msk.f32.mxu0 %vm951_vm3, %v972_v53  ;;  %v3669_v53 = vpack.c.bf16 %v3151_v49, %v3150_v48 }
 0x44b   : > { %3396 = vmatmul.mubr.msk.f32.vlgmr.msra.gmra.mrb[2].mxu0 %vm951_vm3, %v973_v54  ;;  %v3161_v54 = vld [vmem:[%s4338_s8 + $0x2] ss:$0 sm:$0xff] }
 0x44c   : > { %3634 = vmatpush3.bf16.msra.mxu0 %v3631_v45  ;;  %3417 = vmatprep.mubr.msk.f32.mxu0 %vm553_vm0, %v3969_v41  ;;  %v3665_v45 = vpack.c.bf16 %v3149_v42, %v3148_v40  ;;  %v3181_v42 = vld [vmem:[%s4335_s5 + $0x60] sm:$0xff] }
 0x44d   : > { %3636 = vmatprep.subr.bf16.mxu0 %v3635_v55 }
 0x450   : > { %3638 = vmatpush3.bf16.msra.mxu0 %v3635_v55 }
 0x453   : > { %3418 = vmatmul.mubr.msk.f32.vlgmr.msra.gmra.mrb[4].mxu0 %vm553_vm0, %v3981_v46 }
 0x454   : > { %3435 = vmatprep.mubr.msk.f32.mxu0 %vm861_vm1, %v1136_v56 }
 0x51e   : > { %v4073_v57 = vpop.f32.mrb[2].mxu0 }
 0x51f   : > { %v4075_v58 = vpop.f32.mrb[3].mxu0 }
 0x526   : > { %v3419_v60 = vpop.f32.mrb[4].mxu0 }
 0x527   : > { %v1229_v61 = vadd.f32 %v3419_v60, %v3118_v59  ;;  %v1223_v62 = vpop.f32.mrb[5].mxu0 }
 0x528   : > { %v1224_v63 = vadd.f32 %v3118_v59, %v1223_v62 }
 0x52a   : > { %v3647_v2 = vpack.c.bf16 %v1229_v61, %v1224_v63 }
 0x52c   : > { %3649 = vmatprep.subr.msk.bf16.mxu0 %vm4009_vm2, %v3647_v2 }
 0x52d   : > { %3652 = vmatpush3.bf16.xpose.msk.msra.mxu0 %vm4009_vm2, %v3647_v2 }
 0x52e   : > { %3445 = vmatprep.subr.mxu0 %v3135_v23 }
 0x534   : > { %3436 = vmatmul.mubr.msk.f32.vlgmr.msra.gmra.mrb[6].mxu0 %vm861_vm1, %v1141_v24 }
 0x535   : > { %3446 = vmatpush3.msra.mxu0 %v3135_v23  ;;  %v3174_v23 = vld [vmem:[%s4333_s3 + $0x68] sm:$0xff] }
 0x536   : > { %3450 = vmatprep.subr.mxu0 %v1055_v39 }
 0x607   : > { %v3437_v4 = vpop.f32.mrb[6].mxu0 }
 0x608   : > { %v1408_v5 = vmul.f32 0.35355338, %v3437_v4  ;;  %v1398_v6 = vpop.f32.mrb[7].mxu0 }
 0x609   : > { %v1407_v7 = vmul.f32 0.35355338, %v1398_v6 }
 0x60a   : > { %v1412_v8 = vsel %vm951_vm3, %v1408_v5, -inf }
 0x60b   : > { %1413 = vmax.xlane.f32.xlu1 %v1412_v8  ;;  %v1409_v9 = vsel %vm951_vm3, %v1407_v7, -inf }
 0x60c   : > { %1410 = vmax.xlane.f32.xlu0 %v1409_v9 }
 0x698   : > { %v1414_v10 = vpop.xlane.xlu1 %1413 }
 0x699   : > { %v1416_v11 = vsub.f32 %v1408_v5, %v1414_v10  ;;  %v1411_v12 = vpop.xlane.xlu0 %1410 }
 0x69a   : > { %v1415_v13 = vsub.f32 %v1407_v7, %v1411_v12 }
 0x69b   : > { %v1419_v14 = vmul.f32 1.442695, %v1416_v11 }
 0x69c   : > { %v1417_v15 = vmul.f32 1.442695, %v1415_v13 }
 0x69d   : > { %3775 = vpow2.f32 %v1419_v14 }
 0x69e   : > { %3777 = vpow2.f32 %v1417_v15 }
 0x6a7   : > { %v3776_v16 = vpop.eup %3775 }
 0x6a8   : > { %v3778_v17 = vpop.eup %3777  ;;  %v1424_v18 = vsel %vm951_vm3, %v3776_v16, 0.0 }
 0x6a9   : > { %1425 = vadd.xlane.f32.xlu1 %v1424_v18  ;;  %v1421_v19 = vsel %vm951_vm3, %v3778_v17, 0.0 }
 0x6aa   : > { %1422 = vadd.xlane.f32.xlu0 %v1421_v19 }
 0x736   : > { %v1426_v24 = vpop.xlane.xlu1 %1425 }
 0x737   : > { %3779 = vrcp.f32 %v1426_v24  ;;  %v1423_v25 = vpop.xlane.xlu0 %1422 }
 0x738   : > { %3781 = vrcp.f32 %v1423_v25  ;;  %v3170_v25 = vld [vmem:[%s4339_s9 + $0x10] sm:$0xff] }
 0x741   : > { %v3780_v26 = vpop.eup %3779 }
 0x742   : > { %v3782_v29 = vpop.eup %3781  ;;  %v1430_v31 = vmul.f32 %v3780_v26, %v3776_v16 }
 0x743   : > { %v1429_v30 = vmul.f32 %v3782_v29, %v3778_v17  ;;  %v3175_v29 = vld [vmem:[%s4333_s3 + $0x70] sm:$0xff] }
 0x745   : > { %3442 = vmatprep.mubr.msk.f32.mxu1 %vm951_vm3, %v1429_v30  ;;  %v3176_v30 = vld [vmem:[%s4333_s3 + $0x78] sm:$0xff] }
 0x746   : > { %3443 = vmatmul.mubr.msk.f32.vlgmr.msra.gmra.mrb[10].mxu1 %vm951_vm3, %v1430_v31  ;;  %v3695_v34 = vpack.c.bf16 %v3176_v30, %v3175_v29  ;;  %v3206_v30 = vld [vmem:[%s4340_s10] ss:$0 sm:$0xff] }
 0x747   : > { %3660 = vmatpush3.bf16.msra.mxu1 %v3657_v22  ;;  %3463 = vmatprep.mubr.msk.f32.mxu1 %vm553_vm0, %v3969_v41  ;;  %v3173_v22 = vld [vmem:[%s4333_s3 + $0x60] sm:$0xff] }
 0x748   : > { %3662 = vmatprep.subr.bf16.mxu1 %v3661_v32  ;;  %v3691_v24 = vpack.c.bf16 %v3174_v23, %v3173_v22 }
 0x74b   : > { %3664 = vmatpush3.bf16.msra.mxu1 %v3661_v32 }
 0x74c   : > { %3674 = vmatprep.subr.bf16.mxu1 %v3673_v35 }
 0x74e   : > { %3464 = vmatmul.mubr.msk.f32.vlgmr.msra.gmra.mrb[12].mxu1 %vm553_vm0, %v3981_v46 }
 0x74f   : > { %3676 = vmatpush3.bf16.msra.mxu1 %v3673_v35  ;;  %3485 = vmatprep.mubr.msk.f32.mxu1 %vm553_vm0, %v3969_v41  ;;  %v3189_v35 = vld [vmem:[%s4337_s7 + $0x60] sm:$0xff] }
 0x750   : > { %3678 = vmatprep.subr.bf16.mxu1 %v3677_v38  ;;  %v3707_v37 = vpack.c.bf16 %v3190_v36, %v3189_v35 }
 0x753   : > { %3680 = vmatpush3.bf16.msra.mxu1 %v3677_v38  ;;  %v3191_v38 = vld [vmem:[%s4337_s7 + $0x70] sm:$0xff] }
 0x756   : > { %3486 = vmatmul.mubr.msk.f32.vlgmr.msra.gmra.mrb[14].mxu1 %vm553_vm0, %v3981_v46 }
 0x819   : > { %v3444_v43 = vpop.f32.mrb[10].mxu1 }
 0x81a   : > { %v1503_v44 = vpop.f32.mrb[11].mxu1 }
 0x81b   : > { %3447 = vmatprep.mubr.msk.f32.mxu0 %vm861_vm1, %v1503_v44 }
 0x81c   : > { %3448 = vmatmul.mubr.msk.f32.vlgmr.msra.gmra.mrb[8].mxu0 %vm861_vm1, %v3444_v43  ;;  %v3182_v43 = vld [vmem:[%s4335_s5 + $0x68] sm:$0xff] }
 0x81d   : > { %3451 = vmatpush3.msra.mxu0 %v1055_v39  ;;  %3452 = vmatprep.mubr.msk.f32.mxu0 %vm861_vm1, %v4075_v58  ;;  %v3192_v39 = vld [vmem:[%s4337_s7 + $0x78] sm:$0xff]  ;;  %v3699_v44 = vpack.c.bf16 %v3182_v43, %v3181_v42 }
 0x81e   : > { %3666 = vmatprep.subr.bf16.mxu0 %v3665_v45  ;;  %v3711_v40 = vpack.c.bf16 %v3192_v39, %v3191_v38 }
 0x821   : > { %v3465_v50 = vpop.f32.mrb[12].mxu1 }
 0x822   : > { %v1761_v51 = vadd.f32 %v3465_v50, %v3145_v47  ;;  %v1755_v52 = vpop.f32.mrb[13].mxu1 }
 0x823   : > { %v1756_v59 = vadd.f32 %v3145_v47, %v1755_v52  ;;  %v3184_v47 = vld [vmem:[%s4335_s5 + $0x78] sm:$0xff] }
 0x824   : > { %3453 = vmatmul.mubr.msk.f32.vlgmr.msra.gmra.mrb[8].mxu0 %vm861_vm1, %v4073_v57  ;;  %v3153_v57 = vld [vmem:[%s4336_s6 + $0x2] ss:$0 sm:$0xff] }
 0x825   : > { %3668 = vmatpush3.bf16.msra.mxu0 %v3665_v45  ;;  %3474 = vmatprep.mubr.msk.f32.mxu0 %vm553_vm0, %v3969_v41  ;;  %v3183_v45 = vld [vmem:[%s4335_s5 + $0x70] sm:$0xff] }
 0x826   : > { %3670 = vmatprep.subr.bf16.mxu0 %v3669_v53  ;;  %v3703_v50 = vpack.c.bf16 %v3184_v47, %v3183_v45 }
 0x829   : > { %3672 = vmatpush3.bf16.msra.mxu0 %v3669_v53  ;;  %v3487_v55 = vpop.f32.mrb[14].mxu1 }
 0x82a   : > { %v1937_v56 = vadd.f32 %v3487_v55, %v3161_v54  ;;  %v1931_v58 = vpop.f32.mrb[15].mxu1 }
 0x82b   : > { %v1932_v60 = vadd.f32 %v3161_v54, %v1931_v58 }
 0x82c   : > { %3475 = vmatmul.mubr.msk.f32.vlgmr.msra.gmra.mrb[10].mxu0 %vm553_vm0, %v3981_v46 }
 0x82d   : > { %v3687_v61 = vpack.c.bf16 %v1937_v56, %v1932_v60  ;;  %3492 = vmatprep.mubr.msk.f32.mxu0 %vm861_vm1, %v1756_v59  ;;  %v3194_v56 = vld [vmem:[%s4338_s8 + $0x3] ss:$0 sm:$0xff] }
 0x82f   : > { %3688 = vmatprep.subr.bf16.mxu1 %v3687_v61 }
 0x830   : > { %3690 = vmatpush3.bf16.msra.mxu1 %v3687_v61 }
 0x831   : > { %3692 = vmatprep.subr.bf16.mxu1 %v3691_v24 }
 0x8ff   : > { %v3476_v62 = vpop.f32.mrb[10].mxu0 }
 0x900   : > { %v1849_v63 = vadd.f32 %v3476_v62, %v3153_v57  ;;  %v1843_v2 = vpop.f32.mrb[11].mxu0 }
 0x901   : > { %v1844_v4 = vadd.f32 %v3153_v57, %v1843_v2  ;;  %v3186_v57 = vld [vmem:[%s4336_s6 + $0x3] ss:$0 sm:$0xff] }
 0x903   : > { %v3681_v5 = vpack.c.bf16 %v1849_v63, %v1844_v4 }
 0x905   : > { %3683 = vmatprep.subr.msk.bf16.mxu0 %vm4009_vm2, %v3681_v5 }
 0x906   : > { %3686 = vmatpush3.bf16.xpose.msk.msra.mxu0 %vm4009_vm2, %v3681_v5 }
 0x907   : > { %3502 = vmatprep.subr.mxu0 %v3170_v25 }
 0x90d   : > { %3493 = vmatmul.mubr.msk.f32.vlgmr.msra.gmra.mrb[12].mxu0 %vm861_vm1, %v1761_v51  ;;  %v3178_v51 = vld [vmem:[%s4334_s4 + $0x3] ss:$0 sm:$0xff] }
 0x90e   : > { %3503 = vmatpush3.msra.mxu0 %v3170_v25 }
 0x90f   : > { %3700 = vmatprep.subr.bf16.mxu0 %v3699_v44 }
 0x9e0   : > { %v3494_v6 = vpop.f32.mrb[12].mxu0 }
 0x9e1   : > { %v2028_v7 = vmul.f32 0.35355338, %v3494_v6  ;;  %v2018_v8 = vpop.f32.mrb[13].mxu0 }
 0x9e2   : > { %v2027_v9 = vmul.f32 0.35355338, %v2018_v8 }
 0x9e3   : > { %v2032_v10 = vsel %vm951_vm3, %v2028_v7, -inf }
 0x9e4   : > { %2033 = vmax.xlane.f32.xlu1 %v2032_v10  ;;  %v2029_v11 = vsel %vm951_vm3, %v2027_v9, -inf }
 0x9e5   : > { %2030 = vmax.xlane.f32.xlu0 %v2029_v11 }
 0xa71   : > { %v2034_v12 = vpop.xlane.xlu1 %2033 }
 0xa72   : > { %v2036_v13 = vsub.f32 %v2028_v7, %v2034_v12  ;;  %v2031_v14 = vpop.xlane.xlu0 %2030 }
 0xa73   : > { %v2035_v15 = vsub.f32 %v2027_v9, %v2031_v14 }
 0xa74   : > { %v2039_v16 = vmul.f32 1.442695, %v2036_v13 }
 0xa75   : > { %v2037_v17 = vmul.f32 1.442695, %v2035_v15 }
 0xa76   : > { %3783 = vpow2.f32 %v2039_v16 }
 0xa77   : > { %3785 = vpow2.f32 %v2037_v17 }
 0xa80   : > { %v3784_v18 = vpop.eup %3783 }
 0xa81   : > { %v3786_v19 = vpop.eup %3785  ;;  %v2044_v20 = vsel %vm951_vm3, %v3784_v18, 0.0 }
 0xa82   : > { %2045 = vadd.xlane.f32.xlu1 %v2044_v20  ;;  %v2041_v21 = vsel %vm951_vm3, %v3786_v19, 0.0  ;;  %v3203_v20 = vld [vmem:[%s4339_s9 + $0x18] sm:$0xff] }
 0xa83   : > { %2042 = vadd.xlane.f32.xlu0 %v2041_v21 }
 0xb0f   : > { %v2046_v26 = vpop.xlane.xlu1 %2045 }
 0xb10   : > { %3787 = vrcp.f32 %v2046_v26  ;;  %v2043_v27 = vpop.xlane.xlu0 %2042 }
 0xb11   : > { %3789 = vrcp.f32 %v2043_v27 }
 0xb1a   : > { %v3788_v28 = vpop.eup %3787 }
 0xb1b   : > { %v3790_v31 = vpop.eup %3789  ;;  %v2050_v33 = vmul.f32 %v3788_v28, %v3784_v18 }
 0xb1c   : > { %v2049_v32 = vmul.f32 %v3790_v31, %v3786_v19 }
 0xb1e   : > { %3499 = vmatprep.mubr.msk.f32.mxu1 %vm951_vm3, %v2049_v32 }
 0xb1f   : > { %3500 = vmatmul.mubr.msk.f32.vlgmr.msra.gmra.mrb[16].mxu1 %vm951_vm3, %v2050_v33 }
 0xb20   : > { %3694 = vmatpush3.bf16.msra.mxu1 %v3691_v24  ;;  %3515 = vmatprep.mubr.msk.f32.mxu1 %vm553_vm0, %v3969_v41 }
 0xb21   : > { %3696 = vmatprep.subr.bf16.mxu1 %v3695_v34 }
 0xb24   : > { %3698 = vmatpush3.bf16.msra.mxu1 %v3695_v34 }
 0xb25   : > { %3708 = vmatprep.subr.bf16.mxu1 %v3707_v37 }
 0xb27   : > { %3516 = vmatmul.mubr.msk.f32.vlgmr.msra.gmra.mrb[18].mxu1 %vm553_vm0, %v3981_v46 }
 0xb28   : > { %3710 = vmatpush3.bf16.msra.mxu1 %v3707_v37  ;;  %3537 = vmatprep.mubr.msk.f32.mxu1 %vm553_vm0, %v3969_v41 }
 0xb29   : > { %3712 = vmatprep.subr.bf16.mxu1 %v3711_v40 }
 0xb2c   : > { %3714 = vmatpush3.bf16.msra.mxu1 %v3711_v40 }
 0xb2f   : > { %3538 = vmatmul.mubr.msk.f32.vlgmr.msra.gmra.mrb[20].mxu1 %vm553_vm0, %v3981_v46 }
 0xbf2   : > { %v3501_v48 = vpop.f32.mrb[16].mxu1 }
 0xbf3   : > { %v2123_v49 = vpop.f32.mrb[17].mxu1 }
 0xbf4   : > { %3504 = vmatprep.mubr.msk.f32.mxu0 %vm861_vm1, %v2123_v49  ;;  %v2814_v49 = vld [vmem:[%s4343_s13 + $0x8] sm:$0xff] }
 0xbf5   : > { %3505 = vmatmul.mubr.msk.f32.vlgmr.msra.gmra.mrb[8].mxu0 %vm861_vm1, %v3501_v48  ;;  %v2813_v48 = vld [vmem:[%s4343_s13] sm:$0xff] }
 0xbf6   : > { %3702 = vmatpush3.bf16.msra.mxu0 %v3699_v44  ;;  %3526 = vmatprep.mubr.msk.f32.mxu0 %vm553_vm0, %v3969_v41 }
 0xbf7   : > { %3704 = vmatprep.subr.bf16.mxu0 %v3703_v50 }
 0xbfa   : > { %v3517_v52 = vpop.f32.mrb[18].mxu1  ;;  %3706 = vmatpush3.bf16.msra.mxu0 %v3703_v50  ;;  %v3725_v50 = vpack.c.bf16 %v2814_v49, %v2813_v48 }
 0xbfb   : > { %v2302_v53 = vadd.f32 %v3517_v52, %v3178_v51  ;;  %v2296_v54 = vpop.f32.mrb[19].mxu1  ;;  %v2816_v52 = vld [vmem:[%s4343_s13 + $0x18] sm:$0xff] }
 0xbfc   : > { %v2297_v55 = vadd.f32 %v3178_v51, %v2296_v54  ;;  %v2815_v51 = vld [vmem:[%s4343_s13 + $0x10] sm:$0xff] }
 0xbfd   : > { %3527 = vmatmul.mubr.msk.f32.vlgmr.msra.gmra.mrb[14].mxu0 %vm553_vm0, %v3981_v46 }
 0xbfe   : > { %3544 = vmatprep.mubr.msk.f32.mxu0 %vm861_vm1, %v2297_v55 }
 0xc02   : > { %v3539_v41 = vpop.f32.mrb[20].mxu1 }
 0xc03   : > { %v2478_v58 = vadd.f32 %v3539_v41, %v3194_v56  ;;  %v2472_v59 = vpop.f32.mrb[21].mxu1 }
 0xc04   : > { %v2473_v60 = vadd.f32 %v3194_v56, %v2472_v59 }
 0xc06   : > { %v3721_v61 = vpack.c.bf16 %v2478_v58, %v2473_v60 }
 0xc08   : > { %3722 = vmatprep.subr.bf16.mxu1 %v3721_v61 }
 0xc09   : > { %3724 = vmatpush3.bf16.msra.mxu1 %v3721_v61  ;;  %v3207_v61 = vld [vmem:[%s4341_s11] ss:$0 sm:$0xff] }
 0xc0a   : > { %3726 = vmatprep.subr.bf16.mxu1 %v3725_v50 }
 0xcd0   : > { %v3528_v62 = vpop.f32.mrb[14].mxu0 }
 0xcd1   : > { %v2390_v63 = vadd.f32 %v3528_v62, %v3186_v57  ;;  %v2384_v46 = vpop.f32.mrb[15].mxu0 }
 0xcd2   : > { %v2385_v2 = vadd.f32 %v3186_v57, %v2384_v46  ;;  %v3208_v46 = vld [vmem:[%s4342_s12] ss:$0 sm:$0xff] }
 0xcd4   : > { %v3715_v4 = vpack.c.bf16 %v2390_v63, %v2385_v2 }
 0xcd6   : > { %3717 = vmatprep.subr.msk.bf16.mxu0 %vm4009_vm2, %v3715_v4 }
 0xcd7   : > { %3720 = vmatpush3.bf16.xpose.msk.msra.mxu0 %vm4009_vm2, %v3715_v4 }
 0xcd8   : > { %3554 = vmatprep.subr.mxu0 %v3203_v20 }
 0xcde   : > { %3545 = vmatmul.mubr.msk.f32.vlgmr.msra.gmra.mrb[16].mxu0 %vm861_vm1, %v2302_v53  ;;  %v3729_v53 = vpack.c.bf16 %v2816_v52, %v2815_v51 }
 0xcdf   : > { %3555 = vmatpush3.msra.mxu0 %v3203_v20 }
 0xdb1   : > { %v3546_v5 = vpop.f32.mrb[16].mxu0 }
 0xdb2   : > { %v2569_v6 = vmul.f32 0.35355338, %v3546_v5  ;;  %v2559_v7 = vpop.f32.mrb[17].mxu0 }
 0xdb3   : > { %v2568_v8 = vmul.f32 0.35355338, %v2559_v7  ;;  %v2923_v7 = vld [vmem:[%s4345_s15] sm:$0xff] }
 0xdb4   : > { %v2573_v9 = vsel %vm951_vm3, %v2569_v6, -inf }
 0xdb5   : > { %2574 = vmax.xlane.f32.xlu1 %v2573_v9  ;;  %v2570_v10 = vsel %vm951_vm3, %v2568_v8, -inf }
 0xdb6   : > { %2571 = vmax.xlane.f32.xlu0 %v2570_v10  ;;  %v2925_v10 = vld [vmem:[%s4345_s15 + $0x10] sm:$0xff] }
 0xe42   : > { %v2575_v11 = vpop.xlane.xlu1 %2574 }
 0xe43   : > { %v2577_v12 = vsub.f32 %v2569_v6, %v2575_v11  ;;  %v2572_v13 = vpop.xlane.xlu0 %2571  ;;  %v2926_v11 = vld [vmem:[%s4345_s15 + $0x18] sm:$0xff] }
 0xe44   : > { %v2576_v14 = vsub.f32 %v2568_v8, %v2572_v13  ;;  %v2924_v8 = vld [vmem:[%s4345_s15 + $0x8] sm:$0xff]  ;;  %v2927_v13 = vld [vmem:[%s4345_s15 + $0x20] sm:$0xff] }
 0xe45   : > { %v2580_v15 = vmul.f32 1.442695, %v2577_v12  ;;  %v3733_v9 = vpack.c.bf16 %v2924_v8, %v2923_v7  ;;  %v3737_v12 = vpack.c.bf16 %v2926_v11, %v2925_v10 }
 0xe46   : > { %v2578_v16 = vmul.f32 1.442695, %v2576_v14  ;;  %v2928_v14 = vld [vmem:[%s4345_s15 + $0x28] sm:$0xff] }
 0xe47   : > { %3791 = vpow2.f32 %v2580_v15  ;;  %3734 = vmatprep.subr.bf16.mxu0 %v3733_v9  ;;  %v3741_v15 = vpack.c.bf16 %v2928_v14, %v2927_v13 }
 0xe48   : > { %3793 = vpow2.f32 %v2578_v16  ;;  %v2929_v16 = vld [vmem:[%s4345_s15 + $0x30] sm:$0xff] }
 0xe51   : > { %v3792_v3 = vpop.eup %3791 }
 0xe52   : > { %v3794_v17 = vpop.eup %3793  ;;  %v2585_v18 = vsel %vm951_vm3, %v3792_v3, 0.0 }
 0xe53   : > { %2586 = vadd.xlane.f32.xlu1 %v2585_v18  ;;  %v2582_v19 = vsel %vm951_vm3, %v3794_v17, 0.0  ;;  %v3209_v18 = vld [vmem:[%s4344_s14] ss:$0 sm:$0xff] }
 0xe54   : > { %2583 = vadd.xlane.f32.xlu0 %v2582_v19 }
 0xee0   : > { %v2587_v21 = vpop.xlane.xlu1 %2586 }
 0xee1   : > { %3795 = vrcp.f32 %v2587_v21  ;;  %v2584_v22 = vpop.xlane.xlu0 %2583 }
 0xee2   : > { %3797 = vrcp.f32 %v2584_v22 }
 0xeeb   : > { %v3796_v23 = vpop.eup %3795 }
 0xeec   : > { %v3798_v24 = vpop.eup %3797  ;;  %v2591_v26 = vmul.f32 %v3796_v23, %v3792_v3  ;;  %v2930_v3 = vld [vmem:[%s4345_s15 + $0x38] sm:$0xff] }
 0xeed   : > { %v2590_v25 = vmul.f32 %v3798_v24, %v3794_v17  ;;  %v3745_v17 = vpack.c.bf16 %v2930_v3, %v2929_v16 }
 0xeef   : > { %3551 = vmatprep.mubr.msk.f32.mxu1 %vm951_vm3, %v2590_v25 }
 0xef0   : > { %3552 = vmatmul.mubr.msk.f32.vlgmr.msra.gmra.mrb[22].mxu1 %vm951_vm3, %v2591_v26 }
 0xef1   : > { %3728 = vmatpush3.bf16.msra.mxu1 %v3725_v50 }
 0xef2   : > { %3730 = vmatprep.subr.bf16.mxu1 %v3729_v53 }
 0xef5   : > { %3732 = vmatpush3.bf16.msra.mxu1 %v3729_v53 }
 0xfc3   : > { %v3553_v27 = vpop.f32.mrb[22].mxu1 }
 0xfc4   : > { %v2664_v28 = vpop.f32.mrb[23].mxu1 }
 0xfc5   : > { %3556 = vmatprep.mubr.msk.f32.mxu0 %vm861_vm1, %v2664_v28 }
 0xfc6   : > { %3557 = vmatmul.mubr.msk.f32.vlgmr.msra.gmra.mrb[8].mxu0 %vm861_vm1, %v3553_v27 }
 0xfc7   : > { %3736 = vmatpush3.bf16.msra.mxu0 %v3733_v9 }
 0xfc8   : > { %3738 = vmatprep.subr.bf16.mxu0 %v3737_v12 }
 0xfcb   : > { %3740 = vmatpush3.bf16.msra.mxu0 %v3737_v12 }
 0xfcc   : > { %3742 = vmatprep.subr.bf16.mxu0 %v3741_v15 }
 0xfcf   : > { %3744 = vmatpush3.bf16.msra.mxu0 %v3741_v15 }
 0xfd0   : > { %3746 = vmatprep.subr.bf16.mxu0 %v3745_v17 }
 0xfd3   : > { %3748 = vmatpush3.bf16.msra.mxu0 %v3745_v17 }
0x1099   : > { %v3558_v29 = vpop.f32.mrb[8].mxu0 }
0x109a   : > { %v2759_v31 = vadd.f32 %v3558_v29, %v3923_v1  ;;  %v2747_v32 = vpop.f32.mrb[9].mxu0 }
0x109b   : > { %v2758_v33 = vadd.f32 %v2747_v32, %v3921_v0 }
0x109c   : > { %v4256_v34 = vadd.f32 %v3206_v30, %v2759_v31 }
0x109d   : > { %v4258_v35 = vadd.f32 %v3206_v30, %v2758_v33 }
0x109e   : > { %v2774_v36 = vsel %vm553_vm0, %v4256_v34, 0.0 }
0x109f   : > { %2775 = vadd.xlane.f32.xlu1 %v2774_v36  ;;  %v2771_v37 = vsel %vm553_vm0, %v4258_v35, 0.0 }
0x10a0   : > { %2772 = vadd.xlane.f32.xlu0 %v2771_v37 }
0x112c   : > { %v2776_v38 = vpop.xlane.xlu1 %2775 }
0x112d   : > { %v2778_v39 = vmul.f32 0.03125, %v2776_v38  ;;  %v2773_v40 = vpop.xlane.xlu0 %2772 }
0x112e   : > { %v2777_v42 = vmul.f32 0.03125, %v2773_v40 }
0x112f   : > { %v2780_v1 = vsub.f32 %v4256_v34, %v2778_v39 }
0x1130   : > { %v2779_v0 = vsub.f32 %v4258_v35, %v2777_v42 }
0x1131   : > { %v2782_v43 = vmul.f32 %v2780_v1, %v2780_v1 }
0x1132   : > { %v2781_v44 = vmul.f32 %v2779_v0, %v2779_v0 }
0x1133   : > { %v2786_v45 = vsel %vm553_vm0, %v2782_v43, 0.0 }
0x1134   : > { %2787 = vadd.xlane.f32.xlu1 %v2786_v45  ;;  %v2783_v47 = vsel %vm553_vm0, %v2781_v44, 0.0 }
0x1135   : > { %2784 = vadd.xlane.f32.xlu0 %v2783_v47 }
0x11c1   : > { %v2788_v54 = vpop.xlane.xlu1 %2787 }
0x11c2   : > { %v2790_v55 = vmul.f32 0.03125, %v2788_v54  ;;  %v2785_v56 = vpop.xlane.xlu0 %2784 }
0x11c3   : > { %v2789_v41 = vmul.f32 0.03125, %v2785_v56 }
0x11c4   : > { %v2792_v58 = vadd.f32 1e-05, %v2790_v55 }
0x11c5   : > { %v2791_v59 = vadd.f32 1e-05, %v2789_v41 }
0x11c6   : > { %3799 = vrsqrt.f32 %v2792_v58 }
0x11c7   : > { %3801 = vrsqrt.f32 %v2791_v59 }
0x11d0   : > { %v3800_v60 = vpop.eup %3799 }
0x11d1   : > { %v3802_v57 = vpop.eup %3801  ;;  %v2796_v62 = vmul.f32 %v3800_v60, %v2780_v1 }
0x11d2   : > { %v2795_v63 = vmul.f32 %v3802_v57, %v2779_v0  ;;  %v3212_v0 = vld [vmem:[%s4346_s16] ss:$0 sm:$0xff] }
0x11d3   : > { %v2804_v2 = vmul.f32 %v3207_v61, %v2796_v62 }
0x11d4   : > { %v2803_v4 = vmul.f32 %v3207_v61, %v2795_v63 }
0x11d5   : > { %v2812_v6 = vadd.f32 %v3208_v46, %v2804_v2 }
0x11d6   : > { %v2811_v5 = vadd.f32 %v3208_v46, %v2803_v4 }
0x11d8   : > { %3567 = vmatprep.mubr.msk.f32.mxu1 %vm553_vm0, %v2811_v5 }
0x11d9   : > { %3568 = vmatmul.mubr.msk.f32.vlgmr.msra.gmra.mrb[24].mxu1 %vm553_vm0, %v2812_v6 }
0x12ac   : > { %v3569_v19 = vpop.f32.mrb[24].mxu1 }
0x12ad   : > { %v2902_v20 = vadd.f32 %v3569_v19, %v3209_v18  ;;  %v2896_v21 = vpop.f32.mrb[25].mxu1 }
0x12ae   : > { %v2897_v22 = vadd.f32 %v3209_v18, %v2896_v21 }
0x12af   : > { %v2906_v23 = vmul.f32 %v2902_v20, %v2902_v20 }
0x12b0   : > { %v2905_v24 = vmul.f32 %v2897_v22, %v2897_v22 }
0x12b1   : > { %v2908_v25 = vmul.f32 %v2906_v23, %v2902_v20 }
0x12b2   : > { %v2907_v26 = vmul.f32 %v2905_v24, %v2897_v22 }
0x12b3   : > { %v2910_v27 = vmul.f32 0.044715, %v2908_v25 }
0x12b4   : > { %v2909_v28 = vmul.f32 0.044715, %v2907_v26 }
0x12b5   : > { %v2912_v29 = vadd.f32 %v2910_v27, %v2902_v20 }
0x12b6   : > { %v2911_v30 = vadd.f32 %v2909_v28, %v2897_v22 }
0x12b7   : > { %v2914_v31 = vmul.f32 0.7978846, %v2912_v29 }
0x12b8   : > { %v2913_v32 = vmul.f32 0.7978846, %v2911_v30 }
0x12b9   : > { %3803 = vtanh.f32 %v2914_v31 }
0x12ba   : > { %3805 = vtanh.f32 %v2913_v32 }
0x12c3   : > { %v3804_v33 = vpop.eup %3803 }
0x12c4   : > { %v3806_v36 = vpop.eup %3805  ;;  %v2918_v37 = vadd.f32 1.0, %v3804_v33 }
0x12c5   : > { %v2917_v38 = vadd.f32 1.0, %v3806_v36 }
0x12c6   : > { %v2920_v39 = vmul.f32 0.5, %v2918_v37 }
0x12c7   : > { %v2919_v40 = vmul.f32 0.5, %v2917_v38 }
0x12c8   : > { %v2922_v1 = vmul.f32 %v2920_v39, %v2902_v20 }
0x12c9   : > { %v2921_v42 = vmul.f32 %v2919_v40, %v2897_v22 }
0x12cb   : > { %3586 = vmatprep.mubr.msk.f32.mxu0 %vm2938_vm4, %v2921_v42 }
0x12cc   : > { %3587 = vmatmul.mubr.msk.f32.vlgmr.msra.gmra.mrb[18].mxu0 %vm2938_vm4, %v2922_v1 }
0x139f   : > { %v3588_v43 = vpop.f32.mrb[18].mxu0 }
0x13a0   : > { %v3017_v44 = vadd.f32 %v3588_v43, %v3212_v0  ;;  %v3011_v45 = vpop.f32.mrb[19].mxu0 }
0x13a1   : > { %v3012_v47 = vadd.f32 %v3212_v0, %v3011_v45 }
0x13a2   : > { %v3021_v48 = vadd.f32 %v3017_v44, %v4256_v34 }
0x13a3   : > { %v3020_v49 = vadd.f32 %v3012_v47, %v4258_v35 }
0x13a4   : > { %3023 = vst.msk [vmem:[%s548_s18 + $0x8] sm:$0xff] %vm553_vm0, %v3021_v48 }
0x13a5   : > { %3022 = vst.msk [vmem:[%s548_s18] sm:$0xff] %vm553_vm0, %v3020_v49 }
0x13a6 PF: > { %s27_s24 = sadd.s32 1, %s3813_s24  }
0x13a7   : > { %p24_p4 = scmp.ge.s32.totalorder %s27_s24, 4  }
0x13a9   :  { %26 = sbr.rel (!%p24_p4) target bundleno = 3 (0x3), region = 139 }

</bundles_post_ra>
